<compile_context>
chip_gen: v7x
topology: tpu7x:2x2x1
jax: 0.10.0
libtpu: 0.0.40
codegen_flags: <defaults>
</compile_context>

<pallas_src>
import functools

import jax
import jax.numpy as jnp
from jax.experimental import pallas as pl
from jax.experimental.pallas import tpu as pltpu

_VMEM_LIMIT = 32 * 1024 * 1024


# ----------------------------------------------------------------------------
# Pallas kernel 1: fused 3x3 conv + bias + ReLU (9 shifted matmuls, no im2col
# materialized in HBM).  One grid step = one image.
# ----------------------------------------------------------------------------
def _conv3x3_relu_kernel(x_ref, w_ref, b_ref, o_ref, *, H, W):
    # x_ref: (1, H+2, W+2, Cin) padded activation, w_ref: (9, Cin, Cout) bf16,
    # b_ref: (1, Cout) f32, o_ref: (1, H*W, Cout) f32
    xp = x_ref[0]                                # (H+2, W+2, Cin) f32
    cout = o_ref.shape[-1]
    acc = jnp.zeros((H * W, cout), jnp.float32)
    for dy in range(3):
        for dx in range(3):
            xs = xp[dy:dy + H, dx:dx + W, :].reshape(H * W, -1)
            acc = acc + jnp.dot(xs.astype(jnp.bfloat16),
                                w_ref[dy * 3 + dx],
                                preferred_element_type=jnp.float32)
    acc = acc + b_ref[...]
    o_ref[0] = jnp.maximum(acc, 0.0).astype(o_ref.dtype)


def conv3x3_relu(x, p):
    # x: (B, H, W, Cin) f32; p["w"]: (9, Cin, Cout) bf16; p["b"]: (1, Cout) f32
    B, H, W, Cin = x.shape
    Cout = p["w"].shape[-1]
    xp = jnp.pad(x, ((0, 0), (1, 1), (1, 1), (0, 0)))   # zero pad (padding=1)
    out = pl.pallas_call(
        functools.partial(_conv3x3_relu_kernel, H=H, W=W),
        out_shape=jax.ShapeDtypeStruct((B, H * W, Cout), jnp.float32),
        grid=(B,),
        in_specs=[
            pl.BlockSpec((1, H + 2, W + 2, Cin), lambda b: (b, 0, 0, 0)),
            pl.BlockSpec((9, Cin, Cout), lambda b: (0, 0, 0)),
            pl.BlockSpec((1, Cout), lambda b: (0, 0)),
        ],
        out_specs=pl.BlockSpec((1, H * W, Cout), lambda b: (b, 0, 0)),
        compiler_params=pltpu.CompilerParams(
            dimension_semantics=("parallel",),
            vmem_limit_bytes=_VMEM_LIMIT),
    )(xp, p["w"], p["b"])
    return out.reshape(B, H, W, Cout)


# ----------------------------------------------------------------------------
# Pallas kernel 2: contextual loss.  Grid = (batch, query tiles).  Per-step
# tile is (tq, P); column-max is accumulated across query tiles in VMEM
# scratch, finalized (mean, -log) at the last query tile.
# ----------------------------------------------------------------------------
def _cx_kernel(mu_ref, x_ref, y_ref, o_ref, colmax_ref, *, h, eps):
    q = pl.program_id(1)
    nq = pl.num_programs(1)

    mu = mu_ref[...]                                  # (1, C)
    x = x_ref[0] - mu                                 # (tq, C) centered inputs
    y = y_ref[0] - mu                                 # (P, C) centered targets

    # F.normalize(p=2, dim=channel), torch default eps=1e-12 on the norm.
    xn = x * jax.lax.rsqrt(
        jnp.maximum(jnp.sum(x * x, axis=1, keepdims=True), 1e-24))
    yn = y * jax.lax.rsqrt(
        jnp.maximum(jnp.sum(y * y, axis=1, keepdims=True), 1e-24))

    # Cosine similarity: contract the channel axis of both operands (no HBM
    # transpose needed).  Kept in f32: dist_min+eps (eps=1e-5) is too sensitive
    # to bf16-level error in (1 - cos).
    sim = jax.lax.dot_general(xn, yn, (((1,), (1,)), ((), ())),
                              preferred_element_type=jnp.float32)   # (tq, P)
    dist = 1.0 - sim

    dist_min = jnp.min(dist, axis=1, keepdims=True)                 # (tq, 1)
    dist_tilde = dist * pl.reciprocal(dist_min + eps, approx=True)
    w = jnp.exp((1.0 - dist_tilde) * (1.0 / h))
    cx_ij = w * pl.reciprocal(jnp.sum(w, axis=1, keepdims=True), approx=True)
    tile_max = jnp.max(cx_ij, axis=0, keepdims=True)                # (1, P)

    @pl.when(q == 0)
    def _():
        colmax_ref[...] = jnp.full_like(colmax_ref, -jnp.inf)

    colmax_ref[...] = jnp.maximum(colmax_ref[...], tile_max)

    @pl.when(q == nq - 1)
    def _():
        cx_b = jnp.mean(colmax_ref[...], axis=1, keepdims=True)     # (1, 1)
        val = -jnp.log(cx_b + eps)
        o_ref[...] = jnp.broadcast_to(
            val.reshape(1, 1, 1), o_ref.shape).astype(o_ref.dtype)


def contextual_loss_pallas(x, y, y_mu, *, h=0.5, eps=1e-5):
    # x, y: (N, P, C) features (NHWC flattened, no transpose); y_mu: (C,)
    # TODO(synk): for very large P, stream the target axis too (two-pass
    # dist_min / renorm) instead of holding the full (tq, P) tile.
    N, P, C = x.shape
    tq = 256 if P % 256 == 0 else P
    nq = P // tq
    mu = y_mu.reshape(1, C)

    per_batch = pl.pallas_call(
        functools.partial(_cx_kernel, h=h, eps=eps),
        out_shape=jax.ShapeDtypeStruct((N, 1, 128), jnp.float32),
        grid=(N, nq),
        in_specs=[
            pl.BlockSpec((1, C), lambda b, q: (0, 0)),
            pl.BlockSpec((1, tq, C), lambda b, q: (b, q, 0)),
            pl.BlockSpec((1, P, C), lambda b, q: (b, 0, 0)),
        ],
        out_specs=pl.BlockSpec((1, 1, 128), lambda b, q: (b, 0, 0)),
        scratch_shapes=[pltpu.VMEM((1, P), jnp.float32)],
        compiler_params=pltpu.CompilerParams(
            dimension_semantics=("parallel", "arbitrary"),
            vmem_limit_bytes=_VMEM_LIMIT),
    )(mu, x, y)

    return jnp.mean(per_batch[:, 0, 0])


# ----------------------------------------------------------------------------
# VGG19 features up to relu2_1 (synthetic deterministic weights)
# ----------------------------------------------------------------------------
def _maxpool2x2(x):  # NHWC glue; negligible vs. conv/loss hot path
    N, H, W, C = x.shape
    return x.reshape(N, H // 2, 2, W // 2, 2, C).max(axis=(2, 4))


def _prep_conv_params(w, b, cin_pad, cout_pad):
    # w: (Cout, Cin, 3, 3) PyTorch layout -> (9, cin_pad, cout_pad) bf16,
    # taps ordered (ky, kx); zero-padded channels keep results identical.
    cout, cin = w.shape[0], w.shape[1]
    wt = jnp.transpose(w, (2, 3, 1, 0)).reshape(9, cin, cout)
    wt = jnp.pad(wt, ((0, 0), (0, cin_pad - cin), (0, cout_pad - cout)))
    bt = jnp.pad(b, (0, cout_pad - cout)).reshape(1, cout_pad)
    return {"w": wt.astype(jnp.bfloat16), "b": bt.astype(jnp.float32)}


def init_vgg_params(key):
    # TODO(synk): pretrained VGG19 weights are replaced by deterministic
    # He-initialized weights with identical shapes (no checkpoint loading).
    shapes = {
        "conv1_1": (64, 3, 3, 3),
        "conv1_2": (64, 64, 3, 3),
        "conv2_1": (128, 64, 3, 3),
    }
    cin_pad = {"conv1_1": 3, "conv1_2": 128, "conv2_1": 128}
    cout_pad = {"conv1_1": 128, "conv1_2": 128, "conv2_1": 128}
    params = {}
    for i, (name, shp) in enumerate(shapes.items()):
        kw = jax.random.fold_in(key, i)
        fan_in = shp[1] * shp[2] * shp[3]
        w = jax.random.normal(kw, shp, jnp.float32) * jnp.sqrt(2.0 / fan_in)
        b = jnp.zeros((shp[0],), jnp.float32)
        params[name] = _prep_conv_params(w, b, cin_pad[name], cout_pad[name])
    return params


def vgg_relu2_1(x_nchw, params):
    # use_input_norm=True: ImageNet mean/std normalization, then
    # conv1_1 -> relu -> conv1_2 -> relu -> maxpool -> conv2_1 -> relu.
    x = jnp.transpose(x_nchw, (0, 2, 3, 1)).astype(jnp.float32)  # -> NHWC
    mean = jnp.array([0.485, 0.456, 0.406], jnp.float32)
    std = jnp.array([0.229, 0.224, 0.225], jnp.float32)
    x = (x - mean) / std
    x = conv3x3_relu(x, params["conv1_1"])   # (B, H, W, 128)  [64 real + 64 zero]
    x = conv3x3_relu(x, params["conv1_2"])
    x = _maxpool2x2(x)
    x = conv3x3_relu(x, params["conv2_1"])   # (B, H/2, W/2, 128)
    return x                                  # NHWC features


# ----------------------------------------------------------------------------
# Full ContextualLoss forward
# ----------------------------------------------------------------------------
def contextual_loss_forward(inputs, targets, params, *, h=0.5, eps=1e-5):
    N = inputs.shape[0]
    # One VGG pass for inputs + targets (concatenated along batch).
    both = jnp.concatenate([inputs, targets], axis=0)
    feats = vgg_relu2_1(both, params)                     # (2N, Hf, Wf, 128)
    B, Hf, Wf, C = feats.shape
    f = feats.reshape(B, Hf * Wf, C)                      # free reshape (NHWC)
    f_in = f[:N]
    f_tg = jax.lax.stop_gradient(f[N:])                   # targets under no_grad
    y_mu = jnp.mean(f_tg, axis=(0, 1))                    # (C,) per-channel mean
    return contextual_loss_pallas(f_in, f_tg, y_mu, h=h, eps=eps)


if __name__ == "__main__":
    key = jax.random.PRNGKey(0)
    k_in, k_tgt, k_par = jax.random.split(key, 3)

    inputs = jax.random.uniform(k_in, (2, 3, 16, 16), jnp.float32)
    targets = jax.random.uniform(k_tgt, (2, 3, 16, 16), jnp.float32)
    params = init_vgg_params(k_par)

    loss_fn = jax.jit(functools.partial(contextual_loss_forward, params=params))
    loss = jax.block_until_ready(loss_fn(inputs, targets))

    assert loss.shape == () and bool(jnp.isfinite(loss)), loss
    print("KERNEL_OK")
</pallas_src>

<mosaic_0001>
module attributes {stable_mosaic.version = 11 : i64} {
  func.func @_conv3x3_relu_kernel(%arg0: i32, %arg1: memref<1x18x18x3xf32, #tpu.memory_space<vmem>>, %arg2: memref<9x3x128xbf16, #tpu.memory_space<vmem>>, %arg3: memref<1x128xf32, #tpu.memory_space<vmem>>, %arg4: memref<1x256x128xf32, #tpu.memory_space<vmem>>) attributes {dimension_semantics = [#tpu.dimension_semantics<parallel>], iteration_bounds = array<i64: 4>, scalar_prefetch = 0 : i64, scratch_operands = 0 : i64, tpu.core_type = #tpu.core_type<tc>, window_params = [{transform_indices = @transform_0, window_bounds = array<i64: 1, 18, 18, 3>}, {pipeline_mode = #tpu.pipeline_mode<synchronous>, transform_indices = @transform_1, window_bounds = array<i64: 9, 3, 128>}, {pipeline_mode = #tpu.pipeline_mode<synchronous>, transform_indices = @transform_2, window_bounds = array<i64: 1, 128>}, {transform_indices = @transform_3, window_bounds = array<i64: 1, 256, 128>}]} {
    %c0 = arith.constant 0 : index
    %c0_0 = arith.constant 0 : index
    %c0_1 = arith.constant 0 : index
    %c0_2 = arith.constant 0 : index
    %0 = vector.load %arg1[%c0, %c0_0, %c0_1, %c0_2] : memref<1x18x18x3xf32, #tpu.memory_space<vmem>>, vector<1x18x18x3xf32>
    %1 = vector.shape_cast %0 : vector<1x18x18x3xf32> to vector<18x18x3xf32>
    %cst = arith.constant 0.000000e+00 : f32
    %2 = vector.broadcast %cst : f32 to vector<256x128xf32>
    %3 = vector.extract_strided_slice %1 {offsets = [0, 0, 0], sizes = [16, 16, 3], strides = [1, 1, 1]} : vector<18x18x3xf32> to vector<16x16x3xf32>
    %4 = vector.shape_cast %3 : vector<16x16x3xf32> to vector<256x3xf32>
    %5 = arith.truncf %4 : vector<256x3xf32> to vector<256x3xbf16>
    %c0_3 = arith.constant 0 : index
    %c0_4 = arith.constant 0 : index
    %c0_5 = arith.constant 0 : index
    %6 = vector.load %arg2[%c0_3, %c0_4, %c0_5] : memref<9x3x128xbf16, #tpu.memory_space<vmem>>, vector<1x3x128xbf16>
    %7 = vector.shape_cast %6 : vector<1x3x128xbf16> to vector<3x128xbf16>
    %cst_6 = arith.constant dense<0.000000e+00> : vector<256x128xf32>
    %8 = tpu.matmul %5, %7, %cst_6 {dimension_numbers = #tpu.dot_dimension_numbers<[1], [0], [0], [1], [0, 0, 1, 1], [], []>} : vector<256x3xbf16>, vector<3x128xbf16>, vector<256x128xf32> -> vector<256x128xf32>
    %9 = arith.addf %2, %8 : vector<256x128xf32>
    %10 = vector.extract_strided_slice %1 {offsets = [0, 1, 0], sizes = [16, 16, 3], strides = [1, 1, 1]} : vector<18x18x3xf32> to vector<16x16x3xf32>
    %11 = vector.shape_cast %10 : vector<16x16x3xf32> to vector<256x3xf32>
    %12 = arith.truncf %11 : vector<256x3xf32> to vector<256x3xbf16>
    %c1 = arith.constant 1 : index
    %c0_7 = arith.constant 0 : index
    %c0_8 = arith.constant 0 : index
    %13 = vector.load %arg2[%c1, %c0_7, %c0_8] : memref<9x3x128xbf16, #tpu.memory_space<vmem>>, vector<1x3x128xbf16>
    %14 = vector.shape_cast %13 : vector<1x3x128xbf16> to vector<3x128xbf16>
    %cst_9 = arith.constant dense<0.000000e+00> : vector<256x128xf32>
    %15 = tpu.matmul %12, %14, %cst_9 {dimension_numbers = #tpu.dot_dimension_numbers<[1], [0], [0], [1], [0, 0, 1, 1], [], []>} : vector<256x3xbf16>, vector<3x128xbf16>, vector<256x128xf32> -> vector<256x128xf32>
    %16 = arith.addf %9, %15 : vector<256x128xf32>
    %17 = vector.extract_strided_slice %1 {offsets = [0, 2, 0], sizes = [16, 16, 3], strides = [1, 1, 1]} : vector<18x18x3xf32> to vector<16x16x3xf32>
    %18 = vector.shape_cast %17 : vector<16x16x3xf32> to vector<256x3xf32>
    %19 = arith.truncf %18 : vector<256x3xf32> to vector<256x3xbf16>
    %c2 = arith.constant 2 : index
    %c0_10 = arith.constant 0 : index
    %c0_11 = arith.constant 0 : index
    %20 = vector.load %arg2[%c2, %c0_10, %c0_11] : memref<9x3x128xbf16, #tpu.memory_space<vmem>>, vector<1x3x128xbf16>
    %21 = vector.shape_cast %20 : vector<1x3x128xbf16> to vector<3x128xbf16>
    %cst_12 = arith.constant dense<0.000000e+00> : vector<256x128xf32>
    %22 = tpu.matmul %19, %21, %cst_12 {dimension_numbers = #tpu.dot_dimension_numbers<[1], [0], [0], [1], [0, 0, 1, 1], [], []>} : vector<256x3xbf16>, vector<3x128xbf16>, vector<256x128xf32> -> vector<256x128xf32>
    %23 = arith.addf %16, %22 : vector<256x128xf32>
    %24 = vector.extract_strided_slice %1 {offsets = [1, 0, 0], sizes = [16, 16, 3], strides = [1, 1, 1]} : vector<18x18x3xf32> to vector<16x16x3xf32>
    %25 = vector.shape_cast %24 : vector<16x16x3xf32> to vector<256x3xf32>
    %26 = arith.truncf %25 : vector<256x3xf32> to vector<256x3xbf16>
    %c3 = arith.constant 3 : index
    %c0_13 = arith.constant 0 : index
    %c0_14 = arith.constant 0 : index
    %27 = vector.load %arg2[%c3, %c0_13, %c0_14] : memref<9x3x128xbf16, #tpu.memory_space<vmem>>, vector<1x3x128xbf16>
    %28 = vector.shape_cast %27 : vector<1x3x128xbf16> to vector<3x128xbf16>
    %cst_15 = arith.constant dense<0.000000e+00> : vector<256x128xf32>
    %29 = tpu.matmul %26, %28, %cst_15 {dimension_numbers = #tpu.dot_dimension_numbers<[1], [0], [0], [1], [0, 0, 1, 1], [], []>} : vector<256x3xbf16>, vector<3x128xbf16>, vector<256x128xf32> -> vector<256x128xf32>
    %30 = arith.addf %23, %29 : vector<256x128xf32>
    %31 = vector.extract_strided_slice %1 {offsets = [1, 1, 0], sizes = [16, 16, 3], strides = [1, 1, 1]} : vector<18x18x3xf32> to vector<16x16x3xf32>
    %32 = vector.shape_cast %31 : vector<16x16x3xf32> to vector<256x3xf32>
    %33 = arith.truncf %32 : vector<256x3xf32> to vector<256x3xbf16>
    %c4 = arith.constant 4 : index
    %c0_16 = arith.constant 0 : index
    %c0_17 = arith.constant 0 : index
    %34 = vector.load %arg2[%c4, %c0_16, %c0_17] : memref<9x3x128xbf16, #tpu.memory_space<vmem>>, vector<1x3x128xbf16>
    %35 = vector.shape_cast %34 : vector<1x3x128xbf16> to vector<3x128xbf16>
    %cst_18 = arith.constant dense<0.000000e+00> : vector<256x128xf32>
    %36 = tpu.matmul %33, %35, %cst_18 {dimension_numbers = #tpu.dot_dimension_numbers<[1], [0], [0], [1], [0, 0, 1, 1], [], []>} : vector<256x3xbf16>, vector<3x128xbf16>, vector<256x128xf32> -> vector<256x128xf32>
    %37 = arith.addf %30, %36 : vector<256x128xf32>
    %38 = vector.extract_strided_slice %1 {offsets = [1, 2, 0], sizes = [16, 16, 3], strides = [1, 1, 1]} : vector<18x18x3xf32> to vector<16x16x3xf32>
    %39 = vector.shape_cast %38 : vector<16x16x3xf32> to vector<256x3xf32>
    %40 = arith.truncf %39 : vector<256x3xf32> to vector<256x3xbf16>
    %c5 = arith.constant 5 : index
    %c0_19 = arith.constant 0 : index
    %c0_20 = arith.constant 0 : index
    %41 = vector.load %arg2[%c5, %c0_19, %c0_20] : memref<9x3x128xbf16, #tpu.memory_space<vmem>>, vector<1x3x128xbf16>
    %42 = vector.shape_cast %41 : vector<1x3x128xbf16> to vector<3x128xbf16>
    %cst_21 = arith.constant dense<0.000000e+00> : vector<256x128xf32>
    %43 = tpu.matmul %40, %42, %cst_21 {dimension_numbers = #tpu.dot_dimension_numbers<[1], [0], [0], [1], [0, 0, 1, 1], [], []>} : vector<256x3xbf16>, vector<3x128xbf16>, vector<256x128xf32> -> vector<256x128xf32>
    %44 = arith.addf %37, %43 : vector<256x128xf32>
    %45 = vector.extract_strided_slice %1 {offsets = [2, 0, 0], sizes = [16, 16, 3], strides = [1, 1, 1]} : vector<18x18x3xf32> to vector<16x16x3xf32>
    %46 = vector.shape_cast %45 : vector<16x16x3xf32> to vector<256x3xf32>
    %47 = arith.truncf %46 : vector<256x3xf32> to vector<256x3xbf16>
    %c6 = arith.constant 6 : index
    %c0_22 = arith.constant 0 : index
    %c0_23 = arith.constant 0 : index
    %48 = vector.load %arg2[%c6, %c0_22, %c0_23] : memref<9x3x128xbf16, #tpu.memory_space<vmem>>, vector<1x3x128xbf16>
    %49 = vector.shape_cast %48 : vector<1x3x128xbf16> to vector<3x128xbf16>
    %cst_24 = arith.constant dense<0.000000e+00> : vector<256x128xf32>
    %50 = tpu.matmul %47, %49, %cst_24 {dimension_numbers = #tpu.dot_dimension_numbers<[1], [0], [0], [1], [0, 0, 1, 1], [], []>} : vector<256x3xbf16>, vector<3x128xbf16>, vector<256x128xf32> -> vector<256x128xf32>
    %51 = arith.addf %44, %50 : vector<256x128xf32>
    %52 = vector.extract_strided_slice %1 {offsets = [2, 1, 0], sizes = [16, 16, 3], strides = [1, 1, 1]} : vector<18x18x3xf32> to vector<16x16x3xf32>
    %53 = vector.shape_cast %52 : vector<16x16x3xf32> to vector<256x3xf32>
    %54 = arith.truncf %53 : vector<256x3xf32> to vector<256x3xbf16>
    %c7 = arith.constant 7 : index
    %c0_25 = arith.constant 0 : index
    %c0_26 = arith.constant 0 : index
    %55 = vector.load %arg2[%c7, %c0_25, %c0_26] : memref<9x3x128xbf16, #tpu.memory_space<vmem>>, vector<1x3x128xbf16>
    %56 = vector.shape_cast %55 : vector<1x3x128xbf16> to vector<3x128xbf16>
    %cst_27 = arith.constant dense<0.000000e+00> : vector<256x128xf32>
    %57 = tpu.matmul %54, %56, %cst_27 {dimension_numbers = #tpu.dot_dimension_numbers<[1], [0], [0], [1], [0, 0, 1, 1], [], []>} : vector<256x3xbf16>, vector<3x128xbf16>, vector<256x128xf32> -> vector<256x128xf32>
    %58 = arith.addf %51, %57 : vector<256x128xf32>
    %59 = vector.extract_strided_slice %1 {offsets = [2, 2, 0], sizes = [16, 16, 3], strides = [1, 1, 1]} : vector<18x18x3xf32> to vector<16x16x3xf32>
    %60 = vector.shape_cast %59 : vector<16x16x3xf32> to vector<256x3xf32>
    %61 = arith.truncf %60 : vector<256x3xf32> to vector<256x3xbf16>
    %c8 = arith.constant 8 : index
    %c0_28 = arith.constant 0 : index
    %c0_29 = arith.constant 0 : index
    %62 = vector.load %arg2[%c8, %c0_28, %c0_29] : memref<9x3x128xbf16, #tpu.memory_space<vmem>>, vector<1x3x128xbf16>
    %63 = vector.shape_cast %62 : vector<1x3x128xbf16> to vector<3x128xbf16>
    %cst_30 = arith.constant dense<0.000000e+00> : vector<256x128xf32>
    %64 = tpu.matmul %61, %63, %cst_30 {dimension_numbers = #tpu.dot_dimension_numbers<[1], [0], [0], [1], [0, 0, 1, 1], [], []>} : vector<256x3xbf16>, vector<3x128xbf16>, vector<256x128xf32> -> vector<256x128xf32>
    %65 = arith.addf %58, %64 : vector<256x128xf32>
    %c0_31 = arith.constant 0 : index
    %c0_32 = arith.constant 0 : index
    %66 = vector.load %arg3[%c0_31, %c0_32] : memref<1x128xf32, #tpu.memory_space<vmem>>, vector<1x128xf32>
    %67 = vector.broadcast %66 : vector<1x128xf32> to vector<256x128xf32>
    %68 = arith.addf %65, %67 : vector<256x128xf32>
    %cst_33 = arith.constant 0.000000e+00 : f32
    %69 = vector.broadcast %cst_33 : f32 to vector<256x128xf32>
    %70 = arith.maximumf %68, %69 : vector<256x128xf32>
    %c0_34 = arith.constant 0 : index
    %c0_35 = arith.constant 0 : index
    %c0_36 = arith.constant 0 : index
    %71 = vector.load %arg4[%c0_34, %c0_35, %c0_36] : memref<1x256x128xf32, #tpu.memory_space<vmem>>, vector<1x256x128xf32>
    %72 = vector.shape_cast %71 : vector<1x256x128xf32> to vector<256x128xf32>
    %73 = vector.shape_cast %70 : vector<256x128xf32> to vector<1x256x128xf32>
    tpu.vector_store %arg4[%c0_34, %c0_35, %c0_36], %73 {strides = array<i32>} : memref<1x256x128xf32, #tpu.memory_space<vmem>>, vector<1x256x128xf32>,
    return
  }
  func.func @transform_0(%arg0: i32) -> (i32, i32, i32, i32) {
    %c0_i32 = arith.constant 0 : i32
    %c0_i32_0 = arith.constant 0 : i32
    %c0_i32_1 = arith.constant 0 : i32
    %c0_i32_2 = arith.constant 0 : i32
    return %arg0, %c0_i32, %c0_i32_0, %c0_i32_1 : i32, i32, i32, i32
  }
  func.func @transform_1(%arg0: i32) -> (i32, i32, i32) {
    %c0_i32 = arith.constant 0 : i32
    %c0_i32_0 = arith.constant 0 : i32
    %c0_i32_1 = arith.constant 0 : i32
    %c0_i32_2 = arith.constant 0 : i32
    return %c0_i32, %c0_i32_0, %c0_i32_1 : i32, i32, i32
  }
  func.func @transform_2(%arg0: i32) -> (i32, i32) {
    %c0_i32 = arith.constant 0 : i32
    %c0_i32_0 = arith.constant 0 : i32
    %c0_i32_1 = arith.constant 0 : i32
    return %c0_i32, %c0_i32_0 : i32, i32
  }
  func.func @transform_3(%arg0: i32) -> (i32, i32, i32) {
    %c0_i32 = arith.constant 0 : i32
    %c0_i32_0 = arith.constant 0 : i32
    %c0_i32_1 = arith.constant 0 : i32
    return %arg0, %c0_i32, %c0_i32_0 : i32, i32, i32
  }
}

module attributes {stable_mosaic.version = 11 : i64} {
  func.func @_conv3x3_relu_kernel(%arg0: i32, %arg1: memref<1x18x18x128xf32, #tpu.memory_space<vmem>>, %arg2: memref<9x128x128xbf16, #tpu.memory_space<vmem>>, %arg3: memref<1x128xf32, #tpu.memory_space<vmem>>, %arg4: memref<1x256x128xf32, #tpu.memory_space<vmem>>) attributes {dimension_semantics = [#tpu.dimension_semantics<parallel>], iteration_bounds = array<i64: 4>, scalar_prefetch = 0 : i64, scratch_operands = 0 : i64, tpu.core_type = #tpu.core_type<tc>, window_params = [{transform_indices = @transform_0, window_bounds = array<i64: 1, 18, 18, 128>}, {pipeline_mode = #tpu.pipeline_mode<synchronous>, transform_indices = @transform_1, window_bounds = array<i64: 9, 128, 128>}, {pipeline_mode = #tpu.pipeline_mode<synchronous>, transform_indices = @transform_2, window_bounds = array<i64: 1, 128>}, {transform_indices = @transform_3, window_bounds = array<i64: 1, 256, 128>}]} {
    %c0 = arith.constant 0 : index
    %c0_0 = arith.constant 0 : index
    %c0_1 = arith.constant 0 : index
    %c0_2 = arith.constant 0 : index
    %0 = vector.load %arg1[%c0, %c0_0, %c0_1, %c0_2] : memref<1x18x18x128xf32, #tpu.memory_space<vmem>>, vector<1x18x18x128xf32>
    %1 = vector.shape_cast %0 : vector<1x18x18x128xf32> to vector<18x18x128xf32>
    %cst = arith.constant 0.000000e+00 : f32
    %2 = vector.broadcast %cst : f32 to vector<256x128xf32>
    %3 = vector.extract_strided_slice %1 {offsets = [0, 0, 0], sizes = [16, 16, 128], strides = [1, 1, 1]} : vector<18x18x128xf32> to vector<16x16x128xf32>
    %4 = vector.shape_cast %3 : vector<16x16x128xf32> to vector<256x128xf32>
    %5 = arith.truncf %4 : vector<256x128xf32> to vector<256x128xbf16>
    %c0_3 = arith.constant 0 : index
    %c0_4 = arith.constant 0 : index
    %c0_5 = arith.constant 0 : index
    %6 = vector.load %arg2[%c0_3, %c0_4, %c0_5] : memref<9x128x128xbf16, #tpu.memory_space<vmem>>, vector<1x128x128xbf16>
    %7 = vector.shape_cast %6 : vector<1x128x128xbf16> to vector<128x128xbf16>
    %cst_6 = arith.constant dense<0.000000e+00> : vector<256x128xf32>
    %8 = tpu.matmul %5, %7, %cst_6 {dimension_numbers = #tpu.dot_dimension_numbers<[1], [0], [0], [1], [0, 0, 1, 1], [], []>} : vector<256x128xbf16>, vector<128x128xbf16>, vector<256x128xf32> -> vector<256x128xf32>
    %9 = arith.addf %2, %8 : vector<256x128xf32>
    %10 = vector.extract_strided_slice %1 {offsets = [0, 1, 0], sizes = [16, 16, 128], strides = [1, 1, 1]} : vector<18x18x128xf32> to vector<16x16x128xf32>
    %11 = vector.shape_cast %10 : vector<16x16x128xf32> to vector<256x128xf32>
    %12 = arith.truncf %11 : vector<256x128xf32> to vector<256x128xbf16>
    %c1 = arith.constant 1 : index
    %c0_7 = arith.constant 0 : index
    %c0_8 = arith.constant 0 : index
    %13 = vector.load %arg2[%c1, %c0_7, %c0_8] : memref<9x128x128xbf16, #tpu.memory_space<vmem>>, vector<1x128x128xbf16>
    %14 = vector.shape_cast %13 : vector<1x128x128xbf16> to vector<128x128xbf16>
    %cst_9 = arith.constant dense<0.000000e+00> : vector<256x128xf32>
    %15 = tpu.matmul %12, %14, %cst_9 {dimension_numbers = #tpu.dot_dimension_numbers<[1], [0], [0], [1], [0, 0, 1, 1], [], []>} : vector<256x128xbf16>, vector<128x128xbf16>, vector<256x128xf32> -> vector<256x128xf32>
    %16 = arith.addf %9, %15 : vector<256x128xf32>
    %17 = vector.extract_strided_slice %1 {offsets = [0, 2, 0], sizes = [16, 16, 128], strides = [1, 1, 1]} : vector<18x18x128xf32> to vector<16x16x128xf32>
    %18 = vector.shape_cast %17 : vector<16x16x128xf32> to vector<256x128xf32>
    %19 = arith.truncf %18 : vector<256x128xf32> to vector<256x128xbf16>
    %c2 = arith.constant 2 : index
    %c0_10 = arith.constant 0 : index
    %c0_11 = arith.constant 0 : index
    %20 = vector.load %arg2[%c2, %c0_10, %c0_11] : memref<9x128x128xbf16, #tpu.memory_space<vmem>>, vector<1x128x128xbf16>
    %21 = vector.shape_cast %20 : vector<1x128x128xbf16> to vector<128x128xbf16>
    %cst_12 = arith.constant dense<0.000000e+00> : vector<256x128xf32>
    %22 = tpu.matmul %19, %21, %cst_12 {dimension_numbers = #tpu.dot_dimension_numbers<[1], [0], [0], [1], [0, 0, 1, 1], [], []>} : vector<256x128xbf16>, vector<128x128xbf16>, vector<256x128xf32> -> vector<256x128xf32>
    %23 = arith.addf %16, %22 : vector<256x128xf32>
    %24 = vector.extract_strided_slice %1 {offsets = [1, 0, 0], sizes = [16, 16, 128], strides = [1, 1, 1]} : vector<18x18x128xf32> to vector<16x16x128xf32>
    %25 = vector.shape_cast %24 : vector<16x16x128xf32> to vector<256x128xf32>
    %26 = arith.truncf %25 : vector<256x128xf32> to vector<256x128xbf16>
    %c3 = arith.constant 3 : index
    %c0_13 = arith.constant 0 : index
    %c0_14 = arith.constant 0 : index
    %27 = vector.load %arg2[%c3, %c0_13, %c0_14] : memref<9x128x128xbf16, #tpu.memory_space<vmem>>, vector<1x128x128xbf16>
    %28 = vector.shape_cast %27 : vector<1x128x128xbf16> to vector<128x128xbf16>
    %cst_15 = arith.constant dense<0.000000e+00> : vector<256x128xf32>
    %29 = tpu.matmul %26, %28, %cst_15 {dimension_numbers = #tpu.dot_dimension_numbers<[1], [0], [0], [1], [0, 0, 1, 1], [], []>} : vector<256x128xbf16>, vector<128x128xbf16>, vector<256x128xf32> -> vector<256x128xf32>
    %30 = arith.addf %23, %29 : vector<256x128xf32>
    %31 = vector.extract_strided_slice %1 {offsets = [1, 1, 0], sizes = [16, 16, 128], strides = [1, 1, 1]} : vector<18x18x128xf32> to vector<16x16x128xf32>
    %32 = vector.shape_cast %31 : vector<16x16x128xf32> to vector<256x128xf32>
    %33 = arith.truncf %32 : vector<256x128xf32> to vector<256x128xbf16>
    %c4 = arith.constant 4 : index
    %c0_16 = arith.constant 0 : index
    %c0_17 = arith.constant 0 : index
    %34 = vector.load %arg2[%c4, %c0_16, %c0_17] : memref<9x128x128xbf16, #tpu.memory_space<vmem>>, vector<1x128x128xbf16>
    %35 = vector.shape_cast %34 : vector<1x128x128xbf16> to vector<128x128xbf16>
    %cst_18 = arith.constant dense<0.000000e+00> : vector<256x128xf32>
    %36 = tpu.matmul %33, %35, %cst_18 {dimension_numbers = #tpu.dot_dimension_numbers<[1], [0], [0], [1], [0, 0, 1, 1], [], []>} : vector<256x128xbf16>, vector<128x128xbf16>, vector<256x128xf32> -> vector<256x128xf32>
    %37 = arith.addf %30, %36 : vector<256x128xf32>
    %38 = vector.extract_strided_slice %1 {offsets = [1, 2, 0], sizes = [16, 16, 128], strides = [1, 1, 1]} : vector<18x18x128xf32> to vector<16x16x128xf32>
    %39 = vector.shape_cast %38 : vector<16x16x128xf32> to vector<256x128xf32>
    %40 = arith.truncf %39 : vector<256x128xf32> to vector<256x128xbf16>
    %c5 = arith.constant 5 : index
    %c0_19 = arith.constant 0 : index
    %c0_20 = arith.constant 0 : index
    %41 = vector.load %arg2[%c5, %c0_19, %c0_20] : memref<9x128x128xbf16, #tpu.memory_space<vmem>>, vector<1x128x128xbf16>
    %42 = vector.shape_cast %41 : vector<1x128x128xbf16> to vector<128x128xbf16>
    %cst_21 = arith.constant dense<0.000000e+00> : vector<256x128xf32>
    %43 = tpu.matmul %40, %42, %cst_21 {dimension_numbers = #tpu.dot_dimension_numbers<[1], [0], [0], [1], [0, 0, 1, 1], [], []>} : vector<256x128xbf16>, vector<128x128xbf16>, vector<256x128xf32> -> vector<256x128xf32>
    %44 = arith.addf %37, %43 : vector<256x128xf32>
    %45 = vector.extract_strided_slice %1 {offsets = [2, 0, 0], sizes = [16, 16, 128], strides = [1, 1, 1]} : vector<18x18x128xf32> to vector<16x16x128xf32>
    %46 = vector.shape_cast %45 : vector<16x16x128xf32> to vector<256x128xf32>
    %47 = arith.truncf %46 : vector<256x128xf32> to vector<256x128xbf16>
    %c6 = arith.constant 6 : index
    %c0_22 = arith.constant 0 : index
    %c0_23 = arith.constant 0 : index
    %48 = vector.load %arg2[%c6, %c0_22, %c0_23] : memref<9x128x128xbf16, #tpu.memory_space<vmem>>, vector<1x128x128xbf16>
    %49 = vector.shape_cast %48 : vector<1x128x128xbf16> to vector<128x128xbf16>
    %cst_24 = arith.constant dense<0.000000e+00> : vector<256x128xf32>
    %50 = tpu.matmul %47, %49, %cst_24 {dimension_numbers = #tpu.dot_dimension_numbers<[1], [0], [0], [1], [0, 0, 1, 1], [], []>} : vector<256x128xbf16>, vector<128x128xbf16>, vector<256x128xf32> -> vector<256x128xf32>
    %51 = arith.addf %44, %50 : vector<256x128xf32>
    %52 = vector.extract_strided_slice %1 {offsets = [2, 1, 0], sizes = [16, 16, 128], strides = [1, 1, 1]} : vector<18x18x128xf32> to vector<16x16x128xf32>
    %53 = vector.shape_cast %52 : vector<16x16x128xf32> to vector<256x128xf32>
    %54 = arith.truncf %53 : vector<256x128xf32> to vector<256x128xbf16>
    %c7 = arith.constant 7 : index
    %c0_25 = arith.constant 0 : index
    %c0_26 = arith.constant 0 : index
    %55 = vector.load %arg2[%c7, %c0_25, %c0_26] : memref<9x128x128xbf16, #tpu.memory_space<vmem>>, vector<1x128x128xbf16>
    %56 = vector.shape_cast %55 : vector<1x128x128xbf16> to vector<128x128xbf16>
    %cst_27 = arith.constant dense<0.000000e+00> : vector<256x128xf32>
    %57 = tpu.matmul %54, %56, %cst_27 {dimension_numbers = #tpu.dot_dimension_numbers<[1], [0], [0], [1], [0, 0, 1, 1], [], []>} : vector<256x128xbf16>, vector<128x128xbf16>, vector<256x128xf32> -> vector<256x128xf32>
    %58 = arith.addf %51, %57 : vector<256x128xf32>
    %59 = vector.extract_strided_slice %1 {offsets = [2, 2, 0], sizes = [16, 16, 128], strides = [1, 1, 1]} : vector<18x18x128xf32> to vector<16x16x128xf32>
    %60 = vector.shape_cast %59 : vector<16x16x128xf32> to vector<256x128xf32>
    %61 = arith.truncf %60 : vector<256x128xf32> to vector<256x128xbf16>
    %c8 = arith.constant 8 : index
    %c0_28 = arith.constant 0 : index
    %c0_29 = arith.constant 0 : index
    %62 = vector.load %arg2[%c8, %c0_28, %c0_29] : memref<9x128x128xbf16, #tpu.memory_space<vmem>>, vector<1x128x128xbf16>
    %63 = vector.shape_cast %62 : vector<1x128x128xbf16> to vector<128x128xbf16>
    %cst_30 = arith.constant dense<0.000000e+00> : vector<256x128xf32>
    %64 = tpu.matmul %61, %63, %cst_30 {dimension_numbers = #tpu.dot_dimension_numbers<[1], [0], [0], [1], [0, 0, 1, 1], [], []>} : vector<256x128xbf16>, vector<128x128xbf16>, vector<256x128xf32> -> vector<256x128xf32>
    %65 = arith.addf %58, %64 : vector<256x128xf32>
    %c0_31 = arith.constant 0 : index
    %c0_32 = arith.constant 0 : index
    %66 = vector.load %arg3[%c0_31, %c0_32] : memref<1x128xf32, #tpu.memory_space<vmem>>, vector<1x128xf32>
    %67 = vector.broadcast %66 : vector<1x128xf32> to vector<256x128xf32>
    %68 = arith.addf %65, %67 : vector<256x128xf32>
    %cst_33 = arith.constant 0.000000e+00 : f32
    %69 = vector.broadcast %cst_33 : f32 to vector<256x128xf32>
    %70 = arith.maximumf %68, %69 : vector<256x128xf32>
    %c0_34 = arith.constant 0 : index
    %c0_35 = arith.constant 0 : index
    %c0_36 = arith.constant 0 : index
    %71 = vector.load %arg4[%c0_34, %c0_35, %c0_36] : memref<1x256x128xf32, #tpu.memory_space<vmem>>, vector<1x256x128xf32>
    %72 = vector.shape_cast %71 : vector<1x256x128xf32> to vector<256x128xf32>
    %73 = vector.shape_cast %70 : vector<256x128xf32> to vector<1x256x128xf32>
    tpu.vector_store %arg4[%c0_34, %c0_35, %c0_36], %73 {strides = array<i32>} : memref<1x256x128xf32, #tpu.memory_space<vmem>>, vector<1x256x128xf32>,
    return
  }
  func.func @transform_0(%arg0: i32) -> (i32, i32, i32, i32) {
    %c0_i32 = arith.constant 0 : i32
    %c0_i32_0 = arith.constant 0 : i32
    %c0_i32_1 = arith.constant 0 : i32
    %c0_i32_2 = arith.constant 0 : i32
    return %arg0, %c0_i32, %c0_i32_0, %c0_i32_1 : i32, i32, i32, i32
  }
  func.func @transform_1(%arg0: i32) -> (i32, i32, i32) {
    %c0_i32 = arith.constant 0 : i32
    %c0_i32_0 = arith.constant 0 : i32
    %c0_i32_1 = arith.constant 0 : i32
    %c0_i32_2 = arith.constant 0 : i32
    return %c0_i32, %c0_i32_0, %c0_i32_1 : i32, i32, i32
  }
  func.func @transform_2(%arg0: i32) -> (i32, i32) {
    %c0_i32 = arith.constant 0 : i32
    %c0_i32_0 = arith.constant 0 : i32
    %c0_i32_1 = arith.constant 0 : i32
    return %c0_i32, %c0_i32_0 : i32, i32
  }
  func.func @transform_3(%arg0: i32) -> (i32, i32, i32) {
    %c0_i32 = arith.constant 0 : i32
    %c0_i32_0 = arith.constant 0 : i32
    %c0_i32_1 = arith.constant 0 : i32
    return %arg0, %c0_i32, %c0_i32_0 : i32, i32, i32
  }
}

module attributes {stable_mosaic.version = 11 : i64} {
  func.func @_conv3x3_relu_kernel(%arg0: i32, %arg1: memref<1x10x10x128xf32, #tpu.memory_space<vmem>>, %arg2: memref<9x128x128xbf16, #tpu.memory_space<vmem>>, %arg3: memref<1x128xf32, #tpu.memory_space<vmem>>, %arg4: memref<1x64x128xf32, #tpu.memory_space<vmem>>) attributes {dimension_semantics = [#tpu.dimension_semantics<parallel>], iteration_bounds = array<i64: 4>, scalar_prefetch = 0 : i64, scratch_operands = 0 : i64, tpu.core_type = #tpu.core_type<tc>, window_params = [{transform_indices = @transform_0, window_bounds = array<i64: 1, 10, 10, 128>}, {pipeline_mode = #tpu.pipeline_mode<synchronous>, transform_indices = @transform_1, window_bounds = array<i64: 9, 128, 128>}, {pipeline_mode = #tpu.pipeline_mode<synchronous>, transform_indices = @transform_2, window_bounds = array<i64: 1, 128>}, {transform_indices = @transform_3, window_bounds = array<i64: 1, 64, 128>}]} {
    %c0 = arith.constant 0 : index
    %c0_0 = arith.constant 0 : index
    %c0_1 = arith.constant 0 : index
    %c0_2 = arith.constant 0 : index
    %0 = vector.load %arg1[%c0, %c0_0, %c0_1, %c0_2] : memref<1x10x10x128xf32, #tpu.memory_space<vmem>>, vector<1x10x10x128xf32>
    %1 = vector.shape_cast %0 : vector<1x10x10x128xf32> to vector<10x10x128xf32>
    %cst = arith.constant 0.000000e+00 : f32
    %2 = vector.broadcast %cst : f32 to vector<64x128xf32>
    %3 = vector.extract_strided_slice %1 {offsets = [0, 0, 0], sizes = [8, 8, 128], strides = [1, 1, 1]} : vector<10x10x128xf32> to vector<8x8x128xf32>
    %4 = vector.shape_cast %3 : vector<8x8x128xf32> to vector<64x128xf32>
    %5 = arith.truncf %4 : vector<64x128xf32> to vector<64x128xbf16>
    %c0_3 = arith.constant 0 : index
    %c0_4 = arith.constant 0 : index
    %c0_5 = arith.constant 0 : index
    %6 = vector.load %arg2[%c0_3, %c0_4, %c0_5] : memref<9x128x128xbf16, #tpu.memory_space<vmem>>, vector<1x128x128xbf16>
    %7 = vector.shape_cast %6 : vector<1x128x128xbf16> to vector<128x128xbf16>
    %cst_6 = arith.constant dense<0.000000e+00> : vector<64x128xf32>
    %8 = tpu.matmul %5, %7, %cst_6 {dimension_numbers = #tpu.dot_dimension_numbers<[1], [0], [0], [1], [0, 0, 1, 1], [], []>} : vector<64x128xbf16>, vector<128x128xbf16>, vector<64x128xf32> -> vector<64x128xf32>
    %9 = arith.addf %2, %8 : vector<64x128xf32>
    %10 = vector.extract_strided_slice %1 {offsets = [0, 1, 0], sizes = [8, 8, 128], strides = [1, 1, 1]} : vector<10x10x128xf32> to vector<8x8x128xf32>
    %11 = vector.shape_cast %10 : vector<8x8x128xf32> to vector<64x128xf32>
    %12 = arith.truncf %11 : vector<64x128xf32> to vector<64x128xbf16>
    %c1 = arith.constant 1 : index
    %c0_7 = arith.constant 0 : index
    %c0_8 = arith.constant 0 : index
    %13 = vector.load %arg2[%c1, %c0_7, %c0_8] : memref<9x128x128xbf16, #tpu.memory_space<vmem>>, vector<1x128x128xbf16>
    %14 = vector.shape_cast %13 : vector<1x128x128xbf16> to vector<128x128xbf16>
    %cst_9 = arith.constant dense<0.000000e+00> : vector<64x128xf32>
    %15 = tpu.matmul %12, %14, %cst_9 {dimension_numbers = #tpu.dot_dimension_numbers<[1], [0], [0], [1], [0, 0, 1, 1], [], []>} : vector<64x128xbf16>, vector<128x128xbf16>, vector<64x128xf32> -> vector<64x128xf32>
    %16 = arith.addf %9, %15 : vector<64x128xf32>
    %17 = vector.extract_strided_slice %1 {offsets = [0, 2, 0], sizes = [8, 8, 128], strides = [1, 1, 1]} : vector<10x10x128xf32> to vector<8x8x128xf32>
    %18 = vector.shape_cast %17 : vector<8x8x128xf32> to vector<64x128xf32>
    %19 = arith.truncf %18 : vector<64x128xf32> to vector<64x128xbf16>
    %c2 = arith.constant 2 : index
    %c0_10 = arith.constant 0 : index
    %c0_11 = arith.constant 0 : index
    %20 = vector.load %arg2[%c2, %c0_10, %c0_11] : memref<9x128x128xbf16, #tpu.memory_space<vmem>>, vector<1x128x128xbf16>
    %21 = vector.shape_cast %20 : vector<1x128x128xbf16> to vector<128x128xbf16>
    %cst_12 = arith.constant dense<0.000000e+00> : vector<64x128xf32>
    %22 = tpu.matmul %19, %21, %cst_12 {dimension_numbers = #tpu.dot_dimension_numbers<[1], [0], [0], [1], [0, 0, 1, 1], [], []>} : vector<64x128xbf16>, vector<128x128xbf16>, vector<64x128xf32> -> vector<64x128xf32>
    %23 = arith.addf %16, %22 : vector<64x128xf32>
    %24 = vector.extract_strided_slice %1 {offsets = [1, 0, 0], sizes = [8, 8, 128], strides = [1, 1, 1]} : vector<10x10x128xf32> to vector<8x8x128xf32>
    %25 = vector.shape_cast %24 : vector<8x8x128xf32> to vector<64x128xf32>
    %26 = arith.truncf %25 : vector<64x128xf32> to vector<64x128xbf16>
    %c3 = arith.constant 3 : index
    %c0_13 = arith.constant 0 : index
    %c0_14 = arith.constant 0 : index
    %27 = vector.load %arg2[%c3, %c0_13, %c0_14] : memref<9x128x128xbf16, #tpu.memory_space<vmem>>, vector<1x128x128xbf16>
    %28 = vector.shape_cast %27 : vector<1x128x128xbf16> to vector<128x128xbf16>
    %cst_15 = arith.constant dense<0.000000e+00> : vector<64x128xf32>
    %29 = tpu.matmul %26, %28, %cst_15 {dimension_numbers = #tpu.dot_dimension_numbers<[1], [0], [0], [1], [0, 0, 1, 1], [], []>} : vector<64x128xbf16>, vector<128x128xbf16>, vector<64x128xf32> -> vector<64x128xf32>
    %30 = arith.addf %23, %29 : vector<64x128xf32>
    %31 = vector.extract_strided_slice %1 {offsets = [1, 1, 0], sizes = [8, 8, 128], strides = [1, 1, 1]} : vector<10x10x128xf32> to vector<8x8x128xf32>
    %32 = vector.shape_cast %31 : vector<8x8x128xf32> to vector<64x128xf32>
    %33 = arith.truncf %32 : vector<64x128xf32> to vector<64x128xbf16>
    %c4 = arith.constant 4 : index
    %c0_16 = arith.constant 0 : index
    %c0_17 = arith.constant 0 : index
    %34 = vector.load %arg2[%c4, %c0_16, %c0_17] : memref<9x128x128xbf16, #tpu.memory_space<vmem>>, vector<1x128x128xbf16>
    %35 = vector.shape_cast %34 : vector<1x128x128xbf16> to vector<128x128xbf16>
    %cst_18 = arith.constant dense<0.000000e+00> : vector<64x128xf32>
    %36 = tpu.matmul %33, %35, %cst_18 {dimension_numbers = #tpu.dot_dimension_numbers<[1], [0], [0], [1], [0, 0, 1, 1], [], []>} : vector<64x128xbf16>, vector<128x128xbf16>, vector<64x128xf32> -> vector<64x128xf32>
    %37 = arith.addf %30, %36 : vector<64x128xf32>
    %38 = vector.extract_strided_slice %1 {offsets = [1, 2, 0], sizes = [8, 8, 128], strides = [1, 1, 1]} : vector<10x10x128xf32> to vector<8x8x128xf32>
    %39 = vector.shape_cast %38 : vector<8x8x128xf32> to vector<64x128xf32>
    %40 = arith.truncf %39 : vector<64x128xf32> to vector<64x128xbf16>
    %c5 = arith.constant 5 : index
    %c0_19 = arith.constant 0 : index
    %c0_20 = arith.constant 0 : index
    %41 = vector.load %arg2[%c5, %c0_19, %c0_20] : memref<9x128x128xbf16, #tpu.memory_space<vmem>>, vector<1x128x128xbf16>
    %42 = vector.shape_cast %41 : vector<1x128x128xbf16> to vector<128x128xbf16>
    %cst_21 = arith.constant dense<0.000000e+00> : vector<64x128xf32>
    %43 = tpu.matmul %40, %42, %cst_21 {dimension_numbers = #tpu.dot_dimension_numbers<[1], [0], [0], [1], [0, 0, 1, 1], [], []>} : vector<64x128xbf16>, vector<128x128xbf16>, vector<64x128xf32> -> vector<64x128xf32>
    %44 = arith.addf %37, %43 : vector<64x128xf32>
    %45 = vector.extract_strided_slice %1 {offsets = [2, 0, 0], sizes = [8, 8, 128], strides = [1, 1, 1]} : vector<10x10x128xf32> to vector<8x8x128xf32>
    %46 = vector.shape_cast %45 : vector<8x8x128xf32> to vector<64x128xf32>
    %47 = arith.truncf %46 : vector<64x128xf32> to vector<64x128xbf16>
    %c6 = arith.constant 6 : index
    %c0_22 = arith.constant 0 : index
    %c0_23 = arith.constant 0 : index
    %48 = vector.load %arg2[%c6, %c0_22, %c0_23] : memref<9x128x128xbf16, #tpu.memory_space<vmem>>, vector<1x128x128xbf16>
    %49 = vector.shape_cast %48 : vector<1x128x128xbf16> to vector<128x128xbf16>
    %cst_24 = arith.constant dense<0.000000e+00> : vector<64x128xf32>
    %50 = tpu.matmul %47, %49, %cst_24 {dimension_numbers = #tpu.dot_dimension_numbers<[1], [0], [0], [1], [0, 0, 1, 1], [], []>} : vector<64x128xbf16>, vector<128x128xbf16>, vector<64x128xf32> -> vector<64x128xf32>
    %51 = arith.addf %44, %50 : vector<64x128xf32>
    %52 = vector.extract_strided_slice %1 {offsets = [2, 1, 0], sizes = [8, 8, 128], strides = [1, 1, 1]} : vector<10x10x128xf32> to vector<8x8x128xf32>
    %53 = vector.shape_cast %52 : vector<8x8x128xf32> to vector<64x128xf32>
    %54 = arith.truncf %53 : vector<64x128xf32> to vector<64x128xbf16>
    %c7 = arith.constant 7 : index
    %c0_25 = arith.constant 0 : index
    %c0_26 = arith.constant 0 : index
    %55 = vector.load %arg2[%c7, %c0_25, %c0_26] : memref<9x128x128xbf16, #tpu.memory_space<vmem>>, vector<1x128x128xbf16>
    %56 = vector.shape_cast %55 : vector<1x128x128xbf16> to vector<128x128xbf16>
    %cst_27 = arith.constant dense<0.000000e+00> : vector<64x128xf32>
    %57 = tpu.matmul %54, %56, %cst_27 {dimension_numbers = #tpu.dot_dimension_numbers<[1], [0], [0], [1], [0, 0, 1, 1], [], []>} : vector<64x128xbf16>, vector<128x128xbf16>, vector<64x128xf32> -> vector<64x128xf32>
    %58 = arith.addf %51, %57 : vector<64x128xf32>
    %59 = vector.extract_strided_slice %1 {offsets = [2, 2, 0], sizes = [8, 8, 128], strides = [1, 1, 1]} : vector<10x10x128xf32> to vector<8x8x128xf32>
    %60 = vector.shape_cast %59 : vector<8x8x128xf32> to vector<64x128xf32>
    %61 = arith.truncf %60 : vector<64x128xf32> to vector<64x128xbf16>
    %c8 = arith.constant 8 : index
    %c0_28 = arith.constant 0 : index
    %c0_29 = arith.constant 0 : index
    %62 = vector.load %arg2[%c8, %c0_28, %c0_29] : memref<9x128x128xbf16, #tpu.memory_space<vmem>>, vector<1x128x128xbf16>
    %63 = vector.shape_cast %62 : vector<1x128x128xbf16> to vector<128x128xbf16>
    %cst_30 = arith.constant dense<0.000000e+00> : vector<64x128xf32>
    %64 = tpu.matmul %61, %63, %cst_30 {dimension_numbers = #tpu.dot_dimension_numbers<[1], [0], [0], [1], [0, 0, 1, 1], [], []>} : vector<64x128xbf16>, vector<128x128xbf16>, vector<64x128xf32> -> vector<64x128xf32>
    %65 = arith.addf %58, %64 : vector<64x128xf32>
    %c0_31 = arith.constant 0 : index
    %c0_32 = arith.constant 0 : index
    %66 = vector.load %arg3[%c0_31, %c0_32] : memref<1x128xf32, #tpu.memory_space<vmem>>, vector<1x128xf32>
    %67 = vector.broadcast %66 : vector<1x128xf32> to vector<64x128xf32>
    %68 = arith.addf %65, %67 : vector<64x128xf32>
    %cst_33 = arith.constant 0.000000e+00 : f32
    %69 = vector.broadcast %cst_33 : f32 to vector<64x128xf32>
    %70 = arith.maximumf %68, %69 : vector<64x128xf32>
    %c0_34 = arith.constant 0 : index
    %c0_35 = arith.constant 0 : index
    %c0_36 = arith.constant 0 : index
    %71 = vector.load %arg4[%c0_34, %c0_35, %c0_36] : memref<1x64x128xf32, #tpu.memory_space<vmem>>, vector<1x64x128xf32>
    %72 = vector.shape_cast %71 : vector<1x64x128xf32> to vector<64x128xf32>
    %73 = vector.shape_cast %70 : vector<64x128xf32> to vector<1x64x128xf32>
    tpu.vector_store %arg4[%c0_34, %c0_35, %c0_36], %73 {strides = array<i32>} : memref<1x64x128xf32, #tpu.memory_space<vmem>>, vector<1x64x128xf32>,
    return
  }
  func.func @transform_0(%arg0: i32) -> (i32, i32, i32, i32) {
    %c0_i32 = arith.constant 0 : i32
    %c0_i32_0 = arith.constant 0 : i32
    %c0_i32_1 = arith.constant 0 : i32
    %c0_i32_2 = arith.constant 0 : i32
    return %arg0, %c0_i32, %c0_i32_0, %c0_i32_1 : i32, i32, i32, i32
  }
  func.func @transform_1(%arg0: i32) -> (i32, i32, i32) {
    %c0_i32 = arith.constant 0 : i32
    %c0_i32_0 = arith.constant 0 : i32
    %c0_i32_1 = arith.constant 0 : i32
    %c0_i32_2 = arith.constant 0 : i32
    return %c0_i32, %c0_i32_0, %c0_i32_1 : i32, i32, i32
  }
  func.func @transform_2(%arg0: i32) -> (i32, i32) {
    %c0_i32 = arith.constant 0 : i32
    %c0_i32_0 = arith.constant 0 : i32
    %c0_i32_1 = arith.constant 0 : i32
    return %c0_i32, %c0_i32_0 : i32, i32
  }
  func.func @transform_3(%arg0: i32) -> (i32, i32, i32) {
    %c0_i32 = arith.constant 0 : i32
    %c0_i32_0 = arith.constant 0 : i32
    %c0_i32_1 = arith.constant 0 : i32
    return %arg0, %c0_i32, %c0_i32_0 : i32, i32, i32
  }
}

module attributes {stable_mosaic.version = 11 : i64} {
  func.func @_cx_kernel(%arg0: i32, %arg1: i32, %arg2: memref<1x128xf32, #tpu.memory_space<vmem>>, %arg3: memref<1x64x128xf32, #tpu.memory_space<vmem>>, %arg4: memref<1x64x128xf32, #tpu.memory_space<vmem>>, %arg5: memref<1x1x128xf32, #tpu.memory_space<vmem>>, %arg6: memref<1x64xf32, #tpu.memory_space<vmem>>) attributes {dimension_semantics = [#tpu.dimension_semantics<parallel>, #tpu.dimension_semantics<arbitrary>], iteration_bounds = array<i64: 2, 1>, scalar_prefetch = 0 : i64, scratch_operands = 1 : i64, tpu.core_type = #tpu.core_type<tc>, window_params = [{pipeline_mode = #tpu.pipeline_mode<synchronous>, transform_indices = @transform_0, window_bounds = array<i64: 1, 128>}, {transform_indices = @transform_1, window_bounds = array<i64: 1, 64, 128>}, {transform_indices = @transform_2, window_bounds = array<i64: 1, 64, 128>}, {transform_indices = @transform_3, window_bounds = array<i64: 1, 1, 128>}]} {
    %c0 = arith.constant 0 : index
    %c0_0 = arith.constant 0 : index
    %0 = vector.load %arg2[%c0, %c0_0] : memref<1x128xf32, #tpu.memory_space<vmem>>, vector<1x128xf32>
    %c0_1 = arith.constant 0 : index
    %c0_2 = arith.constant 0 : index
    %c0_3 = arith.constant 0 : index
    %1 = vector.load %arg3[%c0_1, %c0_2, %c0_3] : memref<1x64x128xf32, #tpu.memory_space<vmem>>, vector<1x64x128xf32>
    %2 = vector.shape_cast %1 : vector<1x64x128xf32> to vector<64x128xf32>
    %3 = vector.broadcast %0 : vector<1x128xf32> to vector<64x128xf32>
    %4 = arith.subf %2, %3 : vector<64x128xf32>
    %c0_4 = arith.constant 0 : index
    %c0_5 = arith.constant 0 : index
    %c0_6 = arith.constant 0 : index
    %5 = vector.load %arg4[%c0_4, %c0_5, %c0_6] : memref<1x64x128xf32, #tpu.memory_space<vmem>>, vector<1x64x128xf32>
    %6 = vector.shape_cast %5 : vector<1x64x128xf32> to vector<64x128xf32>
    %7 = vector.broadcast %0 : vector<1x128xf32> to vector<64x128xf32>
    %8 = arith.subf %6, %7 : vector<64x128xf32>
    %9 = arith.mulf %4, %4 : vector<64x128xf32>
    %cst = arith.constant dense<0.000000e+00> : vector<64xf32>
    %10 = vector.multi_reduction <add>, %9, %cst [1] : vector<64x128xf32> to vector<64xf32>
    %11 = vector.shape_cast %10 : vector<64xf32> to vector<64x1xf32>
    %cst_7 = arith.constant 1.000000e-24 : f32
    %12 = vector.broadcast %cst_7 : f32 to vector<64x1xf32>
    %13 = arith.maximumf %11, %12 : vector<64x1xf32>
    %14 = math.rsqrt %13 : vector<64x1xf32>
    %15 = vector.broadcast %14 : vector<64x1xf32> to vector<64x128xf32>
    %16 = arith.mulf %4, %15 : vector<64x128xf32>
    %17 = arith.mulf %8, %8 : vector<64x128xf32>
    %cst_8 = arith.constant dense<0.000000e+00> : vector<64xf32>
    %18 = vector.multi_reduction <add>, %17, %cst_8 [1] : vector<64x128xf32> to vector<64xf32>
    %19 = vector.shape_cast %18 : vector<64xf32> to vector<64x1xf32>
    %cst_9 = arith.constant 1.000000e-24 : f32
    %20 = vector.broadcast %cst_9 : f32 to vector<64x1xf32>
    %21 = arith.maximumf %19, %20 : vector<64x1xf32>
    %22 = math.rsqrt %21 : vector<64x1xf32>
    %23 = vector.broadcast %22 : vector<64x1xf32> to vector<64x128xf32>
    %24 = arith.mulf %8, %23 : vector<64x128xf32>
    %cst_10 = arith.constant dense<0.000000e+00> : vector<64x64xf32>
    %25 = tpu.matmul %16, %24, %cst_10 {dimension_numbers = #tpu.dot_dimension_numbers<[1], [1], [0], [0], [0, 0, 1, 0], [], []>} : vector<64x128xf32>, vector<64x128xf32>, vector<64x64xf32> -> vector<64x64xf32>
    %cst_11 = arith.constant 1.000000e+00 : f32
    %26 = vector.broadcast %cst_11 : f32 to vector<64x64xf32>
    %27 = arith.subf %26, %25 : vector<64x64xf32>
    %cst_12 = arith.constant dense<0x7F800000> : vector<64xf32>
    %28 = vector.multi_reduction <minimumf>, %27, %cst_12 [1] : vector<64x64xf32> to vector<64xf32>
    %29 = vector.shape_cast %28 : vector<64xf32> to vector<64x1xf32>
    %cst_13 = arith.constant 9.99999974E-6 : f32
    %30 = vector.broadcast %cst_13 : f32 to vector<64x1xf32>
    %31 = arith.addf %29, %30 : vector<64x1xf32>
    %32 = tpu.reciprocal %31 {approx = true} : vector<64x1xf32> -> vector<64x1xf32>
    %33 = vector.broadcast %32 : vector<64x1xf32> to vector<64x64xf32>
    %34 = arith.mulf %27, %33 : vector<64x64xf32>
    %cst_14 = arith.constant 1.000000e+00 : f32
    %35 = vector.broadcast %cst_14 : f32 to vector<64x64xf32>
    %36 = arith.subf %35, %34 : vector<64x64xf32>
    %cst_15 = arith.constant 2.000000e+00 : f32
    %37 = vector.broadcast %cst_15 : f32 to vector<64x64xf32>
    %38 = arith.mulf %36, %37 : vector<64x64xf32>
    %39 = math.exp %38 : vector<64x64xf32>
    %cst_16 = arith.constant dense<0.000000e+00> : vector<64xf32>
    %40 = vector.multi_reduction <add>, %39, %cst_16 [1] : vector<64x64xf32> to vector<64xf32>
    %41 = vector.shape_cast %40 : vector<64xf32> to vector<64x1xf32>
    %42 = tpu.reciprocal %41 {approx = true} : vector<64x1xf32> -> vector<64x1xf32>
    %43 = vector.broadcast %42 : vector<64x1xf32> to vector<64x64xf32>
    %44 = arith.mulf %39, %43 : vector<64x64xf32>
    %cst_17 = arith.constant dense<0xFF800000> : vector<64xf32>
    %45 = vector.multi_reduction <maximumf>, %44, %cst_17 [0] : vector<64x64xf32> to vector<64xf32>
    %46 = vector.shape_cast %45 : vector<64xf32> to vector<1x64xf32>
    %c0_i32 = arith.constant 0 : i32
    %47 = arith.cmpi eq, %arg1, %c0_i32 : i32
    %48 = arith.extui %47 : i1 to i32
    %c0_i32_18 = arith.constant 0 : i32
    %49 = arith.cmpi ne, %48, %c0_i32_18 : i32
    scf.if %49 {
      %cst_25 = arith.constant 0xFF800000 : f32
      %56 = vector.broadcast %cst_25 : f32 to vector<1x64xf32>
      %c0_26 = arith.constant 0 : index
      %c0_27 = arith.constant 0 : index
      %57 = vector.load %arg6[%c0_26, %c0_27] : memref<1x64xf32, #tpu.memory_space<vmem>>, vector<1x64xf32>
      tpu.vector_store %arg6[%c0_26, %c0_27], %56 {strides = array<i32>} : memref<1x64xf32, #tpu.memory_space<vmem>>, vector<1x64xf32>,
    } else {
    }
    %c0_19 = arith.constant 0 : index
    %c0_20 = arith.constant 0 : index
    %50 = vector.load %arg6[%c0_19, %c0_20] : memref<1x64xf32, #tpu.memory_space<vmem>>, vector<1x64xf32>
    %51 = arith.maximumf %50, %46 : vector<1x64xf32>
    %c0_21 = arith.constant 0 : index
    %c0_22 = arith.constant 0 : index
    %52 = vector.load %arg6[%c0_21, %c0_22] : memref<1x64xf32, #tpu.memory_space<vmem>>, vector<1x64xf32>
    tpu.vector_store %arg6[%c0_21, %c0_22], %51 {strides = array<i32>} : memref<1x64xf32, #tpu.memory_space<vmem>>, vector<1x64xf32>,
    %c0_i32_23 = arith.constant 0 : i32
    %53 = arith.cmpi eq, %arg1, %c0_i32_23 : i32
    %54 = arith.extui %53 : i1 to i32
    %c0_i32_24 = arith.constant 0 : i32
    %55 = arith.cmpi ne, %54, %c0_i32_24 : i32
    scf.if %55 {
      %c0_25 = arith.constant 0 : index
      %c0_26 = arith.constant 0 : index
      %56 = vector.load %arg6[%c0_25, %c0_26] : memref<1x64xf32, #tpu.memory_space<vmem>>, vector<1x64xf32>
      %cst_27 = arith.constant dense<0.000000e+00> : vector<1xf32>
      %57 = vector.multi_reduction <add>, %56, %cst_27 [1] : vector<1x64xf32> to vector<1xf32>
      %58 = vector.shape_cast %57 : vector<1xf32> to vector<1x1xf32>
      %cst_28 = arith.constant 6.400000e+01 : f32
      %59 = vector.broadcast %cst_28 : f32 to vector<1x1xf32>
      %60 = arith.divf %58, %59 : vector<1x1xf32>
      %cst_29 = arith.constant 9.99999974E-6 : f32
      %61 = vector.broadcast %cst_29 : f32 to vector<1x1xf32>
      %62 = arith.addf %60, %61 : vector<1x1xf32>
      %63 = math.log %62 : vector<1x1xf32>
      %cst_30 = arith.constant 0.000000e+00 : f32
      %64 = vector.broadcast %cst_30 : f32 to vector<1x1xf32>
      %65 = arith.subf %64, %63 : vector<1x1xf32>
      %66 = vector.shape_cast %65 : vector<1x1xf32> to vector<1x1x1xf32>
      %67 = vector.shape_cast %66 : vector<1x1x1xf32> to vector<1x1x1xf32>
      %68 = vector.broadcast %67 : vector<1x1x1xf32> to vector<1x1x128xf32>
      %c0_31 = arith.constant 0 : index
      %c0_32 = arith.constant 0 : index
      %c0_33 = arith.constant 0 : index
      %69 = vector.load %arg5[%c0_31, %c0_32, %c0_33] : memref<1x1x128xf32, #tpu.memory_space<vmem>>, vector<1x1x128xf32>
      tpu.vector_store %arg5[%c0_31, %c0_32, %c0_33], %68 {strides = array<i32>} : memref<1x1x128xf32, #tpu.memory_space<vmem>>, vector<1x1x128xf32>,
    } else {
    }
    return
  }
  func.func @transform_0(%arg0: i32, %arg1: i32) -> (i32, i32) {
    %c0_i32 = arith.constant 0 : i32
    %c0_i32_0 = arith.constant 0 : i32
    %c0_i32_1 = arith.constant 0 : i32
    return %c0_i32, %c0_i32_0 : i32, i32
  }
  func.func @transform_1(%arg0: i32, %arg1: i32) -> (i32, i32, i32) {
    %c0_i32 = arith.constant 0 : i32
    %c0_i32_0 = arith.constant 0 : i32
    return %arg0, %arg1, %c0_i32 : i32, i32, i32
  }
  func.func @transform_2(%arg0: i32, %arg1: i32) -> (i32, i32, i32) {
    %c0_i32 = arith.constant 0 : i32
    %c0_i32_0 = arith.constant 0 : i32
    %c0_i32_1 = arith.constant 0 : i32
    return %arg0, %c0_i32, %c0_i32_0 : i32, i32, i32
  }
  func.func @transform_3(%arg0: i32, %arg1: i32) -> (i32, i32, i32) {
    %c0_i32 = arith.constant 0 : i32
    %c0_i32_0 = arith.constant 0 : i32
    %c0_i32_1 = arith.constant 0 : i32
    return %arg0, %c0_i32, %c0_i32_0 : i32, i32, i32
  }
}

</mosaic_0001>

<bundles_post_ra>
// kernel: contextual_loss_forward.4
= control target key start
LH: loop header
LB: loop body
LE: loop exit
PB: predicated region body
PF: predicated region fallthrough
CT: control target
= control target key end

     0   :  { %s3550_s12 = smov 0   ;;  %s4462_s0 = inlined_call_operand.vmem [shape: f32[4,18,18,3], index: 0, kind: input, shape index: {}]   ;;  %s4463_s1 = inlined_call_operand.vmem [shape: bf16[9,3,128], index: 1, kind: input, shape index: {}]   ;;  %s4464_s2 = inlined_call_operand.vmem [shape: f32[1,128], index: 2, kind: input, shape index: {}]   ;;  %s4465_s3 = inlined_call_operand.vmem [shape: f32[4,256,128], index: 3, kind: output, shape index: {}]  }
   0x1 LB: > { %s2630_s13 = sadd.s32 4294967295, %s3527_s12   ;;  %p2634_p0 = scmp.ge.s32.totalorder %s3527_s12, 1  ;;  %s3527_s12 = sphi %s3550_s12, %s13_s12  }
   0x2   : > { %p137_p1 = scmp.lt.s32.totalorder %s3527_s12, 5 }
   0x4   : > { %p138_p2 = pnand %p2634_p0, %p137_p1 }
   0x6   : > { %141 = sbr.rel (%p138_p2) target bundleno = 531 (0x213), region = 32 }
   0xd   : > { %v2638_v0 = vld [vmem:[%s4463_s1 + $0x2] sm:$0x3]  ;;  %vm471_vm0 = vcmask 1040384   ;;  %vm472_vm1 = vcmask 1041408   ;;  %p161_p3 = scmp.lt.s32.totalorder %s2630_s13, 3  ;;  %v3529_v1 = vmov 65535  }
   0xe   : > { %v473_v2 = vsel %vm471_vm0, 4294967295, %v3529_v1  ;;  %v2705_v3 = vld [vmem:[%s4463_s1 + $0x8] sm:$0x3]  ;;  %v242_v5 = vld [vmem:[%s4463_s1] sm:$0x3]  ;;  %vm291_vm2 = vcmask 1046528  }
   0xf   : > { %v3564_v4 = vsel %vm472_vm1, %v473_v2, 0  ;;  %s4527_s13 = smov (!%p161_p3, %s2630_s13), 3  ;;  %v2722_v6 = vld [vmem:[%s4463_s1 + $0xa] sm:$0x3]  ;;  %vm422_vm3 = vcmask 23552   ;;  %vm851_vm4 = vcmask 1045504  }
  0x10   : > { %v476_v7 = vand.u32 %v2638_v0, %v3564_v4  ;;  %v3576_v8 = vand.u32 %v2705_v3, %v3564_v4  ;;  %v688_v9 = vand.u32 %v3564_v4, %v242_v5  ;;  %v3580_v10 = vand.u32 %v2722_v6, %v3564_v4  ;;  %s3511_s22 = smul.u32 432, %s4527_s13  ;;  %v2671_v23 = vld [vmem:[%s4463_s1 + $0x4] sm:$0x3]  ;;  %v2739_v33 = vld [vmem:[%s4463_s1 + $0xc] sm:$0x3]  ;;  %s2793_s11 = sshll.u32 %s4527_s13, 8 }
  0x11   : > { %v3664_v45 = vand.u32 %v2671_v23, %v3564_v4  ;;  %v3676_v51 = vand.u32 %v2739_v33, %v3564_v4  ;;  %s4390_s16 = scalar_lea.vmem %s4465_s3, %s2793_s11 }
  0x12   : > { %4492 = vst [vmem:[#allocation2_spill] sm:$0xff] %v3576_v8  ;;  %2947 = vmatprep.subr.bf16.mxu1 %v476_v7  ;;  %3083 = vmatprep.subr.bf16.mxu0 %v3576_v8  ;;  %s3588_s25 = scalar_lea.vmem %s4462_s0, %s3511_s22 }
  0x13   : > { %2948 = vmatpush3.bf16.msra.mxu1 %v476_v7  ;;  %3084 = vmatpush3.bf16.msra.mxu0 %v3576_v8  ;;  %v3591_v11 = vld [vmem:[%s3588_s25] sm:$0xff]  ;;  %v3594_v12 = vld [vmem:[%s3588_s25 + $0x8] sm:$0xff]  ;;  %v3597_v13 = vld [vmem:[%s3588_s25 + $0x10] sm:$0x3] }
  0x14   : > { %2981 = vmatprep.subr.bf16.mxu1 %v688_v9  ;;  %3117 = vmatprep.subr.bf16.mxu0 %v3580_v10  ;;  %v292_v14 = vrot.slane %v3591_v11, 1  ;;  %v293_v15 = vrot.slane %v3594_v12, 1  ;;  %v295_v16 = vrot.slane %v3597_v13, 1  ;;  %v3604_v17 = vld [vmem:[%s3588_s25 + $0x18] sm:$0xff]  ;;  %v3607_v18 = vld [vmem:[%s3588_s25 + $0x20] sm:$0xff]  ;;  %v3618_v22 = vld [vmem:[%s3588_s25 + $0x30] sm:$0xff] }
  0x15   : > { %v3610_v19 = vld [vmem:[%s3588_s25 + $0x28] sm:$0x3]  ;;  %v3614_v20 = vpack.c.bf16 %v3607_v18, %v3604_v17  ;;  %v297_v21 = vrot.slane %v3604_v17, 1  ;;  %v298_v26 = vrot.slane %v3607_v18, 1  ;;  %v3628_v28 = vld [vmem:[%s3588_s25 + $0x38] sm:$0xff]  ;;  %v3637_v32 = vld [vmem:[%s3588_s25 + $0x50] sm:$0xff] }
  0x16   : > { %v294_v24 = vsel %vm291_vm2, %v292_v14, %v293_v15  ;;  %v296_v25 = vsel %vm291_vm2, %v293_v15, %v295_v16  ;;  %v300_v27 = vrot.slane %v3610_v19, 1  ;;  %v3631_v29 = vld [vmem:[%s3588_s25 + $0x40] sm:$0x3]  ;;  %v3634_v31 = vld [vmem:[%s3588_s25 + $0x48] sm:$0xff]  ;;  %v302_v36 = vrot.slane %v3618_v22, 1  ;;  %v3661_v44 = vld [vmem:[%s3588_s25 + $0x78] sm:$0xff] }
  0x17   : > { %v404_v30 = vpack.c.bf16 %v296_v25, %v294_v24  ;;  %v299_v34 = vsel %vm291_vm2, %v297_v21, %v298_v26  ;;  %v303_v37 = vrot.slane %v3628_v28, 1  ;;  %v3647_v38 = vld [vmem:[%s3588_s25 + $0x58] sm:$0x3]  ;;  %v3650_v39 = vld [vmem:[%s3588_s25 + $0x60] sm:$0xff]  ;;  %v3653_v40 = vld [vmem:[%s3588_s25 + $0x68] sm:$0xff]  ;;  %v305_v42 = vrot.slane %v3631_v29, 1 }
  0x18   : > { %v301_v35 = vsel %vm291_vm2, %v298_v26, %v300_v27  ;;  %v3658_v43 = vld [vmem:[%s3588_s25 + $0x70] sm:$0x3]  ;;  %v307_v47 = vrot.slane %v3634_v31, 1  ;;  %v308_v48 = vrot.slane %v3637_v32, 1  ;;  %v3670_v49 = vld [vmem:[%s3588_s25 + $0x80] sm:$0xff]  ;;  %v310_v53 = vrot.slane %v3647_v38, 1 }
  0x19   : > { %2949 = vmatprep.mubr.msk.bf16.mxu1 %vm422_vm3, %v404_v30  ;;  %v405_v41 = vpack.c.bf16 %v301_v35, %v299_v34  ;;  %v304_v46 = vsel %vm291_vm2, %v302_v36, %v303_v37  ;;  %v3673_v50 = vld [vmem:[%s3588_s25 + $0x88] sm:$0x3]  ;;  %v306_v52 = vsel %vm291_vm2, %v303_v37, %v305_v42  ;;  %v312_v54 = vrot.slane %v3650_v39, 1  ;;  %v3707_v5 = vld [vmem:[%s3588_s25 + $0x90] sm:$0xff]  ;;  %v3710_v6 = vld [vmem:[%s3588_s25 + $0x98] sm:$0xff] }
  0x1a   : > { %v313_v55 = vrot.slane %v3653_v40, 1  ;;  %v3684_v56 = vpack.c.bf16 %v306_v52, %v304_v46  ;;  %v309_v57 = vsel %vm291_vm2, %v307_v47, %v308_v48  ;;  %v315_v58 = vrot.slane %v3658_v43, 1  ;;  %v3713_v7 = vld [vmem:[%s3588_s25 + $0xa0] sm:$0x3]  ;;  %v3723_v14 = vld [vmem:[%s3588_s25 + $0xb8] sm:$0x3] }
  0x1b   : > { %3085 = vmatprep.mubr.msk.bf16.mxu0 %vm422_vm3, %v405_v41  ;;  %2950 = vmatmul.mubr.msk.bf16.vlgmr.msra.gmra.mrb[0].mxu1 %vm422_vm3, %v405_v41  ;;  %v317_v59 = vrot.slane %v3661_v44, 1  ;;  %v311_v60 = vsel %vm291_vm2, %v308_v48, %v310_v53  ;;  %v318_v61 = vrot.slane %v3670_v49, 1  ;;  %v320_v62 = vrot.slane %v3673_v50, 1  ;;  %v3746_v34 = vld [vmem:[%s3588_s25 + $0xc0] sm:$0xff]  ;;  %v3749_v35 = vld [vmem:[%s3588_s25 + $0xc8] sm:$0xff] }
  0x1c   : > { %2982 = vmatpush3.bf16.msra.mxu1 %v688_v9  ;;  %4493 = vst [vmem:[#allocation3_spill] sm:$0xff] %v3684_v56  ;;  %3086 = vmatmul.mubr.msk.bf16.vlgmr.msra.gmra.mrb[0].mxu0 %vm422_vm3, %v3684_v56  ;;  %v3697_v63 = vpack.c.bf16 %v311_v60, %v309_v57  ;;  %v314_v0 = vsel %vm291_vm2, %v312_v54, %v313_v55  ;;  %v3717_v9 = vld [vmem:[%s3588_s25 + $0xa8] sm:$0xff]  ;;  %v322_v21 = vrot.slane %v3707_v5, 1  ;;  %v323_v23 = vrot.slane %v3710_v6, 1  ;;  %v3754_v41 = vld [vmem:[%s3588_s25 + $0xd0] sm:$0x3] }
  0x1d   : > { %3015 = vmatprep.subr.bf16.mxu1 %v3664_v45  ;;  %2953 = vmatprep.mubr.msk.bf16.mxu1 %vm422_vm3, %v3684_v56  ;;  %v316_v1 = vsel %vm291_vm2, %v313_v55, %v315_v58  ;;  %v319_v2 = vsel %vm291_vm2, %v317_v59, %v318_v61  ;;  %v321_v3 = vsel %vm291_vm2, %v318_v61, %v320_v62  ;;  %v325_v24 = vrot.slane %v3713_v7, 1  ;;  %v3777_v55 = vld [vmem:[%s3588_s25 + $0xe8] sm:$0x3]  ;;  %v3782_v59 = vld [vmem:[%s3588_s25 + $0xf0] sm:$0xff]  ;;  %v3785_v60 = vld [vmem:[%s3588_s25 + $0xf8] sm:$0xff] }
  0x1e   : > { %4494 = vst [vmem:[#allocation4_spill] sm:$0xff] %v3697_v63  ;;  %3118 = vmatpush3.bf16.msra.mxu0 %v3580_v10  ;;  %3089 = vmatprep.mubr.msk.bf16.mxu0 %vm422_vm3, %v3697_v63  ;;  %v3720_v10 = vld [vmem:[%s3588_s25 + $0xb0] sm:$0xff]  ;;  %v3725_v15 = vpack.c.bf16 %v316_v1, %v314_v0  ;;  %v3729_v16 = vpack.c.bf16 %v321_v3, %v319_v2  ;;  %v327_v25 = vrot.slane %v3717_v9, 1  ;;  %v330_v27 = vrot.slane %v3723_v14, 1  ;;  %v3794_v2 = vld [vmem:[%s3588_s25 + $0x100] sm:$0x3] }
  0x1f   : > { %3151 = vmatprep.subr.bf16.mxu0 %v3676_v51  ;;  %v328_v26 = vrot.slane %v3720_v10, 1  ;;  %v324_v30 = vsel %vm291_vm2, %v322_v21, %v323_v23  ;;  %v326_v33 = vsel %vm291_vm2, %v323_v23, %v325_v24  ;;  %v857_v42 = vrot.slane %v3604_v17, 2  ;;  %v3866_v56 = vld [vmem:[%s3588_s25 + $0x140] sm:$0xff] }
  0x20   : > { %4495 = vst [vmem:[#allocation5_spill] sm:$0xff] %v3725_v15  ;;  %4496 = vst [vmem:[#allocation6_spill] sm:$0xff] %v3729_v16  ;;  %v858_v46 = vrot.slane %v3607_v18, 2  ;;  %v860_v47 = vrot.slane %v3610_v19, 2  ;;  %v3759_v48 = vpack.c.bf16 %v326_v33, %v324_v30  ;;  %v332_v52 = vrot.slane %v3746_v34, 1  ;;  %v3771_v18 = vld [vmem:[%s3588_s25 + $0xd8] sm:$0xff] }
  0x21   : > { %v329_v36 = vsel %vm291_vm2, %v327_v25, %v328_v26  ;;  %v331_v37 = vsel %vm291_vm2, %v328_v26, %v330_v27  ;;  %v333_v53 = vrot.slane %v3749_v35, 1  ;;  %v335_v17 = vrot.slane %v3754_v41, 1  ;;  %v3774_v19 = vld [vmem:[%s3588_s25 + $0xe0] sm:$0xff]  ;;  %v3810_v33 = vld [vmem:[%s3588_s25 + $0x108] sm:$0xff] }
  0x22   : > { %4497 = vst [vmem:[#allocation7_spill] sm:$0xff] %v3759_v48  ;;  %v3765_v54 = vpack.c.bf16 %v331_v37, %v329_v36  ;;  %v862_v57 = vrot.slane %v3618_v22, 2  ;;  %v863_v58 = vrot.slane %v3628_v28, 2  ;;  %v865_v61 = vrot.slane %v3631_v29, 2  ;;  %v3813_v36 = vld [vmem:[%s3588_s25 + $0x110] sm:$0xff] }
  0x23   : > { %2954 = vmatmul.mubr.msk.bf16.gmra.mrb[4].mxu1 %vm422_vm3, %v3697_v63  ;;  %v334_v62 = vsel %vm291_vm2, %v332_v52, %v333_v53  ;;  %v859_v0 = vsel %vm851_vm4, %v857_v42, %v858_v46  ;;  %v861_v1 = vsel %vm851_vm4, %v858_v46, %v860_v47  ;;  %v336_v3 = vsel %vm291_vm2, %v333_v53, %v335_v17  ;;  %v3816_v37 = vld [vmem:[%s3588_s25 + $0x118] sm:$0x3]  ;;  %v3825_v53 = vld [vmem:[%s3588_s25 + $0x120] sm:$0xff] }
  0x24   : > { %2957 = vmatprep.mubr.msk.bf16.mxu1 %vm422_vm3, %v3725_v15  ;;  %3090 = vmatmul.mubr.msk.bf16.gmra.mrb[4].mxu0 %vm422_vm3, %v3725_v15  ;;  %4498 = vst [vmem:[#allocation8_spill] sm:$0xff] %v3765_v54  ;;  %v337_v29 = vrot.slane %v3771_v18, 1  ;;  %v338_v21 = vrot.slane %v3774_v19, 1  ;;  %v340_v23 = vrot.slane %v3777_v55, 1  ;;  %v342_v24 = vrot.slane %v3782_v59, 1  ;;  %v3863_v63 = vld [vmem:[%s3588_s25 + $0x138] sm:$0xff] }
  0x25   : > { %3093 = vmatprep.mubr.msk.bf16.mxu0 %vm422_vm3, %v3729_v16  ;;  %v343_v25 = vrot.slane %v3785_v60, 1  ;;  %v345_v26 = vrot.slane %v3794_v2, 1  ;;  %v3805_v27 = vpack.c.bf16 %v336_v3, %v334_v62  ;;  %v3807_v30 = vpack.c.bf16 %v861_v1, %v859_v0  ;;  %v3834_v3 = vld [vmem:[%s3588_s25 + $0x128] sm:$0xff] }
  0x26   : > { %v339_v42 = vsel %vm291_vm2, %v337_v29, %v338_v21  ;;  %v341_v46 = vsel %vm291_vm2, %v338_v21, %v340_v23  ;;  %v864_v47 = vsel %vm851_vm4, %v862_v57, %v863_v58  ;;  %v866_v52 = vsel %vm851_vm4, %v863_v58, %v865_v61  ;;  %v3837_v29 = vld [vmem:[%s3588_s25 + $0x130] sm:$0x3] }
  0x27   : > { %4499 = vst [vmem:[#allocation9_spill] sm:$0xff] %v3805_v27  ;;  %4500 = vst [vmem:[#allocation10_spill] sm:$0xff] %v3807_v30  ;;  %v344_v17 = vsel %vm291_vm2, %v342_v24, %v343_v25  ;;  %v867_v62 = vrot.slane %v3634_v31, 2  ;;  %v868_v0 = vrot.slane %v3637_v32, 2  ;;  %v870_v1 = vrot.slane %v3647_v38, 2 }
  0x28   : > { %v346_v57 = vsel %vm291_vm2, %v343_v25, %v345_v26  ;;  %v347_v58 = vrot.slane %v3810_v33, 1  ;;  %v348_v61 = vrot.slane %v3813_v36, 1  ;;  %v350_v21 = vrot.slane %v3816_v37, 1 }
  0x29   : > { %v3847_v38 = vpack.c.bf16 %v341_v46, %v339_v42  ;;  %v352_v23 = vrot.slane %v3825_v53, 1  ;;  %v353_v24 = vrot.slane %v3834_v3, 1  ;;  %v355_v25 = vrot.slane %v3837_v29, 1 }
  0x2a   : > { %v3852_v26 = vpack.c.bf16 %v866_v52, %v864_v47  ;;  %v351_v42 = vsel %vm291_vm2, %v348_v61, %v350_v21  ;;  %v872_v46 = vrot.slane %v3650_v39, 2  ;;  %v873_v15 = vrot.slane %v3653_v40, 2  ;;  %v2756_v47 = vld [vmem:[%s4463_s1 + $0xe] sm:$0x3] }
  0x2b   : > { %2958 = vmatmul.mubr.msk.bf16.gmra.mrb[8].mxu1 %vm422_vm3, %v3729_v16  ;;  %4501 = vst [vmem:[#allocation11_spill] sm:$0xff] %v3847_v38  ;;  %v349_v16 = vsel %vm291_vm2, %v347_v58, %v348_v61  ;;  %v875_v52 = vrot.slane %v3658_v43, 2  ;;  %v354_v58 = vsel %vm291_vm2, %v352_v23, %v353_v24  ;;  %v356_v61 = vsel %vm291_vm2, %v353_v24, %v355_v25 }
  0x2c   : > { %2961 = vmatprep.mubr.msk.bf16.mxu1 %vm422_vm3, %v3759_v48  ;;  %3094 = vmatmul.mubr.msk.bf16.gmra.mrb[8].mxu0 %vm422_vm3, %v3759_v48  ;;  %4502 = vst [vmem:[#allocation12_spill] sm:$0xff] %v3852_v26  ;;  %v869_v48 = vsel %vm851_vm4, %v867_v62, %v868_v0  ;;  %v878_v62 = vrot.slane %v3670_v49, 2  ;;  %v880_v43 = vrot.slane %v3673_v50, 2  ;;  %v357_v21 = vrot.slane %v3863_v63, 1 }
  0x2d   : > { %3097 = vmatprep.mubr.msk.bf16.mxu0 %vm422_vm3, %v3765_v54  ;;  %v358_v8 = vrot.slane %v3866_v56, 1  ;;  %v874_v50 = vsel %vm851_vm4, %v872_v46, %v873_v15  ;;  %v3910_v24 = vpack.c.bf16 %v3637_v32, %v3634_v31  ;;  %v876_v25 = vsel %vm851_vm4, %v873_v15, %v875_v52 }
  0x2e   : > { %v881_v31 = vsel %vm851_vm4, %v878_v62, %v880_v43  ;;  %v882_v52 = vrot.slane %v3707_v5, 2  ;;  %v3942_v43 = vpack.c.bf16 %v876_v25, %v874_v50  ;;  %v3962_v50 = vld [vmem:[%s3588_s25 + $0x178] sm:$0x3]  ;;  %v3966_v25 = vpack.c.bf16 %v3720_v10, %v3717_v9 }
  0x2f   : > { %v359_v46 = vsel %vm291_vm2, %v357_v21, %v358_v8 }
  0x30   : > { %4507 = vst [vmem:[#allocation17_spill] sm:$0xff] %v3942_v43 }
  0x33   : > { %2962 = vmatmul.mubr.msk.bf16.gmra.mrb[12].mxu1 %vm422_vm3, %v3765_v54  ;;  %v3854_v54 = vpack.c.bf16 %v346_v57, %v344_v17  ;;  %v877_v17 = vrot.slane %v3661_v44, 2 }
  0x34   : > { %2965 = vmatprep.mubr.msk.bf16.mxu1 %vm422_vm3, %v3805_v27  ;;  %3098 = vmatmul.mubr.msk.bf16.gmra.mrb[12].mxu0 %vm422_vm3, %v3805_v27  ;;  %v871_v27 = vsel %vm851_vm4, %v868_v0, %v870_v1  ;;  %v3875_v0 = vld [vmem:[%s3588_s25 + $0x148] sm:$0x3]  ;;  %v3879_v1 = vpack.c.bf16 %v3628_v28, %v3618_v22  ;;  %v3893_v22 = vld [vmem:[%s3588_s25 + $0x150] sm:$0xff]  ;;  %v3896_v28 = vld [vmem:[%s3588_s25 + $0x158] sm:$0xff] }
  0x35   : > { %3119 = vmatprep.mubr.msk.bf16.mxu0 %vm422_vm3, %v3807_v30  ;;  %4503 = vst [vmem:[#allocation13_spill] sm:$0xff] %v3854_v54  ;;  %v3883_v57 = vpack.c.bf16 %v871_v27, %v869_v48  ;;  %v3902_v48 = vand.u32 %v2756_v47, %v3564_v4  ;;  %v3904_v27 = vpack.c.bf16 %v351_v42, %v349_v16  ;;  %v360_v23 = vrot.slane %v3875_v0, 1 }
  0x36   : > { %v879_v47 = vsel %vm851_vm4, %v877_v17, %v878_v62  ;;  %v3920_v16 = vpack.c.bf16 %v3653_v40, %v3650_v39  ;;  %v362_v32 = vrot.slane %v3893_v22, 1  ;;  %v363_v15 = vrot.slane %v3896_v28, 1 }
  0x37   : > { %4504 = vst [vmem:[#allocation14_spill] sm:$0xff] %v3883_v57  ;;  %4505 = vst [vmem:[#allocation15_spill] sm:$0xff] %v3904_v27  ;;  %v883_v39 = vrot.slane %v3710_v6, 2  ;;  %v3934_v40 = vpack.c.bf16 %v3670_v49, %v3661_v44  ;;  %v885_v17 = vrot.slane %v3713_v7, 2  ;;  %v887_v62 = vrot.slane %v3717_v9, 2 }
  0x38   : > { %v3944_v21 = vpack.c.bf16 %v881_v31, %v879_v47  ;;  %v3951_v44 = vpack.c.bf16 %v3710_v6, %v3707_v5  ;;  %v890_v7 = vrot.slane %v3723_v14, 2  ;;  %v853_v5 = vrot.slane %v3594_v12, 2 }
  0x39   : > { %v855_v6 = vrot.slane %v3597_v13, 2  ;;  %v884_v31 = vsel %vm851_vm4, %v882_v52, %v883_v39  ;;  %v886_v14 = vsel %vm851_vm4, %v883_v39, %v885_v17  ;;  %v3980_v9 = vpack.c.bf16 %v3749_v35, %v3746_v34 }
  0x3a   : > { %4508 = vst [vmem:[#allocation18_spill] sm:$0xff] %v3944_v21  ;;  %v3997_v39 = vpack.c.bf16 %v3785_v60, %v3782_v59  ;;  %v4005_v17 = vpack.c.bf16 %v3834_v3, %v3825_v53  ;;  %v895_v30 = vrot.slane %v3754_v41, 2 }
  0x3b   : > { %2966 = vmatmul.mubr.msk.bf16.gmra.mrb[16].mxu1 %vm422_vm3, %v3847_v38  ;;  %v3899_v38 = vld [vmem:[%s3588_s25 + $0x160] sm:$0x3] }
  0x3c   : > { %2969 = vmatprep.mubr.msk.bf16.mxu1 %vm422_vm3, %v3854_v54  ;;  %3120 = vmatmul.mubr.msk.bf16.vlgmr.msra.gmra.mrb[0].mxu0 %vm422_vm3, %v3852_v26  ;;  %v3915_v54 = vpack.c.bf16 %v356_v61, %v354_v58  ;;  %v365_v42 = vrot.slane %v3899_v38, 1  ;;  %v888_v58 = vrot.slane %v3720_v10, 2  ;;  %v852_v61 = vrot.slane %v3591_v11, 2 }
  0x3d   : > { %3152 = vmatpush3.bf16.msra.mxu0 %v3676_v51  ;;  %3123 = vmatprep.mubr.msk.bf16.mxu0 %vm422_vm3, %v3883_v57  ;;  %v361_v51 = vsel %vm291_vm2, %v358_v8, %v360_v23  ;;  %v3947_v57 = vld [vmem:[%s3588_s25 + $0x168] sm:$0xff]  ;;  %v364_v8 = vsel %vm291_vm2, %v362_v32, %v363_v15  ;;  %v3959_v23 = vld [vmem:[%s3588_s25 + $0x170] sm:$0xff] }
  0x3e   : > { %4506 = vst [vmem:[#allocation16_spill] sm:$0xff] %v3915_v54  ;;  %3185 = vmatprep.subr.bf16.mxu0 %v3902_v48  ;;  %v366_v49 = vsel %vm291_vm2, %v363_v15, %v365_v42  ;;  %v3972_v47 = vpack.c.bf16 %v361_v51, %v359_v46  ;;  %v889_v32 = vsel %vm851_vm4, %v887_v62, %v888_v58  ;;  %v367_v15 = vrot.slane %v3947_v57, 1 }
  0x3f   : > { %v3984_v13 = vpack.c.bf16 %v366_v49, %v364_v8  ;;  %v368_v10 = vrot.slane %v3959_v23, 1  ;;  %v370_v42 = vrot.slane %v3962_v50, 1  ;;  %v3990_v46 = vpack.c.bf16 %v3774_v19, %v3771_v18 }
  0x40   : > { %v891_v52 = vsel %vm851_vm4, %v888_v58, %v890_v7  ;;  %v4001_v51 = vpack.c.bf16 %v3813_v36, %v3810_v33  ;;  %v4009_v62 = vpack.c.bf16 %v3866_v56, %v3863_v63  ;;  %v4013_v8 = vpack.c.bf16 %v3896_v28, %v3893_v22 }
  0x41   : > { %v4017_v58 = vpack.c.bf16 %v3959_v23, %v3947_v57  ;;  %v4020_v49 = vsel %vm851_vm4, %v852_v61, %v853_v5  ;;  %v4023_v7 = vsel %vm851_vm4, %v853_v5, %v855_v6  ;;  %v369_v26 = vsel %vm291_vm2, %v367_v15, %v368_v10 }
  0x42   : > { %v893_v61 = vrot.slane %v3749_v35, 2  ;;  %v371_v5 = vsel %vm291_vm2, %v368_v10, %v370_v42  ;;  %v898_v6 = vrot.slane %v3774_v19, 2  ;;  %v910_v10 = vrot.slane %v3816_v37, 2  ;;  %v2688_v42 = vld [vmem:[%s4463_s1 + $0x6] sm:$0x3] }
  0x43   : > { %2970 = vmatmul.mubr.msk.bf16.gmra.mrb[20].mxu1 %vm422_vm3, %v3904_v27  ;;  %v892_v27 = vrot.slane %v3746_v34, 2  ;;  %v897_v34 = vrot.slane %v3771_v18, 2  ;;  %v4047_v35 = vpack.c.bf16 %v371_v5, %v369_v26  ;;  %v902_v26 = vrot.slane %v3782_v59, 2 }
  0x44   : > { %2973 = vmatprep.mubr.msk.bf16.mxu1 %vm422_vm3, %v3915_v54  ;;  %3124 = vmatmul.mubr.msk.bf16.gmra.mrb[4].mxu0 %vm422_vm3, %v3942_v43  ;;  %v4025_v54 = vpack.c.bf16 %v886_v14, %v884_v31  ;;  %v4032_v43 = vpack.c.bf16 %v891_v52, %v889_v32  ;;  %v900_v31 = vrot.slane %v3777_v55, 2  ;;  %v896_v14 = vsel %vm851_vm4, %v893_v61, %v895_v30 }
  0x45   : > { %3127 = vmatprep.mubr.msk.bf16.mxu0 %vm422_vm3, %v3944_v21  ;;  %v964_v21 = vpack.c.bf16 %v4023_v7, %v4020_v49  ;;  %v894_v41 = vsel %vm851_vm4, %v892_v27, %v893_v61  ;;  %v226_v32 = vpack.c.bf16 %v3594_v12, %v3591_v11  ;;  %v899_v18 = vsel %vm851_vm4, %v897_v34, %v898_v6  ;;  %v4513_v49 = vld [vmem:[#allocation17_spill] sm:$0xff]  ;;  %v4514_v7 = vld [vmem:[#allocation18_spill] sm:$0xff] }
  0x46   : > { %v901_v19 = vsel %vm851_vm4, %v898_v6, %v900_v31  ;;  %v4055_v55 = vpack.c.bf16 %v896_v14, %v894_v41  ;;  %v903_v27 = vrot.slane %v3785_v60, 2  ;;  %v905_v30 = vrot.slane %v3794_v2, 2 }
  0x47   : > { %v4059_v15 = vpack.c.bf16 %v901_v19, %v899_v18  ;;  %v907_v11 = vrot.slane %v3810_v33, 2  ;;  %v908_v12 = vrot.slane %v3813_v36, 2  ;;  %v4080_v36 = vand.u32 %v2688_v42, %v3564_v4 }
  0x48   : > { %v904_v59 = vsel %vm851_vm4, %v902_v26, %v903_v27  ;;  %v906_v60 = vsel %vm851_vm4, %v903_v27, %v905_v30  ;;  %v912_v61 = vrot.slane %v3825_v53, 2  ;;  %v913_v5 = vrot.slane %v3834_v3, 2  ;;  %v220_v30 = vld [vmem:[%s3588_s25 + $0x180] sm:$0xff] }
  0x49   : > { %v909_v2 = vsel %vm851_vm4, %v907_v11, %v908_v12  ;;  %v911_v33 = vsel %vm851_vm4, %v908_v12, %v910_v10  ;;  %v4082_v37 = vpack.c.bf16 %v906_v60, %v904_v59  ;;  %v915_v34 = vrot.slane %v3837_v29, 2  ;;  %v222_v11 = vld [vmem:[%s3588_s25 + $0x190] sm:$0x3] }
  0x4a   : > { %v4086_v52 = vpack.c.bf16 %v911_v33, %v909_v2  ;;  %v917_v6 = vrot.slane %v3863_v63, 2  ;;  %v918_v31 = vrot.slane %v3866_v56, 2  ;;  %v920_v41 = vrot.slane %v3875_v0, 2 }
  0x4b   : > { %2974 = vmatmul.mubr.msk.bf16.gmra.mrb[24].mxu1 %vm422_vm3, %v3972_v47  ;;  %v914_v53 = vsel %vm851_vm4, %v912_v61, %v913_v5  ;;  %v922_v0 = vrot.slane %v3893_v22, 2  ;;  %v923_v14 = vrot.slane %v3896_v28, 2  ;;  %v927_v18 = vrot.slane %v3947_v57, 2  ;;  %v221_v57 = vld [vmem:[%s3588_s25 + $0x188] sm:$0xff] }
  0x4c   : > { %2977 = vmatprep.mubr.msk.bf16.mxu1 %vm422_vm3, %v3984_v13  ;;  %3128 = vmatmul.mubr.msk.bf16.gmra.mrb[8].mxu0 %vm422_vm3, %v4025_v54  ;;  %v919_v3 = vsel %vm851_vm4, %v917_v6, %v918_v31  ;;  %v921_v63 = vsel %vm851_vm4, %v918_v31, %v920_v41  ;;  %v928_v19 = vrot.slane %v3959_v23, 2  ;;  %v930_v26 = vrot.slane %v3962_v50, 2  ;;  %v2773_v41 = vld [vmem:[%s4463_s1 + $0x10] sm:$0x3] }
  0x4d   : > { %3131 = vmatprep.mubr.msk.bf16.mxu0 %vm422_vm3, %v4032_v43  ;;  %v4110_v56 = vpack.c.bf16 %v921_v63, %v919_v3  ;;  %v924_v22 = vsel %vm851_vm4, %v922_v0, %v923_v14  ;;  %v1640_v12 = vrot.slane %v220_v30, 2  ;;  %v1641_v10 = vrot.slane %v221_v57, 2  ;;  %v223_v3 = vld [vmem:[%s3588_s25 + $0x198] sm:$0xff]  ;;  %v224_v63 = vld [vmem:[%s3588_s25 + $0x1a0] sm:$0xff] }
  0x4e   : > { %v931_v27 = vsel %vm851_vm4, %v928_v19, %v930_v26  ;;  %v1643_v42 = vrot.slane %v222_v11, 2  ;;  %v1431_v59 = vrot.slane %v220_v30, 1  ;;  %v1432_v60 = vrot.slane %v221_v57, 1 }
  0x4f   : > { %v1434_v2 = vrot.slane %v222_v11, 1  ;;  %v1642_v33 = vsel %vm851_vm4, %v1640_v12, %v1641_v10  ;;  %v2263_v0 = vrot.slane %v223_v3, 2  ;;  %v4519_v11 = vld [vmem:[#allocation7_spill] sm:$0xff]  ;;  %v4520_v12 = vld [vmem:[#allocation8_spill] sm:$0xff] }
  0x50   : > { %v1644_v61 = vsel %vm851_vm4, %v1641_v10, %v1643_v42  ;;  %v4521_v10 = vld [vmem:[#allocation9_spill] sm:$0xff]  ;;  %v4522_v42 = vld [vmem:[#allocation11_spill] sm:$0xff] }
  0x51   : > { %v4149_v31 = vpack.c.bf16 %v1644_v61, %v1642_v33 }
  0x53   : > { %2978 = vmatmul.mubr.msk.bf16.gmra.mrb[28].mxu1 %vm422_vm3, %v4047_v35 }
  0x54   : > { %2983 = vmatprep.mubr.msk.bf16.mxu1 %vm422_vm3, %v226_v32  ;;  %3132 = vmatmul.mubr.msk.bf16.gmra.mrb[12].mxu0 %vm422_vm3, %v4055_v55  ;;  %v925_v32 = vrot.slane %v3899_v38, 2  ;;  %v929_v38 = vsel %vm851_vm4, %v927_v18, %v928_v19  ;;  %v1849_v19 = vpack.c.bf16 %v224_v63, %v223_v3 }
  0x55   : > { %3135 = vmatprep.mubr.msk.bf16.mxu0 %vm422_vm3, %v4059_v15  ;;  %v4135_v50 = vpack.c.bf16 %v931_v27, %v929_v38  ;;  %v4515_v38 = vld [vmem:[#allocation3_spill] sm:$0xff]  ;;  %v4516_v27 = vld [vmem:[#allocation4_spill] sm:$0xff] }
  0x56   : > { %v926_v28 = vsel %vm851_vm4, %v923_v14, %v925_v32  ;;  %v2264_v14 = vrot.slane %v224_v63, 2  ;;  %v225_v32 = vld [vmem:[%s3588_s25 + $0x1a8] sm:$0x3] }
  0x57   : > { %v4131_v23 = vpack.c.bf16 %v926_v28, %v924_v22  ;;  %v2266_v18 = vrot.slane %v225_v32, 2 }
  0x58   : > { %v4232_v26 = vsel %vm851_vm4, %v2263_v0, %v2264_v14 }
  0x59   : > { %v4235_v22 = vsel %vm851_vm4, %v2264_v14, %v2266_v18 }
  0x5a   : > { %v2270_v28 = vpack.c.bf16 %v4235_v22, %v4232_v26 }
  0x5b   : > { %2984 = vmatmul.mubr.msk.bf16.vlgmr.msra.gmra.mrb[0].mxu1 %vm422_vm3, %v3614_v20 }
  0x5c   : > { %3016 = vmatpush3.bf16.msra.mxu1 %v3664_v45  ;;  %2987 = vmatprep.mubr.msk.bf16.mxu1 %vm422_vm3, %v3879_v1  ;;  %v916_v45 = vsel %vm851_vm4, %v913_v5, %v915_v34  ;;  %v1433_v5 = vsel %vm291_vm2, %v1431_v59, %v1432_v60  ;;  %v1435_v34 = vsel %vm291_vm2, %v1432_v60, %v1434_v2  ;;  %v4523_v59 = vld [vmem:[#allocation13_spill] sm:$0xff]  ;;  %v4524_v60 = vld [vmem:[#allocation15_spill] sm:$0xff]  ;;  %v4525_v2 = vld [vmem:[#allocation16_spill] sm:$0xff] }
  0x5d   : > { %3049 = vmatprep.subr.bf16.mxu1 %v4080_v36  ;;  %3136 = vmatmul.mubr.msk.bf16.gmra.mrb[16].mxu0 %vm422_vm3, %v4082_v37  ;;  %v4106_v29 = vpack.c.bf16 %v916_v45, %v914_v53  ;;  %v4147_v6 = vpack.c.bf16 %v1435_v34, %v1433_v5  ;;  %v2277_v53 = vand.u32 %v2773_v41, %v3564_v4  ;;  %v4509_v4 = vld [vmem:[#allocation10_spill] sm:$0xff] }
  0x5e   : > { %3139 = vmatprep.mubr.msk.bf16.mxu0 %vm422_vm3, %v4086_v52  ;;  %v4511_v45 = vld [vmem:[#allocation2_spill] sm:$0xff] }
  0x63   : > { %2988 = vmatmul.mubr.msk.bf16.gmra.mrb[4].mxu1 %vm422_vm3, %v3910_v24 }
  0x64   : > { %2991 = vmatprep.mubr.msk.bf16.mxu1 %vm422_vm3, %v3920_v16 }
  0x65   : > { %3140 = vmatmul.mubr.msk.bf16.gmra.mrb[20].mxu0 %vm422_vm3, %v4106_v29 }
  0x66   : > { %3143 = vmatprep.mubr.msk.bf16.mxu0 %vm422_vm3, %v4110_v56 }
  0x6b   : > { %2992 = vmatmul.mubr.msk.bf16.gmra.mrb[8].mxu1 %vm422_vm3, %v3934_v40 }
  0x6c   : > { %2995 = vmatprep.mubr.msk.bf16.mxu1 %vm422_vm3, %v3951_v44 }
  0x6d   : > { %3144 = vmatmul.mubr.msk.bf16.gmra.mrb[24].mxu0 %vm422_vm3, %v4131_v23 }
  0x6e   : > { %3147 = vmatprep.mubr.msk.bf16.mxu0 %vm422_vm3, %v4135_v50 }
  0x73   : > { %2996 = vmatmul.mubr.msk.bf16.gmra.mrb[12].mxu1 %vm422_vm3, %v3966_v25 }
  0x74   : > { %2999 = vmatprep.mubr.msk.bf16.mxu1 %vm422_vm3, %v3980_v9 }
  0x75   : > { %3148 = vmatmul.mubr.msk.bf16.gmra.mrb[28].mxu0 %vm422_vm3, %v4149_v31 }
  0x76   : > { %3153 = vmatprep.mubr.msk.bf16.mxu0 %vm422_vm3, %v3879_v1 }
  0x7b   : > { %3000 = vmatmul.mubr.msk.bf16.gmra.mrb[16].mxu1 %vm422_vm3, %v3990_v46 }
  0x7c   : > { %3003 = vmatprep.mubr.msk.bf16.mxu1 %vm422_vm3, %v3997_v39 }
  0x7d   : > { %3154 = vmatmul.mubr.msk.bf16.vlgmr.msra.gmra.mrb[0].mxu0 %vm422_vm3, %v3910_v24 }
  0x7e   : > { %3186 = vmatpush3.bf16.msra.mxu0 %v3902_v48  ;;  %3157 = vmatprep.mubr.msk.bf16.mxu0 %vm422_vm3, %v3920_v16  ;;  %v4510_v48 = vld [vmem:[#allocation12_spill] sm:$0xff] }
  0x7f   : > { %3219 = vmatprep.subr.bf16.mxu0 %v2277_v53 }
  0x83   : > { %3004 = vmatmul.mubr.msk.bf16.gmra.mrb[20].mxu1 %vm422_vm3, %v4001_v51 }
  0x84   : > { %3007 = vmatprep.mubr.msk.bf16.mxu1 %vm422_vm3, %v4005_v17 }
  0x85   : > { %3158 = vmatmul.mubr.msk.bf16.gmra.mrb[4].mxu0 %vm422_vm3, %v3934_v40 }
  0x86   : > { %3161 = vmatprep.mubr.msk.bf16.mxu0 %vm422_vm3, %v3951_v44 }
  0x8b   : > { %3008 = vmatmul.mubr.msk.bf16.gmra.mrb[24].mxu1 %vm422_vm3, %v4009_v62 }
  0x8c   : > { %3011 = vmatprep.mubr.msk.bf16.mxu1 %vm422_vm3, %v4013_v8 }
  0x8d   : > { %3162 = vmatmul.mubr.msk.bf16.gmra.mrb[8].mxu0 %vm422_vm3, %v3966_v25 }
  0x8e   : > { %3165 = vmatprep.mubr.msk.bf16.mxu0 %vm422_vm3, %v3980_v9 }
  0x93   : > { %3012 = vmatmul.mubr.msk.bf16.gmra.mrb[28].mxu1 %vm422_vm3, %v4017_v58 }
  0x94   : > { %3017 = vmatprep.mubr.msk.bf16.mxu1 %vm422_vm3, %v964_v21  ;;  %v4512_v21 = vld [vmem:[#allocation14_spill] sm:$0xff] }
  0x95   : > { %3166 = vmatmul.mubr.msk.bf16.gmra.mrb[12].mxu0 %vm422_vm3, %v3990_v46 }
  0x96   : > { %3169 = vmatprep.mubr.msk.bf16.mxu0 %vm422_vm3, %v3997_v39 }
  0x9b   : > { %3018 = vmatmul.mubr.msk.bf16.vlgmr.msra.gmra.mrb[0].mxu1 %vm422_vm3, %v4509_v4 }
  0x9c   : > { %3050 = vmatpush3.bf16.msra.mxu1 %v4080_v36  ;;  %3021 = vmatprep.mubr.msk.bf16.mxu1 %vm422_vm3, %v4510_v48  ;;  %v4218_v36 = vpack.c.bf16 %v221_v57, %v220_v30  ;;  %v4517_v30 = vld [vmem:[#allocation5_spill] sm:$0xff]  ;;  %v4518_v57 = vld [vmem:[#allocation6_spill] sm:$0xff] }
  0x9d   : > { %3253 = vmatprep.subr.bf16.mxu1 %v4511_v45  ;;  %3170 = vmatmul.mubr.msk.bf16.gmra.mrb[16].mxu0 %vm422_vm3, %v4001_v51 }
  0x9e   : > { %3173 = vmatprep.mubr.msk.bf16.mxu0 %vm422_vm3, %v4005_v17 }
  0xa3   : > { %3022 = vmatmul.mubr.msk.bf16.gmra.mrb[4].mxu1 %vm422_vm3, %v4512_v21 }
  0xa4   : > { %3025 = vmatprep.mubr.msk.bf16.mxu1 %vm422_vm3, %v4513_v49 }
  0xa5   : > { %3174 = vmatmul.mubr.msk.bf16.gmra.mrb[20].mxu0 %vm422_vm3, %v4009_v62 }
  0xa6   : > { %3177 = vmatprep.mubr.msk.bf16.mxu0 %vm422_vm3, %v4013_v8 }
  0xab   : > { %3026 = vmatmul.mubr.msk.bf16.gmra.mrb[8].mxu1 %vm422_vm3, %v4514_v7 }
  0xac   : > { %3029 = vmatprep.mubr.msk.bf16.mxu1 %vm422_vm3, %v4025_v54 }
  0xad   : > { %3178 = vmatmul.mubr.msk.bf16.gmra.mrb[24].mxu0 %vm422_vm3, %v4017_v58 }
  0xae   : > { %3181 = vmatprep.mubr.msk.bf16.mxu0 %vm422_vm3, %v4218_v36 }
  0xb3   : > { %3030 = vmatmul.mubr.msk.bf16.gmra.mrb[12].mxu1 %vm422_vm3, %v4032_v43 }
  0xb4   : > { %3033 = vmatprep.mubr.msk.bf16.mxu1 %vm422_vm3, %v4055_v55 }
  0xb5   : > { %3182 = vmatmul.mubr.msk.bf16.gmra.mrb[28].mxu0 %vm422_vm3, %v1849_v19 }
  0xb6   : > { %3187 = vmatprep.mubr.msk.bf16.mxu0 %vm422_vm3, %v4515_v38 }
  0xbb   : > { %3034 = vmatmul.mubr.msk.bf16.gmra.mrb[16].mxu1 %vm422_vm3, %v4059_v15 }
  0xbc   : > { %3037 = vmatprep.mubr.msk.bf16.mxu1 %vm422_vm3, %v4082_v37 }
  0xbd   : > { %3188 = vmatmul.mubr.msk.bf16.vlgmr.msra.gmra.mrb[0].mxu0 %vm422_vm3, %v4516_v27 }
  0xbe   : > { %3220 = vmatpush3.bf16.msra.mxu0 %v2277_v53  ;;  %3191 = vmatprep.mubr.msk.bf16.mxu0 %vm422_vm3, %v4517_v30 }
  0xc3   : > { %3038 = vmatmul.mubr.msk.bf16.gmra.mrb[20].mxu1 %vm422_vm3, %v4086_v52 }
  0xc4   : > { %3041 = vmatprep.mubr.msk.bf16.mxu1 %vm422_vm3, %v4106_v29 }
  0xc5   : > { %3192 = vmatmul.mubr.msk.bf16.gmra.mrb[4].mxu0 %vm422_vm3, %v4518_v57 }
  0xc6   : > { %3195 = vmatprep.mubr.msk.bf16.mxu0 %vm422_vm3, %v4519_v11 }
  0xcb   : > { %3042 = vmatmul.mubr.msk.bf16.gmra.mrb[24].mxu1 %vm422_vm3, %v4110_v56 }
  0xcc   : > { %3045 = vmatprep.mubr.msk.bf16.mxu1 %vm422_vm3, %v4131_v23 }
  0xcd   : > { %3196 = vmatmul.mubr.msk.bf16.gmra.mrb[8].mxu0 %vm422_vm3, %v4520_v12 }
  0xce   : > { %3199 = vmatprep.mubr.msk.bf16.mxu0 %vm422_vm3, %v4521_v10 }
  0xd3   : > { %3046 = vmatmul.mubr.msk.bf16.gmra.mrb[28].mxu1 %vm422_vm3, %v4135_v50 }
  0xd4   : > { %3051 = vmatprep.mubr.msk.bf16.mxu1 %vm422_vm3, %v3614_v20  ;;  %v2054_v20 = vrot.slane %v223_v3, 1 }
  0xd5   : > { %3200 = vmatmul.mubr.msk.bf16.gmra.mrb[12].mxu0 %vm422_vm3, %v4522_v42 }
  0xd6   : > { %3203 = vmatprep.mubr.msk.bf16.mxu0 %vm422_vm3, %v4523_v59 }
  0xdb   : > { %3052 = vmatmul.mubr.msk.bf16.vlgmr.msra.gmra.mrb[0].mxu1 %vm422_vm3, %v3879_v1  ;;  %v2055_v1 = vrot.slane %v224_v63, 1 }
  0xdc   : > { %3254 = vmatpush3.bf16.msra.mxu1 %v4511_v45  ;;  %3055 = vmatprep.mubr.msk.bf16.mxu1 %vm422_vm3, %v3910_v24  ;;  %v2057_v24 = vrot.slane %v225_v32, 1 }
  0xdd   : > { %3204 = vmatmul.mubr.msk.bf16.gmra.mrb[16].mxu0 %vm422_vm3, %v4524_v60 }
  0xde   : > { %3207 = vmatprep.mubr.msk.bf16.mxu0 %vm422_vm3, %v4525_v2 }
  0xe3   : > { %3056 = vmatmul.mubr.msk.bf16.gmra.mrb[4].mxu1 %vm422_vm3, %v3920_v16  ;;  %v2056_v16 = vsel %vm291_vm2, %v2054_v20, %v2055_v1 }
  0xe4   : > { %3059 = vmatprep.mubr.msk.bf16.mxu1 %vm422_vm3, %v3934_v40  ;;  %v2058_v40 = vsel %vm291_vm2, %v2055_v1, %v2057_v24 }
  0xe5   : > { %3208 = vmatmul.mubr.msk.bf16.gmra.mrb[20].mxu0 %vm422_vm3, %v3972_v47  ;;  %v2061_v33 = vpack.c.bf16 %v2058_v40, %v2056_v16 }
  0xe6   : > { %3211 = vmatprep.mubr.msk.bf16.mxu0 %vm422_vm3, %v3984_v13 }
  0xeb   : > { %3060 = vmatmul.mubr.msk.bf16.gmra.mrb[8].mxu1 %vm422_vm3, %v3951_v44 }
  0xec   : > { %3063 = vmatprep.mubr.msk.bf16.mxu1 %vm422_vm3, %v3966_v25 }
  0xed   : > { %3212 = vmatmul.mubr.msk.bf16.gmra.mrb[24].mxu0 %vm422_vm3, %v4047_v35 }
  0xee   : > { %3215 = vmatprep.mubr.msk.bf16.mxu0 %vm422_vm3, %v4147_v6 }
  0xf3   : > { %3064 = vmatmul.mubr.msk.bf16.gmra.mrb[12].mxu1 %vm422_vm3, %v3980_v9 }
  0xf4   : > { %3067 = vmatprep.mubr.msk.bf16.mxu1 %vm422_vm3, %v3990_v46 }
  0xf5   : > { %3216 = vmatmul.mubr.msk.bf16.gmra.mrb[28].mxu0 %vm422_vm3, %v2061_v33 }
  0xf6   : > { %3221 = vmatprep.mubr.msk.bf16.mxu0 %vm422_vm3, %v4510_v48 }
  0xfb   : > { %3068 = vmatmul.mubr.msk.bf16.gmra.mrb[16].mxu1 %vm422_vm3, %v3997_v39 }
  0xfc   : > { %3071 = vmatprep.mubr.msk.bf16.mxu1 %vm422_vm3, %v4001_v51 }
  0xfd   : > { %3222 = vmatmul.mubr.msk.bf16.vlgmr.msra.gmra.mrb[0].mxu0 %vm422_vm3, %v4512_v21 }
  0xfe   : > { %3225 = vmatprep.mubr.msk.bf16.mxu0 %vm422_vm3, %v4513_v49 }
 0x103   : > { %3072 = vmatmul.mubr.msk.bf16.gmra.mrb[20].mxu1 %vm422_vm3, %v4005_v17 }
 0x104   : > { %3075 = vmatprep.mubr.msk.bf16.mxu1 %vm422_vm3, %v4009_v62 }
 0x105   : > { %3226 = vmatmul.mubr.msk.bf16.gmra.mrb[4].mxu0 %vm422_vm3, %v4514_v7 }
 0x106   : > { %3229 = vmatprep.mubr.msk.bf16.mxu0 %vm422_vm3, %v4025_v54 }
 0x10b   : > { %3076 = vmatmul.mubr.msk.bf16.gmra.mrb[24].mxu1 %vm422_vm3, %v4013_v8 }
 0x10c   : > { %3079 = vmatprep.mubr.msk.bf16.mxu1 %vm422_vm3, %v4017_v58 }
 0x10d   : > { %3230 = vmatmul.mubr.msk.bf16.gmra.mrb[8].mxu0 %vm422_vm3, %v4032_v43 }
 0x10e   : > { %3233 = vmatprep.mubr.msk.bf16.mxu0 %vm422_vm3, %v4055_v55 }
 0x113   : > { %3080 = vmatmul.mubr.msk.bf16.gmra.mrb[28].mxu1 %vm422_vm3, %v4218_v36 }
 0x114   : > { %3101 = vmatprep.mubr.msk.bf16.mxu1 %vm422_vm3, %v4522_v42 }
 0x115   : > { %3234 = vmatmul.mubr.msk.bf16.gmra.mrb[12].mxu0 %vm422_vm3, %v4059_v15 }
 0x116   : > { %3237 = vmatprep.mubr.msk.bf16.mxu0 %vm422_vm3, %v4082_v37  ;;  %v4383_v37 = vld [vmem:[%s4464_s2] ss:$0 sm:$0xff] }
 0x11b   : > { %3102 = vmatmul.mubr.msk.bf16.vlgmr.msra.gmra.mrb[16].mxu1 %vm422_vm3, %v4523_v59 }
 0x11c   : > { %3105 = vmatprep.mubr.msk.bf16.mxu1 %vm422_vm3, %v4524_v60 }
 0x11d   : > { %3238 = vmatmul.mubr.msk.bf16.gmra.mrb[16].mxu0 %vm422_vm3, %v4086_v52 }
 0x11e   : > { %3241 = vmatprep.mubr.msk.bf16.mxu0 %vm422_vm3, %v4106_v29 }
 0x123   : > { %3106 = vmatmul.mubr.msk.bf16.gmra.mrb[20].mxu1 %vm422_vm3, %v4525_v2 }
 0x124   : > { %3109 = vmatprep.mubr.msk.bf16.mxu1 %vm422_vm3, %v3972_v47 }
 0x125   : > { %3242 = vmatmul.mubr.msk.bf16.gmra.mrb[20].mxu0 %vm422_vm3, %v4110_v56 }
 0x126   : > { %3245 = vmatprep.mubr.msk.bf16.mxu0 %vm422_vm3, %v4131_v23 }
 0x12b   : > { %3110 = vmatmul.mubr.msk.bf16.gmra.mrb[24].mxu1 %vm422_vm3, %v3984_v13 }
 0x12c   : > { %3113 = vmatprep.mubr.msk.bf16.mxu1 %vm422_vm3, %v4047_v35 }
 0x12d   : > { %3246 = vmatmul.mubr.msk.bf16.gmra.mrb[24].mxu0 %vm422_vm3, %v4135_v50 }
 0x12e   : > { %3249 = vmatprep.mubr.msk.bf16.mxu0 %vm422_vm3, %v4149_v31 }
 0x133   : > { %3114 = vmatmul.mubr.msk.bf16.gmra.mrb[28].mxu1 %vm422_vm3, %v4147_v6 }
 0x135   : > { %3250 = vmatmul.mubr.msk.bf16.gmra.mrb[28].mxu0 %vm422_vm3, %v2270_v28 }
 0x1ae   : > { %v3053_v54 = vpop.f32.mrb[0].mxu1 }
 0x1af   : > { %v1269_v43 = vpop.f32.mrb[1].mxu1 }
 0x1b0   : > { %v3054_v44 = vpop.f32.mrb[2].mxu1 }
 0x1b1   : > { %v1272_v25 = vpop.f32.mrb[3].mxu1 }
 0x1b6   : > { %v3057_v47 = vpop.f32.mrb[4].mxu1 }
 0x1b7   : > { %v1285_v9 = vpop.f32.mrb[5].mxu1 }
 0x1b8   : > { %v3058_v13 = vpop.f32.mrb[6].mxu1 }
 0x1b9   : > { %v1288_v46 = vpop.f32.mrb[7].mxu1 }
 0x1be   : > { %v3061_v39 = vpop.f32.mrb[8].mxu1 }
 0x1bf   : > { %v1301_v51 = vpop.f32.mrb[9].mxu1 }
 0x1c0   : > { %v3062_v17 = vpop.f32.mrb[10].mxu1 }
 0x1c1   : > { %v1304_v62 = vpop.f32.mrb[11].mxu1 }
 0x1c6   : > { %v4372_v8 = vpop.f32.mrb[12].mxu1 }
 0x1c7   : > { %v4374_v58 = vpop.f32.mrb[13].mxu1 }
 0x1c8   : > { %v4376_v35 = vpop.f32.mrb[14].mxu1 }
 0x1c9   : > { %v4378_v55 = vpop.f32.mrb[15].mxu1 }
 0x1d0   : > { %v3223_v15 = vpop.f32.mrb[0].mxu0 }
 0x1d1   : > { %v3255_v52 = vadd.f32 %v3223_v15, %v3053_v54  ;;  %v2313_v29 = vpop.f32.mrb[1].mxu0 }
 0x1d2   : > { %v3256_v56 = vadd.f32 %v2313_v29, %v1269_v43  ;;  %v3224_v23 = vpop.f32.mrb[2].mxu0 }
 0x1d3   : > { %v2481_v50 = vadd.f32 %v3255_v52, %v4383_v37  ;;  %v3257_v61 = vadd.f32 %v3224_v23, %v3054_v44  ;;  %v2316_v5 = vpop.f32.mrb[3].mxu0 }
 0x1d4   : > { %v2479_v34 = vadd.f32 %v3256_v56, %v4383_v37  ;;  %v3258_v6 = vadd.f32 %v2316_v5, %v1272_v25 }
 0x1d5   : > { %v2513_v31 = vmax.f32 %v2481_v50, 0.0  ;;  %v2482_v41 = vadd.f32 %v3257_v61, %v4383_v37 }
 0x1d6   : > { %v2511_v53 = vmax.f32 %v2479_v34, 0.0  ;;  %v2480_v4 = vadd.f32 %v3258_v6, %v4383_v37 }
 0x1d7   : > { %2545 = vst [vmem:[%s4390_s16 + $0x10] sm:$0xff] %v2513_v31  ;;  %v2514_v48 = vmax.f32 %v2482_v41, 0.0 }
 0x1d8   : > { %2543 = vst [vmem:[%s4390_s16] sm:$0xff] %v2511_v53  ;;  %v2512_v45 = vmax.f32 %v2480_v4, 0.0  ;;  %v3227_v21 = vpop.f32.mrb[4].mxu0 }
 0x1d9   : > { %2546 = vst [vmem:[%s4390_s16 + $0x18] sm:$0xff] %v2514_v48  ;;  %v3259_v49 = vadd.f32 %v3227_v21, %v3057_v47  ;;  %v2329_v7 = vpop.f32.mrb[5].mxu0 }
 0x1da   : > { %2544 = vst [vmem:[%s4390_s16 + $0x8] sm:$0xff] %v2512_v45  ;;  %v3260_v36 = vadd.f32 %v2329_v7, %v1285_v9  ;;  %v3228_v3 = vpop.f32.mrb[6].mxu0 }
 0x1db   : > { %v2485_v63 = vadd.f32 %v3259_v49, %v4383_v37  ;;  %v3261_v0 = vadd.f32 %v3228_v3, %v3058_v13  ;;  %v2332_v14 = vpop.f32.mrb[7].mxu0 }
 0x1dc   : > { %v2483_v32 = vadd.f32 %v3260_v36, %v4383_v37  ;;  %v3262_v18 = vadd.f32 %v2332_v14, %v1288_v46 }
 0x1dd   : > { %v2517_v19 = vmax.f32 %v2485_v63, 0.0  ;;  %v2486_v26 = vadd.f32 %v3261_v0, %v4383_v37 }
 0x1de   : > { %v2515_v22 = vmax.f32 %v2483_v32, 0.0  ;;  %v2484_v28 = vadd.f32 %v3262_v18, %v4383_v37 }
 0x1df   : > { %2549 = vst [vmem:[%s4390_s16 + $0x30] sm:$0xff] %v2517_v19  ;;  %v2518_v38 = vmax.f32 %v2486_v26, 0.0 }
 0x1e0   : > { %2547 = vst [vmem:[%s4390_s16 + $0x20] sm:$0xff] %v2515_v22  ;;  %v2516_v27 = vmax.f32 %v2484_v28, 0.0  ;;  %v3231_v30 = vpop.f32.mrb[8].mxu0 }
 0x1e1   : > { %2550 = vst [vmem:[%s4390_s16 + $0x38] sm:$0xff] %v2518_v38  ;;  %v3263_v57 = vadd.f32 %v3231_v30, %v3061_v39  ;;  %v2345_v11 = vpop.f32.mrb[9].mxu0 }
 0x1e2   : > { %2548 = vst [vmem:[%s4390_s16 + $0x28] sm:$0xff] %v2516_v27  ;;  %v3264_v12 = vadd.f32 %v2345_v11, %v1301_v51  ;;  %v3232_v10 = vpop.f32.mrb[10].mxu0 }
 0x1e3   : > { %v2489_v42 = vadd.f32 %v3263_v57, %v4383_v37  ;;  %v3265_v59 = vadd.f32 %v3232_v10, %v3062_v17  ;;  %v2348_v60 = vpop.f32.mrb[11].mxu0 }
 0x1e4   : > { %v2487_v2 = vadd.f32 %v3264_v12, %v4383_v37  ;;  %v3266_v20 = vadd.f32 %v2348_v60, %v1304_v62 }
 0x1e5   : > { %v2521_v1 = vmax.f32 %v2489_v42, 0.0  ;;  %v2490_v24 = vadd.f32 %v3265_v59, %v4383_v37 }
 0x1e6   : > { %v2519_v16 = vmax.f32 %v2487_v2, 0.0  ;;  %v2488_v40 = vadd.f32 %v3266_v20, %v4383_v37 }
 0x1e7   : > { %2553 = vst [vmem:[%s4390_s16 + $0x50] sm:$0xff] %v2521_v1  ;;  %v2522_v33 = vmax.f32 %v2490_v24, 0.0 }
 0x1e8   : > { %2551 = vst [vmem:[%s4390_s16 + $0x40] sm:$0xff] %v2519_v16  ;;  %v2520_v54 = vmax.f32 %v2488_v40, 0.0  ;;  %v3235_v43 = vpop.f32.mrb[12].mxu0 }
 0x1e9   : > { %2554 = vst [vmem:[%s4390_s16 + $0x58] sm:$0xff] %v2522_v33  ;;  %v3267_v44 = vadd.f32 %v3235_v43, %v4372_v8  ;;  %v2361_v25 = vpop.f32.mrb[13].mxu0 }
 0x1ea   : > { %2552 = vst [vmem:[%s4390_s16 + $0x48] sm:$0xff] %v2520_v54  ;;  %v3268_v47 = vadd.f32 %v2361_v25, %v4374_v58  ;;  %v3236_v9 = vpop.f32.mrb[14].mxu0 }
 0x1eb   : > { %v2493_v13 = vadd.f32 %v3267_v44, %v4383_v37  ;;  %v3269_v46 = vadd.f32 %v3236_v9, %v4376_v35  ;;  %v2364_v39 = vpop.f32.mrb[15].mxu0 }
 0x1ec   : > { %v2491_v51 = vadd.f32 %v3268_v47, %v4383_v37  ;;  %v3270_v17 = vadd.f32 %v2364_v39, %v4378_v55 }
 0x1ed   : > { %v2525_v62 = vmax.f32 %v2493_v13, 0.0  ;;  %v2494_v8 = vadd.f32 %v3269_v46, %v4383_v37 }
 0x1ee   : > { %v3103_v15 = vpop.f32.mrb[16].mxu1  ;;  %v2523_v52 = vmax.f32 %v2491_v51, 0.0  ;;  %v2492_v58 = vadd.f32 %v3270_v17, %v4383_v37 }
 0x1ef   : > { %v1545_v29 = vpop.f32.mrb[17].mxu1  ;;  %2557 = vst [vmem:[%s4390_s16 + $0x70] sm:$0xff] %v2525_v62  ;;  %v2526_v56 = vmax.f32 %v2494_v8, 0.0 }
 0x1f0   : > { %v3104_v23 = vpop.f32.mrb[18].mxu1  ;;  %2555 = vst [vmem:[%s4390_s16 + $0x60] sm:$0xff] %v2523_v52  ;;  %v2524_v35 = vmax.f32 %v2492_v58, 0.0  ;;  %v3239_v50 = vpop.f32.mrb[16].mxu0 }
 0x1f1   : > { %v1548_v61 = vpop.f32.mrb[19].mxu1  ;;  %2558 = vst [vmem:[%s4390_s16 + $0x78] sm:$0xff] %v2526_v56  ;;  %v3271_v5 = vadd.f32 %v3239_v50, %v3103_v15  ;;  %v2377_v55 = vpop.f32.mrb[17].mxu0 }
 0x1f2   : > { %2556 = vst [vmem:[%s4390_s16 + $0x68] sm:$0xff] %v2524_v35  ;;  %v3272_v34 = vadd.f32 %v2377_v55, %v1545_v29  ;;  %v3240_v6 = vpop.f32.mrb[18].mxu0 }
 0x1f3   : > { %v2497_v31 = vadd.f32 %v3271_v5, %v4383_v37  ;;  %v3273_v41 = vadd.f32 %v3240_v6, %v3104_v23  ;;  %v2380_v53 = vpop.f32.mrb[19].mxu0 }
 0x1f4   : > { %v2495_v4 = vadd.f32 %v3272_v34, %v4383_v37  ;;  %v3274_v48 = vadd.f32 %v2380_v53, %v1548_v61 }
 0x1f5   : > { %v2529_v45 = vmax.f32 %v2497_v31, 0.0  ;;  %v2498_v21 = vadd.f32 %v3273_v41, %v4383_v37 }
 0x1f6   : > { %v3107_v49 = vpop.f32.mrb[20].mxu1  ;;  %v2527_v7 = vmax.f32 %v2495_v4, 0.0  ;;  %v2496_v36 = vadd.f32 %v3274_v48, %v4383_v37 }
 0x1f7   : > { %v1561_v3 = vpop.f32.mrb[21].mxu1  ;;  %2561 = vst [vmem:[%s4390_s16 + $0x90] sm:$0xff] %v2529_v45  ;;  %v2530_v63 = vmax.f32 %v2498_v21, 0.0 }
 0x1f8   : > { %v3108_v0 = vpop.f32.mrb[22].mxu1  ;;  %2559 = vst [vmem:[%s4390_s16 + $0x80] sm:$0xff] %v2527_v7  ;;  %v2528_v14 = vmax.f32 %v2496_v36, 0.0  ;;  %v3243_v32 = vpop.f32.mrb[20].mxu0 }
 0x1f9   : > { %v1564_v18 = vpop.f32.mrb[23].mxu1  ;;  %2562 = vst [vmem:[%s4390_s16 + $0x98] sm:$0xff] %v2530_v63  ;;  %v3275_v19 = vadd.f32 %v3243_v32, %v3107_v49  ;;  %v2393_v26 = vpop.f32.mrb[21].mxu0 }
 0x1fa   : > { %2560 = vst [vmem:[%s4390_s16 + $0x88] sm:$0xff] %v2528_v14  ;;  %v3276_v22 = vadd.f32 %v2393_v26, %v1561_v3  ;;  %v3244_v28 = vpop.f32.mrb[22].mxu0 }
 0x1fb   : > { %v2501_v38 = vadd.f32 %v3275_v19, %v4383_v37  ;;  %v3277_v27 = vadd.f32 %v3244_v28, %v3108_v0  ;;  %v2396_v30 = vpop.f32.mrb[23].mxu0 }
 0x1fc   : > { %v2499_v57 = vadd.f32 %v3276_v22, %v4383_v37  ;;  %v3278_v11 = vadd.f32 %v2396_v30, %v1564_v18 }
 0x1fd   : > { %v2533_v12 = vmax.f32 %v2501_v38, 0.0  ;;  %v2502_v10 = vadd.f32 %v3277_v27, %v4383_v37 }
 0x1fe   : > { %v3111_v42 = vpop.f32.mrb[24].mxu1  ;;  %v2531_v59 = vmax.f32 %v2499_v57, 0.0  ;;  %v2500_v60 = vadd.f32 %v3278_v11, %v4383_v37 }
 0x1ff   : > { %v1577_v2 = vpop.f32.mrb[25].mxu1  ;;  %2565 = vst [vmem:[%s4390_s16 + $0xb0] sm:$0xff] %v2533_v12  ;;  %v2534_v20 = vmax.f32 %v2502_v10, 0.0 }
 0x200   : > { %v3112_v1 = vpop.f32.mrb[26].mxu1  ;;  %2563 = vst [vmem:[%s4390_s16 + $0xa0] sm:$0xff] %v2531_v59  ;;  %v2532_v24 = vmax.f32 %v2500_v60, 0.0  ;;  %v3247_v16 = vpop.f32.mrb[24].mxu0 }
 0x201   : > { %v1580_v40 = vpop.f32.mrb[27].mxu1  ;;  %2566 = vst [vmem:[%s4390_s16 + $0xb8] sm:$0xff] %v2534_v20  ;;  %v3279_v33 = vadd.f32 %v3247_v16, %v3111_v42  ;;  %v2409_v54 = vpop.f32.mrb[25].mxu0 }
 0x202   : > { %2564 = vst [vmem:[%s4390_s16 + $0xa8] sm:$0xff] %v2532_v24  ;;  %v3280_v43 = vadd.f32 %v2409_v54, %v1577_v2  ;;  %v3248_v44 = vpop.f32.mrb[26].mxu0 }
 0x203   : > { %v2505_v25 = vadd.f32 %v3279_v33, %v4383_v37  ;;  %v3281_v47 = vadd.f32 %v3248_v44, %v3112_v1  ;;  %v2412_v9 = vpop.f32.mrb[27].mxu0 }
 0x204   : > { %v2503_v13 = vadd.f32 %v3280_v43, %v4383_v37  ;;  %v3282_v46 = vadd.f32 %v2412_v9, %v1580_v40 }
 0x205   : > { %v2537_v39 = vmax.f32 %v2505_v25, 0.0  ;;  %v2506_v51 = vadd.f32 %v3281_v47, %v4383_v37 }
 0x206   : > { %v3115_v17 = vpop.f32.mrb[28].mxu1  ;;  %v2535_v62 = vmax.f32 %v2503_v13, 0.0  ;;  %v2504_v8 = vadd.f32 %v3282_v46, %v4383_v37 }
 0x207   : > { %v1593_v15 = vpop.f32.mrb[29].mxu1  ;;  %2569 = vst [vmem:[%s4390_s16 + $0xd0] sm:$0xff] %v2537_v39  ;;  %v2538_v52 = vmax.f32 %v2506_v51, 0.0 }
 0x208   : > { %v3116_v58 = vpop.f32.mrb[30].mxu1  ;;  %2567 = vst [vmem:[%s4390_s16 + $0xc0] sm:$0xff] %v2535_v62  ;;  %v2536_v29 = vmax.f32 %v2504_v8, 0.0  ;;  %v3251_v56 = vpop.f32.mrb[28].mxu0 }
 0x209   : > { %v1596_v23 = vpop.f32.mrb[31].mxu1  ;;  %2570 = vst [vmem:[%s4390_s16 + $0xd8] sm:$0xff] %v2538_v52  ;;  %v3283_v35 = vadd.f32 %v3251_v56, %v3115_v17  ;;  %v2425_v50 = vpop.f32.mrb[29].mxu0 }
 0x20a   : > { %2568 = vst [vmem:[%s4390_s16 + $0xc8] sm:$0xff] %v2536_v29  ;;  %v3284_v61 = vadd.f32 %v2425_v50, %v1593_v15  ;;  %v3252_v5 = vpop.f32.mrb[30].mxu0 }
 0x20b   : > { %v2509_v55 = vadd.f32 %v3283_v35, %v4383_v37  ;;  %v3285_v34 = vadd.f32 %v3252_v5, %v3116_v58  ;;  %v2428_v6 = vpop.f32.mrb[31].mxu0 }
 0x20c   : > { %v2507_v31 = vadd.f32 %v3284_v61, %v4383_v37  ;;  %v3286_v41 = vadd.f32 %v2428_v6, %v1596_v23 }
 0x20d   : > { %v2541_v53 = vmax.f32 %v2509_v55, 0.0  ;;  %v2510_v4 = vadd.f32 %v3285_v34, %v4383_v37 }
 0x20e   : > { %v2539_v48 = vmax.f32 %v2507_v31, 0.0  ;;  %v2508_v45 = vadd.f32 %v3286_v41, %v4383_v37 }
 0x20f   : > { %2573 = vst [vmem:[%s4390_s16 + $0xf0] sm:$0xff] %v2541_v53  ;;  %v2542_v21 = vmax.f32 %v2510_v4, 0.0 }
 0x210   : > { %2571 = vst [vmem:[%s4390_s16 + $0xe0] sm:$0xff] %v2539_v48  ;;  %v2540_v49 = vmax.f32 %v2508_v45, 0.0 }
 0x211   : > { %2574 = vst [vmem:[%s4390_s16 + $0xf8] sm:$0xff] %v2542_v21 }
 0x212   : > { %2572 = vst [vmem:[%s4390_s16 + $0xe8] sm:$0xff] %v2540_v49 }
 0x213 PF: > { %s13_s12 = sadd.s32 1, %s3527_s12  }
 0x214   : > { %p10_p4 = scmp.ge.s32.totalorder %s13_s12, 6  }
 0x216   :  { %12 = sbr.rel (!%p10_p4) target bundleno = 1 (0x1), region = 70 }

// kernel: contextual_loss_forward.5
= control target key start
LH: loop header
LB: loop body
LE: loop exit
PB: predicated region body
PF: predicated region fallthrough
CT: control target
= control target key end

     0   :  { %s4252_s12 = smov 0   ;;  %s5239_s0 = inlined_call_operand.vmem [shape: f32[4,18,18,128], index: 0, kind: input, shape index: {}]   ;;  %s5240_s1 = inlined_call_operand.vmem [shape: bf16[9,128,128], index: 1, kind: input, shape index: {}]   ;;  %s5241_s2 = inlined_call_operand.vmem [shape: f32[1,128], index: 2, kind: input, shape index: {}]   ;;  %s5242_s3 = inlined_call_operand.vmem [shape: f32[4,256,128], index: 3, kind: output, shape index: {}]  }
   0x1 LB: > { %s3003_s13 = sadd.s32 4294967295, %s4230_s12   ;;  %p3007_p0 = scmp.ge.s32.totalorder %s4230_s12, 1  ;;  %s4230_s12 = sphi %s4252_s12, %s13_s12  }
   0x2   : > { %p137_p1 = scmp.lt.s32.totalorder %s4230_s12, 5 }
   0x4   : > { %p138_p2 = pnand %p3007_p0, %p137_p1 }
   0x6   : > { %141 = sbr.rel (%p138_p2) target bundleno = 549 (0x225), region = 32 }
   0xd   : > { %v4144_v0 = vld [vmem:[%s5240_s1 + $0x40] sm:$0xff]   ;;  %p161_p3 = scmp.lt.s32.totalorder %s3003_s13, 3  ;;  %v4146_v2 = vld [vmem:[%s5240_s1 + $0x48] sm:$0xff]   ;;  %v4148_v4 = vld [vmem:[%s5240_s1 + $0x50] sm:$0xff]   ;;  %vm306_vm0 = vcmask 1046528   ;;  %vm870_vm1 = vcmask 1045504  }
   0xe   : > { %v4145_v1 = vld [vmem:[%s5240_s1 + $0x100] sm:$0xff]   ;;  %3431 = vmatprep.subr.bf16.mxu1 %v4144_v0  ;;  %v4147_v3 = vld [vmem:[%s5240_s1 + $0x108] sm:$0xff]   ;;  %v4149_v5 = vld [vmem:[%s5240_s1 + $0x110] sm:$0xff]  }
   0xf   : > { %3623 = vmatprep.subr.bf16.mxu0 %v4145_v1  ;;  %3432 = vmatpush3.bf16.msra.mxu1 %v4144_v0  ;;  %s5309_s13 = smov (!%p161_p3, %s3003_s13), 3  ;;  %v4150_v6 = vld [vmem:[%s5240_s1 + $0x58] sm:$0xff]   ;;  %v4152_v8 = vld [vmem:[%s5240_s1 + $0x60] sm:$0xff]   ;;  %v4154_v10 = vld [vmem:[%s5240_s1 + $0x68] sm:$0xff]  }
  0x10   : > { %3624 = vmatpush3.bf16.msra.mxu0 %v4145_v1  ;;  %3433 = vmatprep.subr.bf16.mxu1 %v4146_v2  ;;  %v4151_v7 = vld [vmem:[%s5240_s1 + $0x118] sm:$0xff]   ;;  %s4135_s30 = smul.u32 432, %s5309_s13  ;;  %v4153_v9 = vld [vmem:[%s5240_s1 + $0x120] sm:$0xff]   ;;  %v4155_v14 = vld [vmem:[%s5240_s1 + $0x128] sm:$0xff]   ;;  %s3214_s6 = sshll.u32 %s5309_s13, 8 }
  0x11   : > { %3625 = vmatprep.subr.bf16.mxu0 %v4147_v3  ;;  %v4156_v28 = vld [vmem:[%s5240_s1 + $0x70] sm:$0xff]   ;;  %v4158_v36 = vld [vmem:[%s5240_s1 + $0x78] sm:$0xff]   ;;  %v4160_v46 = vld [vmem:[%s5240_s1] sm:$0xff]   ;;  %s5167_s9 = scalar_lea.vmem %s5242_s3, %s3214_s6 }
  0x12   : > { %s4296_s10 = scalar_lea.vmem %s5239_s0, %s4135_s30  ;;  %v4157_v29 = vld [vmem:[%s5240_s1 + $0x130] sm:$0xff]   ;;  %v4159_v45 = vld [vmem:[%s5240_s1 + $0x138] sm:$0xff]   ;;  %v4161_v50 = vld [vmem:[%s5240_s1 + $0x140] sm:$0xff]  }
  0x13   : > { %3434 = vmatpush3.bf16.msra.mxu1 %v4146_v2  ;;  %v4302_v11 = vld [vmem:[%s4296_s10] sm:$0xff]  ;;  %v4305_v12 = vld [vmem:[%s4296_s10 + $0x8] sm:$0xff]  ;;  %v4308_v13 = vld [vmem:[%s4296_s10 + $0x10] sm:$0x3] }
  0x14   : > { %3626 = vmatpush3.bf16.msra.mxu0 %v4147_v3  ;;  %3435 = vmatprep.subr.bf16.mxu1 %v4148_v4  ;;  %v307_v15 = vrot.slane %v4302_v11, 1  ;;  %v308_v16 = vrot.slane %v4305_v12, 1  ;;  %v310_v17 = vrot.slane %v4308_v13, 1  ;;  %v4317_v18 = vld [vmem:[%s4296_s10 + $0x18] sm:$0xff]  ;;  %v4320_v19 = vld [vmem:[%s4296_s10 + $0x20] sm:$0xff]  ;;  %v4344_v32 = vld [vmem:[%s4296_s10 + $0x30] sm:$0xff] }
  0x15   : > { %3627 = vmatprep.subr.bf16.mxu0 %v4149_v5  ;;  %v4323_v20 = vld [vmem:[%s4296_s10 + $0x28] sm:$0x3]  ;;  %v4327_v21 = vpack.c.bf16 %v4320_v19, %v4317_v18  ;;  %v312_v22 = vrot.slane %v4317_v18, 1  ;;  %v313_v23 = vrot.slane %v4320_v19, 1  ;;  %v4348_v34 = vld [vmem:[%s4296_s10 + $0x38] sm:$0xff]  ;;  %v317_v40 = vrot.slane %v4344_v32, 1 }
  0x16   : > { %v309_v25 = vsel %vm306_vm0, %v307_v15, %v308_v16  ;;  %v311_v26 = vsel %vm306_vm0, %v308_v16, %v310_v17  ;;  %v315_v27 = vrot.slane %v4323_v20, 1  ;;  %v4351_v35 = vld [vmem:[%s4296_s10 + $0x40] sm:$0x3]  ;;  %v4357_v38 = vld [vmem:[%s4296_s10 + $0x48] sm:$0xff]  ;;  %v4361_v39 = vpack.c.bf16 %v4348_v34, %v4344_v32  ;;  %v4365_v41 = vld [vmem:[%s4296_s10 + $0x50] sm:$0xff] }
  0x17   : > { %3436 = vmatpush3.bf16.msra.mxu1 %v4148_v4  ;;  %v419_v30 = vpack.c.bf16 %v311_v26, %v309_v25  ;;  %v314_v31 = vsel %vm306_vm0, %v312_v22, %v313_v23  ;;  %v4368_v42 = vld [vmem:[%s4296_s10 + $0x58] sm:$0x3]  ;;  %v318_v43 = vrot.slane %v4348_v34, 1  ;;  %v320_v44 = vrot.slane %v4351_v35, 1  ;;  %v4387_v53 = vld [vmem:[%s4296_s10 + $0x60] sm:$0xff]  ;;  %v4390_v54 = vld [vmem:[%s4296_s10 + $0x68] sm:$0xff] }
  0x18   : > { %3628 = vmatpush3.bf16.msra.mxu0 %v4149_v5  ;;  %3437 = vmatprep.subr.bf16.mxu1 %v4150_v6  ;;  %v316_v33 = vsel %vm306_vm0, %v313_v23, %v315_v27  ;;  %v322_v47 = vrot.slane %v4357_v38, 1  ;;  %v323_v48 = vrot.slane %v4365_v41, 1  ;;  %v325_v49 = vrot.slane %v4368_v42, 1  ;;  %v4393_v55 = vld [vmem:[%s4296_s10 + $0x70] sm:$0x3]  ;;  %v4396_v56 = vld [vmem:[%s4296_s10 + $0x78] sm:$0xff] }
  0x19   : > { %3629 = vmatprep.subr.bf16.mxu0 %v4151_v7  ;;  %3447 = vmatprep.mubr.bf16.mxu1 %v419_v30  ;;  %v420_v37 = vpack.c.bf16 %v316_v33, %v314_v31  ;;  %v319_v51 = vsel %vm306_vm0, %v317_v40, %v318_v43  ;;  %v321_v52 = vsel %vm306_vm0, %v318_v43, %v320_v44  ;;  %v4409_v61 = vld [vmem:[%s4296_s10 + $0x80] sm:$0xff]  ;;  %v4412_v62 = vld [vmem:[%s4296_s10 + $0x88] sm:$0x3]  ;;  %v327_v1 = vrot.slane %v4387_v53, 1  ;;  %v4448_v17 = vld [vmem:[%s4296_s10 + $0xb0] sm:$0xff] }
  0x1a   : > { %v4400_v57 = vpack.c.bf16 %v4365_v41, %v4357_v38  ;;  %v4404_v58 = vpack.c.bf16 %v4390_v54, %v4387_v53  ;;  %v324_v59 = vsel %vm306_vm0, %v322_v47, %v323_v48  ;;  %v326_v60 = vsel %vm306_vm0, %v323_v48, %v325_v49  ;;  %v4162_v0 = vld [vmem:[%s5240_s1 + $0x148] sm:$0xff]   ;;  %v4164_v22 = vld [vmem:[%s5240_s1 + $0x150] sm:$0xff]   ;;  %v4471_v31 = vld [vmem:[%s4296_s10 + $0xc0] sm:$0xff] }
  0x1b   : > { %3438 = vmatpush3.bf16.msra.mxu1 %v4150_v6  ;;  %3639 = vmatprep.mubr.bf16.mxu0 %v420_v37  ;;  %v4414_v63 = vpack.c.bf16 %v321_v52, %v319_v51  ;;  %v328_v2 = vrot.slane %v4390_v54, 1  ;;  %v4423_v3 = vpack.c.bf16 %v4409_v61, %v4396_v56  ;;  %v4163_v4 = vld [vmem:[%s5240_s1 + $0x8] sm:$0xff]   ;;  %v330_v5 = vrot.slane %v4393_v55, 1  ;;  %v4166_v27 = vld [vmem:[%s5240_s1 + $0x10] sm:$0xff]   ;;  %v4165_v43 = vld [vmem:[%s5240_s1 + $0x158] sm:$0xff]  }
  0x1c   : > { %3630 = vmatpush3.bf16.msra.mxu0 %v4151_v7  ;;  %3439 = vmatprep.subr.bf16.mxu1 %v4152_v8  ;;  %v332_v6 = vrot.slane %v4396_v56, 1  ;;  %v4431_v7 = vld [vmem:[%s4296_s10 + $0x90] sm:$0xff]  ;;  %v4445_v16 = vld [vmem:[%s4296_s10 + $0xa8] sm:$0xff]  ;;  %v4495_v49 = vld [vmem:[%s4296_s10 + $0xd8] sm:$0xff]  ;;  %v343_v51 = vrot.slane %v4448_v17, 1 }
  0x1d   : > { %3631 = vmatprep.subr.bf16.mxu0 %v4153_v9  ;;  %5266 = vst [vmem:[#allocation2_spill] sm:$0xff] %v4414_v63  ;;  %v4456_v23 = vpack.c.bf16 %v4448_v17, %v4445_v16  ;;  %v329_v25 = vsel %vm306_vm0, %v327_v1, %v328_v2  ;;  %v331_v26 = vsel %vm306_vm0, %v328_v2, %v330_v5  ;;  %v4474_v33 = vld [vmem:[%s4296_s10 + $0xc8] sm:$0xff]  ;;  %v337_v44 = vrot.slane %v4431_v7, 1  ;;  %v4516_v1 = vld [vmem:[%s4296_s10 + $0xf8] sm:$0xff]  ;;  %v4167_v5 = vld [vmem:[%s5240_s1 + $0x160] sm:$0xff]  }
  0x1e   : > { %v4483_v40 = vpack.c.bf16 %v331_v26, %v329_v25  ;;  %v342_v48 = vrot.slane %v4445_v16, 1  ;;  %v4172_v25 = vld [vmem:[%s5240_s1 + $0x20] sm:$0xff]   ;;  %v4176_v24 = vld [vmem:[%s5240_s1 + $0x30] sm:$0xff]  }
  0x1f   : > { %3440 = vmatpush3.bf16.msra.mxu1 %v4152_v8  ;;  %v4434_v8 = vld [vmem:[%s4296_s10 + $0x98] sm:$0xff] }
  0x20   : > { %3632 = vmatpush3.bf16.msra.mxu0 %v4153_v9  ;;  %3441 = vmatprep.subr.bf16.mxu1 %v4154_v10  ;;  %v4436_v9 = vpack.c.bf16 %v326_v60, %v324_v59  ;;  %v4442_v15 = vpack.c.bf16 %v4434_v8, %v4431_v7  ;;  %5269 = vst [vmem:[#allocation5_spill] sm:$0xff] %v4483_v40  ;;  %v4169_v60 = vld [vmem:[%s5240_s1 + $0x18] sm:$0xff]  }
  0x21   : > { %3633 = vmatprep.subr.bf16.mxu0 %v4155_v14 }
  0x22   : > { %5267 = vst [vmem:[#allocation3_spill] sm:$0xff] %v4436_v9 }
  0x23   : > { %3442 = vmatpush3.bf16.msra.mxu1 %v4154_v10  ;;  %v333_v10 = vrot.slane %v4409_v61, 1 }
  0x24   : > { %3634 = vmatpush3.bf16.msra.mxu0 %v4155_v14  ;;  %3443 = vmatprep.subr.bf16.mxu1 %v4156_v28  ;;  %v335_v14 = vrot.slane %v4412_v62, 1 }
  0x25   : > { %3635 = vmatprep.subr.bf16.mxu0 %v4157_v29 }
  0x26   : > { %v336_v30 = vsel %vm306_vm0, %v333_v10, %v335_v14 }
  0x27   : > { %3444 = vmatpush3.bf16.msra.mxu1 %v4156_v28  ;;  %v4465_v28 = vld [vmem:[%s4296_s10 + $0xa0] sm:$0x3] }
  0x28   : > { %3636 = vmatpush3.bf16.msra.mxu0 %v4157_v29  ;;  %3445 = vmatprep.subr.bf16.mxu1 %v4158_v36  ;;  %v334_v29 = vsel %vm306_vm0, %v332_v6, %v333_v10  ;;  %v340_v47 = vrot.slane %v4465_v28, 1  ;;  %v344_v10 = vsel %vm306_vm0, %v342_v48, %v343_v51 }
  0x29   : > { %3637 = vmatprep.subr.bf16.mxu0 %v4159_v45 }
  0x2b   : > { %3446 = vmatpush3.bf16.msra.mxu1 %v4158_v36  ;;  %v4477_v36 = vld [vmem:[%s4296_s10 + $0xb8] sm:$0x3] }
  0x2c   : > { %3638 = vmatpush3.bf16.msra.mxu0 %v4159_v45  ;;  %3479 = vmatprep.subr.bf16.mxu1 %v4160_v46  ;;  %v338_v45 = vrot.slane %v4434_v8, 1  ;;  %v345_v52 = vrot.slane %v4477_v36, 1 }
  0x2d   : > { %3671 = vmatprep.subr.bf16.mxu0 %v4161_v50 }
  0x2e   : > { %3448 = vmatmul.mubr.bf16.vlgmr.msra.gmra.mrb[0].mxu1 %v420_v37  ;;  %v4481_v37 = vpack.c.bf16 %v4474_v33, %v4471_v31  ;;  %v339_v2 = vsel %vm306_vm0, %v337_v44, %v338_v45  ;;  %v346_v14 = vsel %vm306_vm0, %v343_v51, %v345_v52  ;;  %v879_v51 = vrot.slane %v4323_v20, 2  ;;  %v4168_v52 = vld [vmem:[%s5240_s1 + $0x168] sm:$0xff]  }
  0x2f   : > { %3640 = vmatmul.mubr.bf16.vlgmr.msra.gmra.mrb[0].mxu0 %v4414_v63  ;;  %3480 = vmatpush3.bf16.msra.mxu1 %v4160_v46  ;;  %v4490_v46 = vpack.c.bf16 %v336_v30, %v334_v29  ;;  %v876_v30 = vrot.slane %v4317_v18, 2  ;;  %v4541_v44 = vpack.c.bf16 %v346_v14, %v344_v10  ;;  %v881_v18 = vrot.slane %v4344_v32, 2 }
  0x30   : > { %3672 = vmatpush3.bf16.msra.mxu0 %v4161_v50  ;;  %3451 = vmatprep.mubr.bf16.mxu1 %v4414_v63  ;;  %5268 = vst [vmem:[#allocation4_spill] sm:$0xff] %v4481_v37  ;;  %v4498_v50 = vld [vmem:[%s4296_s10 + $0xe0] sm:$0xff]  ;;  %v884_v20 = vrot.slane %v4351_v35, 2  ;;  %v886_v32 = vrot.slane %v4357_v38, 2  ;;  %v887_v35 = vrot.slane %v4365_v41, 2  ;;  %v889_v14 = vrot.slane %v4368_v42, 2 }
  0x31   : > { %3673 = vmatprep.subr.bf16.mxu0 %v4162_v0  ;;  %3643 = vmatprep.mubr.bf16.mxu0 %v4436_v9  ;;  %5270 = vst [vmem:[#allocation6_spill] sm:$0xff] %v4490_v46  ;;  %v4504_v59 = vpack.c.bf16 %v4498_v50, %v4495_v49  ;;  %5274 = vst [vmem:[#allocation10_spill] sm:$0xff] %v4541_v44  ;;  %v353_v41 = vrot.slane %v4498_v50, 1  ;;  %v4611_v63 = vld [vmem:[%s4296_s10 + $0x128] sm:$0xff] }
  0x32   : > { %3481 = vmatprep.subr.bf16.mxu1 %v4163_v4 }
  0x33   : > { %3482 = vmatpush3.bf16.msra.mxu1 %v4163_v4  ;;  %5271 = vst [vmem:[#allocation7_spill] sm:$0xff] %v4504_v59  ;;  %v341_v4 = vsel %vm306_vm0, %v338_v45, %v340_v47  ;;  %v347_v45 = vrot.slane %v4471_v31, 1  ;;  %v348_v47 = vrot.slane %v4474_v33, 1  ;;  %v4642_v59 = vld [vmem:[%s4296_s10 + $0x148] sm:$0x3] }
  0x34   : > { %3674 = vmatpush3.bf16.msra.mxu0 %v4162_v0  ;;  %3483 = vmatprep.subr.bf16.mxu1 %v4166_v27  ;;  %v4513_v0 = vld [vmem:[%s4296_s10 + $0xf0] sm:$0xff]  ;;  %v4537_v29 = vpack.c.bf16 %v341_v4, %v339_v2  ;;  %v4561_v2 = vld [vmem:[%s4296_s10 + $0xe8] sm:$0x3] }
  0x35   : > { %3675 = vmatprep.subr.bf16.mxu0 %v4164_v22  ;;  %v4526_v6 = vpack.c.bf16 %v4516_v1, %v4513_v0  ;;  %v349_v4 = vsel %vm306_vm0, %v347_v45, %v348_v47  ;;  %v355_v42 = vrot.slane %v4561_v2, 1  ;;  %v4593_v45 = vld [vmem:[%s4296_s10 + $0x108] sm:$0xff] }
  0x36   : > { %3452 = vmatmul.mubr.bf16.gmra.mrb[4].mxu1 %v4436_v9  ;;  %5273 = vst [vmem:[#allocation9_spill] sm:$0xff] %v4537_v29  ;;  %v4608_v9 = vld [vmem:[%s4296_s10 + $0x120] sm:$0xff] }
  0x37   : > { %3644 = vmatmul.mubr.bf16.gmra.mrb[4].mxu0 %v4483_v40  ;;  %3455 = vmatprep.mubr.bf16.mxu1 %v4483_v40  ;;  %5272 = vst [vmem:[#allocation8_spill] sm:$0xff] %v4526_v6  ;;  %v894_v40 = vrot.slane %v4393_v55, 2  ;;  %v356_v55 = vsel %vm306_vm0, %v353_v41, %v355_v42  ;;  %v4630_v6 = vld [vmem:[%s4296_s10 + $0x138] sm:$0xff]  ;;  %v890_v42 = vsel %vm870_vm1, %v887_v35, %v889_v14 }
  0x38   : > { %3676 = vmatpush3.bf16.msra.mxu0 %v4164_v22  ;;  %3647 = vmatprep.mubr.bf16.mxu0 %v4490_v46  ;;  %v4531_v22 = vld [vmem:[%s4296_s10 + $0xd0] sm:$0x3] }
  0x39   : > { %3677 = vmatprep.subr.bf16.mxu0 %v4165_v43  ;;  %3484 = vmatpush3.bf16.msra.mxu1 %v4166_v27  ;;  %v877_v27 = vrot.slane %v4320_v19, 2  ;;  %v350_v48 = vrot.slane %v4531_v22, 1  ;;  %v4174_v19 = vld [vmem:[%s5240_s1 + $0x28] sm:$0xff]  }
  0x3a   : > { %3485 = vmatprep.subr.bf16.mxu1 %v4169_v60 }
  0x3b   : > { %v351_v10 = vsel %vm306_vm0, %v348_v47, %v350_v48  ;;  %v880_v38 = vsel %vm870_vm1, %v877_v27, %v879_v51  ;;  %v357_v48 = vrot.slane %v4513_v0, 1  ;;  %v358_v51 = vrot.slane %v4516_v1, 1  ;;  %v4596_v47 = vld [vmem:[%s4296_s10 + $0x110] sm:$0xff] }
  0x3c   : > { %3678 = vmatpush3.bf16.msra.mxu0 %v4165_v43  ;;  %v882_v43 = vrot.slane %v4348_v34, 2  ;;  %v4568_v34 = vld [vmem:[%s4296_s10 + $0x100] sm:$0x3] }
  0x3d   : > { %3679 = vmatprep.subr.bf16.mxu0 %v4167_v5  ;;  %3486 = vmatpush3.bf16.msra.mxu1 %v4169_v60  ;;  %v878_v60 = vsel %vm870_vm1, %v876_v30, %v877_v27  ;;  %v4170_v30 = vld [vmem:[%s5240_s1 + $0x170] sm:$0xff]   ;;  %v4585_v27 = vpack.c.bf16 %v351_v10, %v349_v4  ;;  %v360_v26 = vrot.slane %v4568_v34, 1  ;;  %v362_v10 = vrot.slane %v4593_v45, 1 }
  0x3e   : > { %3456 = vmatmul.mubr.bf16.gmra.mrb[8].mxu1 %v4490_v46  ;;  %3487 = vmatprep.subr.bf16.mxu1 %v4172_v25  ;;  %v4601_v46 = vld [vmem:[%s4296_s10 + $0x118] sm:$0x3]  ;;  %v883_v4 = vsel %vm870_vm1, %v881_v18, %v882_v43 }
  0x3f   : > { %3648 = vmatmul.mubr.bf16.gmra.mrb[8].mxu0 %v4537_v29  ;;  %3459 = vmatprep.mubr.bf16.mxu1 %v4537_v29  ;;  %5275 = vst [vmem:[#allocation11_spill] sm:$0xff] %v4585_v27  ;;  %v4598_v29 = vpack.c.bf16 %v880_v38, %v878_v60  ;;  %v885_v60 = vsel %vm870_vm1, %v882_v43, %v884_v20  ;;  %v363_v38 = vrot.slane %v4596_v47, 1  ;;  %v4637_v43 = vld [vmem:[%s4296_s10 + $0x140] sm:$0xff] }
  0x40   : > { %3680 = vmatpush3.bf16.msra.mxu0 %v4167_v5  ;;  %3651 = vmatprep.mubr.bf16.mxu0 %v4541_v44  ;;  %v352_v5 = vrot.slane %v4495_v49, 1  ;;  %v888_v20 = vsel %vm870_vm1, %v886_v32, %v887_v35  ;;  %v367_v32 = vrot.slane %v4608_v9, 1  ;;  %v368_v35 = vrot.slane %v4611_v63, 1 }
  0x41   : > { %3681 = vmatprep.subr.bf16.mxu0 %v4168_v52  ;;  %3488 = vmatpush3.bf16.msra.mxu1 %v4172_v25  ;;  %v4171_v25 = vld [vmem:[%s5240_s1 + $0x178] sm:$0xff]   ;;  %5276 = vst [vmem:[#allocation12_spill] sm:$0xff] %v4598_v29  ;;  %v4659_v14 = vpack.c.bf16 %v890_v42, %v888_v20  ;;  %v904_v42 = vrot.slane %v4465_v28, 2  ;;  %v4177_v28 = vld [vmem:[%s5240_s1 + $0x190] sm:$0xff]  }
  0x42   : > { %3489 = vmatprep.subr.bf16.mxu1 %v4174_v19  ;;  %v354_v18 = vsel %vm306_vm0, %v352_v5, %v353_v41  ;;  %v359_v5 = vsel %vm306_vm0, %v357_v48, %v358_v51  ;;  %v365_v41 = vrot.slane %v4601_v46, 1  ;;  %v897_v48 = vrot.slane %v4409_v61, 2 }
  0x43   : > { %v4644_v37 = vpack.c.bf16 %v356_v55, %v354_v18  ;;  %5280 = vst [vmem:[#allocation16_spill] sm:$0xff] %v4659_v14  ;;  %v373_v18 = vrot.slane %v4637_v43, 1  ;;  %v375_v55 = vrot.slane %v4642_v59, 1 }
  0x44   : > { %3682 = vmatpush3.bf16.msra.mxu0 %v4168_v52  ;;  %v896_v52 = vrot.slane %v4396_v56, 2  ;;  %v4173_v56 = vld [vmem:[%s5240_s1 + $0x180] sm:$0xff]  }
  0x45   : > { %3683 = vmatprep.subr.bf16.mxu0 %v4170_v30  ;;  %3490 = vmatpush3.bf16.msra.mxu1 %v4174_v19  ;;  %v4178_v19 = vld [vmem:[%s5240_s1 + $0x38] sm:$0xff]   ;;  %5277 = vst [vmem:[#allocation13_spill] sm:$0xff] %v4644_v37 }
  0x46   : > { %3460 = vmatmul.mubr.bf16.gmra.mrb[12].mxu1 %v4541_v44  ;;  %3491 = vmatprep.subr.bf16.mxu1 %v4176_v24  ;;  %v4627_v44 = vld [vmem:[%s4296_s10 + $0x130] sm:$0x3] }
  0x47   : > { %3652 = vmatmul.mubr.bf16.gmra.mrb[12].mxu0 %v4585_v27  ;;  %3463 = vmatprep.mubr.bf16.mxu1 %v4585_v27  ;;  %v361_v27 = vsel %vm306_vm0, %v358_v51, %v360_v26  ;;  %v4652_v26 = vld [vmem:[%s5240_s1 + $0x80] sm:$0xff]   ;;  %v370_v61 = vrot.slane %v4627_v44, 1 }
  0x48   : > { %3684 = vmatpush3.bf16.msra.mxu0 %v4170_v30  ;;  %3687 = vmatprep.mubr.bf16.mxu0 %v4598_v29  ;;  %v4646_v30 = vpack.c.bf16 %v885_v60, %v883_v4  ;;  %v4654_v51 = vpack.c.bf16 %v361_v27, %v359_v5  ;;  %v372_v4 = vrot.slane %v4630_v6, 1  ;;  %v4175_v27 = vld [vmem:[%s5240_s1 + $0x188] sm:$0xff]   ;;  %v901_v60 = vrot.slane %v4431_v7, 2  ;;  %v4678_v29 = vld [vmem:[%s4296_s10 + $0x150] sm:$0xff] }
  0x49   : > { %3685 = vmatprep.subr.bf16.mxu0 %v4171_v25  ;;  %3492 = vmatpush3.bf16.msra.mxu1 %v4176_v24  ;;  %v899_v24 = vrot.slane %v4412_v62, 2  ;;  %v902_v62 = vrot.slane %v4434_v8, 2  ;;  %v5282_v5 = vrot.slane %v4387_v53, 2  ;;  %v364_v7 = vsel %vm306_vm0, %v362_v10, %v363_v38 }
  0x4a   : > { %5278 = vst [vmem:[#allocation14_spill] sm:$0xff] %v4646_v30  ;;  %3493 = vmatprep.subr.bf16.mxu1 %v4178_v19  ;;  %5279 = vst [vmem:[#allocation15_spill] sm:$0xff] %v4654_v51  ;;  %v366_v8 = vsel %vm306_vm0, %v363_v38, %v365_v41  ;;  %v369_v10 = vsel %vm306_vm0, %v367_v32, %v368_v35  ;;  %v371_v38 = vsel %vm306_vm0, %v368_v35, %v370_v61  ;;  %v4700_v41 = vld [vmem:[%s4296_s10 + $0x160] sm:$0x3] }
  0x4b   : > { %v4713_v32 = vpack.c.bf16 %v4596_v47, %v4593_v45  ;;  %v4719_v35 = vpack.c.bf16 %v366_v8, %v364_v7  ;;  %v4725_v61 = vpack.c.bf16 %v4637_v43, %v4630_v6  ;;  %v871_v7 = vrot.slane %v4302_v11, 2 }
  0x4c   : > { %3686 = vmatpush3.bf16.msra.mxu0 %v4171_v25  ;;  %v5281_v25 = vrot.slane %v4390_v54, 2  ;;  %v898_v54 = vsel %vm870_vm1, %v896_v52, %v897_v48  ;;  %v4717_v52 = vpack.c.bf16 %v4611_v63, %v4608_v9  ;;  %v380_v8 = vrot.slane %v4700_v41, 1 }
  0x4d   : > { %3719 = vmatprep.subr.bf16.mxu0 %v4173_v56  ;;  %3494 = vmatpush3.bf16.msra.mxu1 %v4178_v19 }
  0x4e   : > { %3464 = vmatmul.mubr.bf16.gmra.mrb[16].mxu1 %v4644_v37  ;;  %v893_v20 = vsel %vm870_vm1, %v5282_v5, %v5281_v25  ;;  %3527 = vmatprep.subr.bf16.mxu1 %v4652_v26  ;;  %v5283_v53 = vmov %v5281_v25  ;;  %v4692_v25 = vld [vmem:[%s4296_s10 + $0x158] sm:$0xff]  ;;  %v906_v5 = vrot.slane %v4445_v16, 2  ;;  %v377_v16 = vrot.slane %v4678_v29, 1 }
  0x4f   : > { %3688 = vmatmul.mubr.bf16.vlgmr.msra.gmra.mrb[0].mxu0 %v4646_v30  ;;  %3467 = vmatprep.mubr.bf16.mxu1 %v4654_v51  ;;  %v895_v19 = vsel %vm870_vm1, %v5283_v53, %v894_v40  ;;  %v907_v40 = vrot.slane %v4448_v17, 2  ;;  %v4704_v53 = vld [vmem:[%s4296_s10 + $0x168] sm:$0xff]  ;;  %v900_v51 = vsel %vm870_vm1, %v897_v48, %v899_v24  ;;  %v4729_v48 = vpack.c.bf16 %v4692_v25, %v4678_v29 }
  0x50   : > { %3720 = vmatpush3.bf16.msra.mxu0 %v4173_v56  ;;  %3691 = vmatprep.mubr.bf16.mxu0 %v4659_v14  ;;  %v4709_v56 = vld [vmem:[%s4296_s10 + $0x170] sm:$0xff]  ;;  %v4721_v17 = vpack.c.bf16 %v895_v19, %v893_v20  ;;  %v4731_v24 = vpack.c.bf16 %v371_v38, %v369_v10  ;;  %v378_v37 = vrot.slane %v4692_v25, 1  ;;  %v4739_v20 = vpack.c.bf16 %v900_v51, %v898_v54  ;;  %v4179_v38 = vld [vmem:[%s5240_s1 + $0x198] sm:$0xff]  }
  0x51   : > { %3721 = vmatprep.subr.bf16.mxu0 %v4175_v27  ;;  %5284 = vst [vmem:[#allocation17_spill] sm:$0xff] %v4729_v48  ;;  %v4736_v14 = vpack.c.bf16 %v4709_v56, %v4704_v53  ;;  %v872_v19 = vrot.slane %v4305_v12, 2  ;;  %v909_v10 = vrot.slane %v4477_v36, 2  ;;  %v374_v30 = vsel %vm306_vm0, %v372_v4, %v373_v18  ;;  %v4762_v48 = vld [vmem:[%s4296_s10 + $0x178] sm:$0x3]  ;;  %v4181_v4 = vld [vmem:[%s5240_s1 + $0x1a0] sm:$0xff]  }
  0x52   : > { %5285 = vst [vmem:[#allocation18_spill] sm:$0xff] %v4731_v24  ;;  %v5287_v51 = vrot.slane %v4308_v13, 2  ;;  %v376_v36 = vsel %vm306_vm0, %v373_v18, %v375_v55  ;;  %v903_v54 = vsel %vm870_vm1, %v901_v60, %v902_v62  ;;  %v905_v13 = vsel %vm870_vm1, %v902_v62, %v904_v42 }
  0x53   : > { %5286 = vst [vmem:[#allocation19_spill] sm:$0xff] %v4736_v14  ;;  %v4750_v14 = vsel %vm870_vm1, %v871_v7, %v872_v19  ;;  %v379_v7 = vsel %vm306_vm0, %v377_v16, %v378_v37  ;;  %v908_v18 = vsel %vm870_vm1, %v906_v5, %v907_v40  ;;  %v910_v55 = vsel %vm870_vm1, %v907_v40, %v909_v10 }
  0x54   : > { %3722 = vmatpush3.bf16.msra.mxu0 %v4175_v27  ;;  %v4755_v27 = vsel %vm870_vm1, %v872_v19, %v5287_v51  ;;  %v381_v19 = vsel %vm306_vm0, %v378_v37, %v380_v8  ;;  %v382_v51 = vrot.slane %v4704_v53, 1  ;;  %v383_v60 = vrot.slane %v4709_v56, 1 }
  0x55   : > { %3723 = vmatprep.subr.bf16.mxu0 %v4177_v28  ;;  %v385_v62 = vrot.slane %v4762_v48, 1  ;;  %v911_v42 = vrot.slane %v4471_v31, 2  ;;  %v4781_v37 = vpack.c.bf16 %v905_v13, %v903_v54  ;;  %v912_v5 = vrot.slane %v4474_v33, 2  ;;  %v4183_v31 = vld [vmem:[%s5240_s1 + $0x1a8] sm:$0xff]  }
  0x56   : > { %3468 = vmatmul.mubr.bf16.gmra.mrb[20].mxu1 %v4719_v35  ;;  %v914_v40 = vrot.slane %v4531_v22, 2  ;;  %v4787_v16 = vpack.c.bf16 %v910_v55, %v908_v18  ;;  %v916_v8 = vrot.slane %v4495_v49, 2  ;;  %v919_v10 = vrot.slane %v4561_v2, 2  ;;  %v4185_v2 = vld [vmem:[%s5240_s1 + $0x1b0] sm:$0xff]  }
  0x57   : > { %3692 = vmatmul.mubr.bf16.gmra.mrb[4].mxu0 %v4721_v17  ;;  %3471 = vmatprep.mubr.bf16.mxu1 %v4731_v24  ;;  %v4777_v24 = vpack.c.bf16 %v376_v36, %v374_v30  ;;  %v917_v30 = vrot.slane %v4498_v50, 2  ;;  %v384_v33 = vsel %vm306_vm0, %v382_v51, %v383_v60  ;;  %v386_v22 = vsel %vm306_vm0, %v383_v60, %v385_v62 }
  0x58   : > { %3695 = vmatprep.mubr.bf16.mxu0 %v4739_v20  ;;  %3724 = vmatpush3.bf16.msra.mxu0 %v4177_v28  ;;  %v4783_v28 = vpack.c.bf16 %v381_v19, %v379_v7  ;;  %v913_v49 = vsel %vm870_vm1, %v911_v42, %v912_v5  ;;  %v915_v50 = vsel %vm870_vm1, %v912_v5, %v914_v40  ;;  %v921_v13 = vrot.slane %v4513_v0, 2  ;;  %v4187_v0 = vld [vmem:[%s5240_s1 + $0x1b8] sm:$0xff]  }
  0x59   : > { %3725 = vmatprep.subr.bf16.mxu0 %v4179_v38  ;;  %v920_v36 = vsel %vm870_vm1, %v917_v30, %v919_v10  ;;  %v4808_v54 = vpack.c.bf16 %v386_v22, %v384_v33  ;;  %v4811_v7 = vpack.c.bf16 %v915_v50, %v913_v49  ;;  %v922_v19 = vrot.slane %v4516_v1, 2 }
  0x5a   : > { %v924_v51 = vrot.slane %v4568_v34, 2  ;;  %v926_v18 = vrot.slane %v4593_v45, 2  ;;  %v927_v55 = vrot.slane %v4596_v47, 2  ;;  %v929_v60 = vrot.slane %v4601_v46, 2  ;;  %v4834_v46 = vld [vmem:[%s5240_s1 + $0x1c0] sm:$0xff]  }
  0x5b   : > { %v5288_v1 = vpack.c.bf16 %v4305_v12, %v4302_v11  ;;  %v923_v34 = vsel %vm870_vm1, %v921_v13, %v922_v19  ;;  %v931_v12 = vrot.slane %v4608_v9, 2  ;;  %v932_v5 = vrot.slane %v4611_v63, 2  ;;  %v222_v13 = vld [vmem:[%s4296_s10 + $0x190] sm:$0x3] }
  0x5c   : > { %3726 = vmatpush3.bf16.msra.mxu0 %v4179_v38  ;;  %v918_v38 = vsel %vm870_vm1, %v916_v8, %v917_v30  ;;  %v925_v45 = vsel %vm870_vm1, %v922_v19, %v924_v51  ;;  %v928_v47 = vsel %vm870_vm1, %v926_v18, %v927_v55  ;;  %v930_v62 = vsel %vm870_vm1, %v927_v55, %v929_v60  ;;  %v4182_v8 = vld [vmem:[%s5240_s1 + $0x88] sm:$0xff]   ;;  %v4188_v19 = vld [vmem:[%s5240_s1 + $0xa0] sm:$0xff]  }
  0x5d   : > { %3727 = vmatprep.subr.bf16.mxu0 %v4181_v4  ;;  %v4838_v42 = vpack.c.bf16 %v925_v45, %v923_v34  ;;  %v4840_v11 = vpack.c.bf16 %v930_v62, %v928_v47  ;;  %v934_v40 = vrot.slane %v4627_v44, 2  ;;  %v936_v30 = vrot.slane %v4630_v6, 2 }
  0x5e   : > { %3472 = vmatmul.mubr.bf16.gmra.mrb[24].mxu1 %v4777_v24  ;;  %v937_v10 = vrot.slane %v4637_v43, 2  ;;  %v933_v63 = vsel %vm870_vm1, %v931_v12, %v932_v5  ;;  %v941_v33 = vrot.slane %v4678_v29, 2  ;;  %v942_v22 = vrot.slane %v4692_v25, 2 }
  0x5f   : > { %3696 = vmatmul.mubr.bf16.gmra.mrb[8].mxu0 %v4781_v37  ;;  %3475 = vmatprep.mubr.bf16.mxu1 %v4783_v28  ;;  %v935_v9 = vsel %vm870_vm1, %v932_v5, %v934_v40  ;;  %v944_v49 = vrot.slane %v4700_v41, 2  ;;  %v946_v50 = vrot.slane %v4704_v53, 2  ;;  %v4884_v41 = vld [vmem:[%s4296_s10 + $0x180] sm:$0xff]  ;;  %v1522_v47 = vrot.slane %v222_v13, 1  ;;  %v4192_v5 = vld [vmem:[%s5240_s1 + $0xb0] sm:$0xff]  }
  0x60   : > { %3699 = vmatprep.mubr.bf16.mxu0 %v4787_v16  ;;  %3728 = vmatpush3.bf16.msra.mxu0 %v4181_v4  ;;  %v4815_v4 = vpack.c.bf16 %v920_v36, %v918_v38  ;;  %v938_v6 = vsel %vm870_vm1, %v936_v30, %v937_v10  ;;  %v4864_v43 = vpack.c.bf16 %v935_v9, %v933_v63  ;;  %v949_v38 = vrot.slane %v4762_v48, 2  ;;  %v4186_v36 = vld [vmem:[%s5240_s1 + $0x98] sm:$0xff]   ;;  %v4889_v48 = vld [vmem:[%s4296_s10 + $0x188] sm:$0xff]  ;;  %v5289_v63 = vld [vmem:[#allocation4_spill] sm:$0xff] }
  0x61   : > { %3729 = vmatprep.subr.bf16.mxu0 %v4183_v31  ;;  %v943_v29 = vsel %vm870_vm1, %v941_v33, %v942_v22  ;;  %v945_v25 = vsel %vm870_vm1, %v942_v22, %v944_v49  ;;  %v1785_v55 = vrot.slane %v4884_v41, 2  ;;  %v1786_v60 = vrot.slane %v4889_v48, 2  ;;  %v4196_v9 = vld [vmem:[%s5240_s1 + $0xc0] sm:$0xff]   ;;  %v4193_v33 = vld [vmem:[%s5240_s1 + $0x1d0] sm:$0xff]   ;;  %v4195_v22 = vld [vmem:[%s5240_s1 + $0x1d8] sm:$0xff]  }
  0x62   : > { %v4895_v51 = vpack.c.bf16 %v945_v25, %v943_v29  ;;  %v1519_v34 = vrot.slane %v4884_v41, 1  ;;  %v1520_v45 = vrot.slane %v4889_v48, 1  ;;  %v4199_v49 = vld [vmem:[%s5240_s1 + $0x1e8] sm:$0xff]   ;;  %v5294_v29 = vpack.c.bf16 %v4755_v27, %v4750_v14  ;;  %v4205_v25 = vld [vmem:[%s5240_s1 + $0x200] sm:$0xff]   ;;  %v4200_v27 = vld [vmem:[%s5240_s1 + $0xd0] sm:$0xff]  }
  0x63   : > { %v1787_v62 = vsel %vm870_vm1, %v1785_v55, %v1786_v60  ;;  %v5296_v14 = vld [vmem:[#allocation14_spill] sm:$0xff] }
  0x64   : > { %3730 = vmatpush3.bf16.msra.mxu0 %v4183_v31  ;;  %v939_v31 = vrot.slane %v4642_v59, 2  ;;  %v4184_v59 = vld [vmem:[%s5240_s1 + $0x90] sm:$0xff]   ;;  %v1521_v40 = vsel %vm306_vm0, %v1519_v34, %v1520_v45  ;;  %v4204_v55 = vld [vmem:[%s5240_s1 + $0xe0] sm:$0xff]  }
  0x65   : > { %3731 = vmatprep.subr.bf16.mxu0 %v4185_v2  ;;  %v5008_v34 = vld [vmem:[%s4296_s10 + $0x1a0] sm:$0xff] }
  0x66   : > { %3476 = vmatmul.mubr.bf16.gmra.mrb[28].mxu1 %v4808_v54  ;;  %v940_v44 = vsel %vm870_vm1, %v937_v10, %v939_v31  ;;  %v4194_v31 = vld [vmem:[%s5240_s1 + $0xb8] sm:$0xff]  }
  0x67   : > { %3700 = vmatmul.mubr.bf16.gmra.mrb[12].mxu0 %v4811_v7  ;;  %3495 = vmatprep.mubr.bf16.mxu1 %v5288_v1  ;;  %v4190_v1 = vld [vmem:[%s5240_s1 + $0xa8] sm:$0xff]  }
  0x68   : > { %3703 = vmatprep.mubr.bf16.mxu0 %v4815_v4  ;;  %3732 = vmatpush3.bf16.msra.mxu0 %v4185_v2  ;;  %v947_v2 = vrot.slane %v4709_v56, 2 }
  0x69   : > { %3733 = vmatprep.subr.bf16.mxu0 %v4187_v0 }
  0x6a   : > { %v948_v53 = vsel %vm870_vm1, %v946_v50, %v947_v2  ;;  %v950_v56 = vsel %vm870_vm1, %v947_v2, %v949_v38  ;;  %v5292_v50 = vld [vmem:[#allocation17_spill] sm:$0xff]  ;;  %v4201_v2 = vld [vmem:[%s5240_s1 + $0x1f0] sm:$0xff]  }
  0x6b   : > { %v4897_v18 = vpack.c.bf16 %v950_v56, %v948_v53  ;;  %v4203_v38 = vld [vmem:[%s5240_s1 + $0x1f8] sm:$0xff]   ;;  %v4198_v53 = vld [vmem:[%s5240_s1 + $0xc8] sm:$0xff]   ;;  %v5295_v56 = vld [vmem:[#allocation12_spill] sm:$0xff] }
  0x6c   : > { %3734 = vmatpush3.bf16.msra.mxu0 %v4187_v0  ;;  %v1788_v0 = vrot.slane %v222_v13, 2  ;;  %v4202_v13 = vld [vmem:[%s5240_s1 + $0xd8] sm:$0xff]  }
  0x6d   : > { %3767 = vmatprep.subr.bf16.mxu0 %v4834_v46 }
  0x6e   : > { %3496 = vmatmul.mubr.bf16.vlgmr.msra.gmra.mrb[0].mxu1 %v4327_v21  ;;  %v1789_v12 = vsel %vm870_vm1, %v1786_v60, %v1788_v0  ;;  %v4996_v60 = vpack.c.bf16 %v4889_v48, %v4884_v41  ;;  %v4206_v0 = vld [vmem:[%s5240_s1 + $0xe8] sm:$0xff]   ;;  %v2580_v48 = vrot.slane %v5008_v34, 2 }
  0x6f   : > { %3704 = vmatmul.mubr.bf16.gmra.mrb[16].mxu0 %v4838_v42  ;;  %3528 = vmatpush3.bf16.msra.mxu1 %v4652_v26  ;;  %v4866_v26 = vpack.c.bf16 %v940_v44, %v938_v6  ;;  %v4919_v10 = vpack.c.bf16 %v1789_v12, %v1787_v62  ;;  %v5290_v6 = vld [vmem:[#allocation7_spill] sm:$0xff]  ;;  %v5291_v44 = vld [vmem:[#allocation8_spill] sm:$0xff] }
  0x70   : > { %3499 = vmatprep.mubr.bf16.mxu1 %v4361_v39  ;;  %3707 = vmatprep.mubr.bf16.mxu0 %v4840_v11 }
  0x71   : > { %3529 = vmatprep.subr.bf16.mxu1 %v4182_v8 }
  0x73   : > { %3530 = vmatpush3.bf16.msra.mxu1 %v4182_v8  ;;  %v1523_v8 = vsel %vm306_vm0, %v1520_v45, %v1522_v47  ;;  %v4208_v45 = vld [vmem:[%s5240_s1 + $0xf0] sm:$0xff]   ;;  %v5017_v47 = vld [vmem:[%s4296_s10 + $0x1a8] sm:$0x3] }
  0x74   : > { %3531 = vmatprep.subr.bf16.mxu1 %v4184_v59  ;;  %v4917_v30 = vpack.c.bf16 %v1523_v8, %v1521_v40  ;;  %v2582_v62 = vrot.slane %v5017_v47, 2  ;;  %v4210_v8 = vld [vmem:[%s5240_s1 + $0xf8] sm:$0xff]  }
  0x76   : > { %3500 = vmatmul.mubr.bf16.gmra.mrb[4].mxu1 %v4400_v57  ;;  %v5026_v40 = vsel %vm870_vm1, %v2580_v48, %v2582_v62  ;;  %v2314_v62 = vrot.slane %v5008_v34, 1 }
  0x77   : > { %3708 = vmatmul.mubr.bf16.gmra.mrb[20].mxu0 %v4864_v43  ;;  %3503 = vmatprep.mubr.bf16.mxu1 %v4404_v58 }
  0x78   : > { %3711 = vmatprep.mubr.bf16.mxu0 %v4866_v26  ;;  %3532 = vmatpush3.bf16.msra.mxu1 %v4184_v59  ;;  %v4191_v59 = vld [vmem:[%s5240_s1 + $0x1c8] sm:$0xff]  }
  0x79   : > { %3533 = vmatprep.subr.bf16.mxu1 %v4186_v36 }
  0x7c   : > { %3534 = vmatpush3.bf16.msra.mxu1 %v4186_v36  ;;  %v5293_v36 = vld [vmem:[#allocation19_spill] sm:$0xff] }
  0x7d   : > { %3535 = vmatprep.subr.bf16.mxu1 %v4188_v19 }
  0x7e   : > { %3504 = vmatmul.mubr.bf16.gmra.mrb[8].mxu1 %v4423_v3 }
  0x7f   : > { %3712 = vmatmul.mubr.bf16.gmra.mrb[24].mxu0 %v4895_v51  ;;  %3507 = vmatprep.mubr.bf16.mxu1 %v4442_v15 }
  0x80   : > { %3715 = vmatprep.mubr.bf16.mxu0 %v4897_v18  ;;  %3536 = vmatpush3.bf16.msra.mxu1 %v4188_v19  ;;  %v5297_v19 = vld [vmem:[#allocation16_spill] sm:$0xff] }
  0x81   : > { %3537 = vmatprep.subr.bf16.mxu1 %v4190_v1 }
  0x84   : > { %3538 = vmatpush3.bf16.msra.mxu1 %v4190_v1  ;;  %v5005_v1 = vld [vmem:[%s4296_s10 + $0x198] sm:$0xff] }
  0x85   : > { %3539 = vmatprep.subr.bf16.mxu1 %v4192_v5  ;;  %v2579_v41 = vrot.slane %v5005_v1, 2  ;;  %v2051_v12 = vpack.c.bf16 %v5008_v34, %v5005_v1  ;;  %v4221_v34 = vld [vmem:[%s5240_s1 + $0x128] sm:$0xff]  }
  0x86   : > { %3508 = vmatmul.mubr.bf16.gmra.mrb[12].mxu1 %v4456_v23 }
  0x87   : > { %3716 = vmatmul.mubr.bf16.gmra.mrb[28].mxu0 %v4919_v10  ;;  %3511 = vmatprep.mubr.bf16.mxu1 %v5289_v63 }
  0x88   : > { %3735 = vmatprep.mubr.bf16.mxu0 %v4361_v39  ;;  %3540 = vmatpush3.bf16.msra.mxu1 %v4192_v5  ;;  %v5023_v5 = vsel %vm870_vm1, %v2579_v41, %v2580_v48  ;;  %v5306_v41 = vld [vmem:[#allocation15_spill] sm:$0xff]  ;;  %v5307_v48 = vld [vmem:[#allocation18_spill] sm:$0xff] }
  0x89   : > { %3541 = vmatprep.subr.bf16.mxu1 %v4194_v31 }
  0x8c   : > { %3542 = vmatpush3.bf16.msra.mxu1 %v4194_v31  ;;  %v2586_v31 = vpack.c.bf16 %v5026_v40, %v5023_v5 }
  0x8d   : > { %3575 = vmatprep.subr.bf16.mxu1 %v4196_v9 }
  0x8e   : > { %3512 = vmatmul.mubr.bf16.gmra.mrb[16].mxu1 %v5290_v6 }
  0x8f   : > { %3736 = vmatmul.mubr.bf16.vlgmr.msra.gmra.mrb[0].mxu0 %v4400_v57  ;;  %3515 = vmatprep.mubr.bf16.mxu1 %v5291_v44 }
  0x90   : > { %3768 = vmatpush3.bf16.msra.mxu0 %v4834_v46  ;;  %3739 = vmatprep.mubr.bf16.mxu0 %v4404_v58  ;;  %v4197_v46 = vld [vmem:[%s5240_s1 + $0x1e0] sm:$0xff]  }
  0x91   : > { %3769 = vmatprep.subr.bf16.mxu0 %v4191_v59 }
  0x94   : > { %3770 = vmatpush3.bf16.msra.mxu0 %v4191_v59  ;;  %v4207_v59 = vld [vmem:[%s5240_s1 + $0x208] sm:$0xff]  }
  0x95   : > { %3771 = vmatprep.subr.bf16.mxu0 %v4193_v33 }
  0x96   : > { %3516 = vmatmul.mubr.bf16.gmra.mrb[20].mxu1 %v4713_v32 }
  0x97   : > { %3740 = vmatmul.mubr.bf16.gmra.mrb[4].mxu0 %v4423_v3  ;;  %3519 = vmatprep.mubr.bf16.mxu1 %v4717_v52 }
  0x98   : > { %3743 = vmatprep.mubr.bf16.mxu0 %v4442_v15  ;;  %3772 = vmatpush3.bf16.msra.mxu0 %v4193_v33  ;;  %v4216_v33 = vld [vmem:[%s5240_s1 + $0x100] sm:$0xff]  }
  0x99   : > { %3773 = vmatprep.subr.bf16.mxu0 %v4195_v22 }
  0x9c   : > { %3774 = vmatpush3.bf16.msra.mxu0 %v4195_v22  ;;  %v5299_v22 = vld [vmem:[#allocation3_spill] sm:$0xff] }
  0x9d   : > { %3775 = vmatprep.subr.bf16.mxu0 %v4197_v46 }
  0x9e   : > { %3520 = vmatmul.mubr.bf16.gmra.mrb[24].mxu1 %v4725_v61 }
  0x9f   : > { %3744 = vmatmul.mubr.bf16.gmra.mrb[8].mxu0 %v4456_v23  ;;  %3523 = vmatprep.mubr.bf16.mxu1 %v5292_v50 }
  0xa0   : > { %3747 = vmatprep.mubr.bf16.mxu0 %v5289_v63  ;;  %3776 = vmatpush3.bf16.msra.mxu0 %v4197_v46  ;;  %v5300_v46 = vld [vmem:[#allocation5_spill] sm:$0xff] }
  0xa1   : > { %3777 = vmatprep.subr.bf16.mxu0 %v4199_v49 }
  0xa4   : > { %3778 = vmatpush3.bf16.msra.mxu0 %v4199_v49  ;;  %v4209_v49 = vld [vmem:[%s5240_s1 + $0x210] sm:$0xff]  }
  0xa5   : > { %3779 = vmatprep.subr.bf16.mxu0 %v4201_v2 }
  0xa6   : > { %3524 = vmatmul.mubr.bf16.gmra.mrb[28].mxu1 %v5293_v36 }
  0xa7   : > { %3748 = vmatmul.mubr.bf16.gmra.mrb[12].mxu0 %v5290_v6  ;;  %3543 = vmatprep.mubr.bf16.mxu1 %v5294_v29  ;;  %v5302_v29 = vld [vmem:[#allocation9_spill] sm:$0xff] }
  0xa8   : > { %3751 = vmatprep.mubr.bf16.mxu0 %v5291_v44  ;;  %3780 = vmatpush3.bf16.msra.mxu0 %v4201_v2  ;;  %v4211_v2 = vld [vmem:[%s5240_s1 + $0x218] sm:$0xff]  }
  0xa9   : > { %3781 = vmatprep.subr.bf16.mxu0 %v4203_v38 }
  0xac   : > { %3782 = vmatpush3.bf16.msra.mxu0 %v4203_v38  ;;  %v5301_v38 = vld [vmem:[#allocation6_spill] sm:$0xff] }
  0xad   : > { %3815 = vmatprep.subr.bf16.mxu0 %v4205_v25 }
  0xae   : > { %3544 = vmatmul.mubr.bf16.vlgmr.msra.gmra.mrb[0].mxu1 %v5295_v56  ;;  %v5303_v56 = vld [vmem:[#allocation10_spill] sm:$0xff] }
  0xaf   : > { %3752 = vmatmul.mubr.bf16.gmra.mrb[16].mxu0 %v4713_v32  ;;  %3576 = vmatpush3.bf16.msra.mxu1 %v4196_v9  ;;  %v5298_v9 = vld [vmem:[#allocation2_spill] sm:$0xff] }
  0xb0   : > { %3547 = vmatprep.mubr.bf16.mxu1 %v5296_v14  ;;  %3755 = vmatprep.mubr.bf16.mxu0 %v4717_v52 }
  0xb1   : > { %3577 = vmatprep.subr.bf16.mxu1 %v4198_v53 }
  0xb3   : > { %3578 = vmatpush3.bf16.msra.mxu1 %v4198_v53  ;;  %v4213_v53 = vld [vmem:[%s5240_s1 + $0x228] sm:$0xff]  }
  0xb4   : > { %3579 = vmatprep.subr.bf16.mxu1 %v4200_v27 }
  0xb6   : > { %3548 = vmatmul.mubr.bf16.gmra.mrb[4].mxu1 %v5297_v19 }
  0xb7   : > { %3756 = vmatmul.mubr.bf16.gmra.mrb[20].mxu0 %v4725_v61  ;;  %3551 = vmatprep.mubr.bf16.mxu1 %v4721_v17 }
  0xb8   : > { %3759 = vmatprep.mubr.bf16.mxu0 %v5292_v50  ;;  %3580 = vmatpush3.bf16.msra.mxu1 %v4200_v27  ;;  %v5304_v27 = vld [vmem:[#allocation11_spill] sm:$0xff] }
  0xb9   : > { %3581 = vmatprep.subr.bf16.mxu1 %v4202_v13 }
  0xbc   : > { %3582 = vmatpush3.bf16.msra.mxu1 %v4202_v13  ;;  %v4214_v13 = vld [vmem:[%s5240_s1 + $0x230] sm:$0xff]  }
  0xbd   : > { %3583 = vmatprep.subr.bf16.mxu1 %v4204_v55 }
  0xbe   : > { %3552 = vmatmul.mubr.bf16.gmra.mrb[8].mxu1 %v4739_v20 }
  0xbf   : > { %3760 = vmatmul.mubr.bf16.gmra.mrb[24].mxu0 %v5293_v36  ;;  %3555 = vmatprep.mubr.bf16.mxu1 %v4781_v37 }
  0xc0   : > { %3763 = vmatprep.mubr.bf16.mxu0 %v4996_v60  ;;  %3584 = vmatpush3.bf16.msra.mxu1 %v4204_v55  ;;  %v4215_v55 = vld [vmem:[%s5240_s1 + $0x238] sm:$0xff]  }
  0xc1   : > { %3585 = vmatprep.subr.bf16.mxu1 %v4206_v0 }
  0xc4   : > { %3586 = vmatpush3.bf16.msra.mxu1 %v4206_v0  ;;  %v5305_v0 = vld [vmem:[#allocation13_spill] sm:$0xff] }
  0xc5   : > { %3587 = vmatprep.subr.bf16.mxu1 %v4208_v45 }
  0xc6   : > { %3556 = vmatmul.mubr.bf16.gmra.mrb[12].mxu1 %v4787_v16 }
  0xc7   : > { %3764 = vmatmul.mubr.bf16.gmra.mrb[28].mxu0 %v2051_v12  ;;  %3559 = vmatprep.mubr.bf16.mxu1 %v4811_v7  ;;  %v2316_v12 = vrot.slane %v5017_v47, 1 }
  0xc8   : > { %3783 = vmatprep.mubr.bf16.mxu0 %v5298_v9  ;;  %3588 = vmatpush3.bf16.msra.mxu1 %v4208_v45  ;;  %v4217_v45 = vld [vmem:[%s5240_s1 + $0x108] sm:$0xff]  }
  0xc9   : > { %3589 = vmatprep.subr.bf16.mxu1 %v4210_v8 }
  0xcc   : > { %3590 = vmatpush3.bf16.msra.mxu1 %v4210_v8 }
  0xcd   : > { %3863 = vmatprep.subr.bf16.mxu1 %v4216_v33 }
  0xce   : > { %3560 = vmatmul.mubr.bf16.gmra.mrb[16].mxu1 %v4815_v4 }
  0xcf   : > { %3784 = vmatmul.mubr.bf16.vlgmr.msra.gmra.mrb[0].mxu0 %v5299_v22  ;;  %3563 = vmatprep.mubr.bf16.mxu1 %v4838_v42 }
  0xd0   : > { %3816 = vmatpush3.bf16.msra.mxu0 %v4205_v25  ;;  %3787 = vmatprep.mubr.bf16.mxu0 %v5300_v46  ;;  %v4212_v25 = vld [vmem:[%s5240_s1 + $0x220] sm:$0xff]  }
  0xd1   : > { %3817 = vmatprep.subr.bf16.mxu0 %v4207_v59 }
  0xd4   : > { %3818 = vmatpush3.bf16.msra.mxu0 %v4207_v59 }
  0xd5   : > { %3819 = vmatprep.subr.bf16.mxu0 %v4209_v49 }
  0xd6   : > { %3564 = vmatmul.mubr.bf16.gmra.mrb[20].mxu1 %v4840_v11 }
  0xd7   : > { %3788 = vmatmul.mubr.bf16.gmra.mrb[4].mxu0 %v5301_v38  ;;  %3567 = vmatprep.mubr.bf16.mxu1 %v4864_v43 }
  0xd8   : > { %3791 = vmatprep.mubr.bf16.mxu0 %v5302_v29  ;;  %3820 = vmatpush3.bf16.msra.mxu0 %v4209_v49 }
  0xd9   : > { %3821 = vmatprep.subr.bf16.mxu0 %v4211_v2 }
  0xdc   : > { %3822 = vmatpush3.bf16.msra.mxu0 %v4211_v2 }
  0xdd   : > { %3823 = vmatprep.subr.bf16.mxu0 %v4212_v25 }
  0xde   : > { %3568 = vmatmul.mubr.bf16.gmra.mrb[24].mxu1 %v4866_v26 }
  0xdf   : > { %3792 = vmatmul.mubr.bf16.gmra.mrb[8].mxu0 %v5303_v56  ;;  %3571 = vmatprep.mubr.bf16.mxu1 %v4895_v51 }
  0xe0   : > { %3795 = vmatprep.mubr.bf16.mxu0 %v5304_v27  ;;  %3824 = vmatpush3.bf16.msra.mxu0 %v4212_v25 }
  0xe1   : > { %3825 = vmatprep.subr.bf16.mxu0 %v4213_v53 }
  0xe4   : > { %3826 = vmatpush3.bf16.msra.mxu0 %v4213_v53 }
  0xe5   : > { %3827 = vmatprep.subr.bf16.mxu0 %v4214_v13 }
  0xe6   : > { %3572 = vmatmul.mubr.bf16.gmra.mrb[28].mxu1 %v4897_v18 }
  0xe7   : > { %3796 = vmatmul.mubr.bf16.gmra.mrb[12].mxu0 %v5305_v0  ;;  %3591 = vmatprep.mubr.bf16.mxu1 %v4327_v21  ;;  %v4218_v21 = vld [vmem:[%s5240_s1 + $0x110] sm:$0xff]  }
  0xe8   : > { %3799 = vmatprep.mubr.bf16.mxu0 %v5306_v41  ;;  %3828 = vmatpush3.bf16.msra.mxu0 %v4214_v13 }
  0xe9   : > { %3829 = vmatprep.subr.bf16.mxu0 %v4215_v55 }
  0xec   : > { %3830 = vmatpush3.bf16.msra.mxu0 %v4215_v55 }
  0xee   : > { %3592 = vmatmul.mubr.bf16.vlgmr.msra.gmra.mrb[0].mxu1 %v4361_v39  ;;  %v4219_v39 = vld [vmem:[%s5240_s1 + $0x118] sm:$0xff]  }
  0xef   : > { %3800 = vmatmul.mubr.bf16.gmra.mrb[16].mxu0 %v4719_v35  ;;  %3871 = vmatpush3.bf16.msra.mxu1 %v4216_v33 }
  0xf0   : > { %3595 = vmatprep.mubr.bf16.mxu1 %v4400_v57  ;;  %3803 = vmatprep.mubr.bf16.mxu0 %v5307_v48  ;;  %v2313_v57 = vrot.slane %v5005_v1, 1  ;;  %v2317_v1 = vsel %vm306_vm0, %v2314_v62, %v2316_v12 }
  0xf1   : > { %3864 = vmatprep.subr.bf16.mxu1 %v4217_v45 }
  0xf3   : > { %3872 = vmatpush3.bf16.msra.mxu1 %v4217_v45 }
  0xf4   : > { %3865 = vmatprep.subr.bf16.mxu1 %v4218_v21 }
  0xf6   : > { %3596 = vmatmul.mubr.bf16.gmra.mrb[4].mxu1 %v4404_v58  ;;  %v4220_v58 = vld [vmem:[%s5240_s1 + $0x120] sm:$0xff]  }
  0xf7   : > { %3804 = vmatmul.mubr.bf16.gmra.mrb[20].mxu0 %v4777_v24  ;;  %3599 = vmatprep.mubr.bf16.mxu1 %v4423_v3  ;;  %v2315_v3 = vsel %vm306_vm0, %v2313_v57, %v2314_v62 }
  0xf8   : > { %3807 = vmatprep.mubr.bf16.mxu0 %v4783_v28  ;;  %3873 = vmatpush3.bf16.msra.mxu1 %v4218_v21  ;;  %v2320_v47 = vpack.c.bf16 %v2317_v1, %v2315_v3 }
  0xf9   : > { %3866 = vmatprep.subr.bf16.mxu1 %v4219_v39 }
  0xfc   : > { %3874 = vmatpush3.bf16.msra.mxu1 %v4219_v39 }
  0xfd   : > { %3867 = vmatprep.subr.bf16.mxu1 %v4220_v58 }
  0xfe   : > { %3600 = vmatmul.mubr.bf16.gmra.mrb[8].mxu1 %v4442_v15  ;;  %v4222_v15 = vld [vmem:[%s5240_s1 + $0x130] sm:$0xff]  }
  0xff   : > { %3808 = vmatmul.mubr.bf16.gmra.mrb[24].mxu0 %v4808_v54  ;;  %3603 = vmatprep.mubr.bf16.mxu1 %v4456_v23  ;;  %v4223_v23 = vld [vmem:[%s5240_s1 + $0x138] sm:$0xff]  }
 0x100   : > { %3811 = vmatprep.mubr.bf16.mxu0 %v4917_v30  ;;  %3875 = vmatpush3.bf16.msra.mxu1 %v4220_v58 }
 0x101   : > { %3868 = vmatprep.subr.bf16.mxu1 %v4221_v34 }
 0x104   : > { %3876 = vmatpush3.bf16.msra.mxu1 %v4221_v34 }
 0x105   : > { %3869 = vmatprep.subr.bf16.mxu1 %v4222_v15 }
 0x106   : > { %3604 = vmatmul.mubr.bf16.gmra.mrb[12].mxu1 %v5289_v63 }
 0x107   : > { %3812 = vmatmul.mubr.bf16.gmra.mrb[28].mxu0 %v2320_v47  ;;  %3607 = vmatprep.mubr.bf16.mxu1 %v5290_v6 }
 0x108   : > { %3831 = vmatprep.mubr.bf16.mxu0 %v5296_v14  ;;  %3877 = vmatpush3.bf16.msra.mxu1 %v4222_v15 }
 0x109   : > { %3870 = vmatprep.subr.bf16.mxu1 %v4223_v23 }
 0x10c   : > { %3878 = vmatpush3.bf16.msra.mxu1 %v4223_v23 }
 0x10e   : > { %3608 = vmatmul.mubr.bf16.gmra.mrb[16].mxu1 %v5291_v44 }
 0x10f   : > { %3832 = vmatmul.mubr.bf16.vlgmr.msra.gmra.mrb[0].mxu0 %v5297_v19  ;;  %3611 = vmatprep.mubr.bf16.mxu1 %v4713_v32 }
 0x110   : > { %3835 = vmatprep.mubr.bf16.mxu0 %v4721_v17 }
 0x116   : > { %3612 = vmatmul.mubr.bf16.gmra.mrb[20].mxu1 %v4717_v52 }
 0x117   : > { %3836 = vmatmul.mubr.bf16.gmra.mrb[4].mxu0 %v4739_v20  ;;  %3615 = vmatprep.mubr.bf16.mxu1 %v4725_v61 }
 0x118   : > { %3839 = vmatprep.mubr.bf16.mxu0 %v4781_v37 }
 0x11e   : > { %3616 = vmatmul.mubr.bf16.gmra.mrb[24].mxu1 %v5292_v50 }
 0x11f   : > { %3840 = vmatmul.mubr.bf16.gmra.mrb[8].mxu0 %v4787_v16  ;;  %3619 = vmatprep.mubr.bf16.mxu1 %v5293_v36 }
 0x120   : > { %3843 = vmatprep.mubr.bf16.mxu0 %v4811_v7 }
 0x126   : > { %3620 = vmatmul.mubr.bf16.gmra.mrb[28].mxu1 %v4996_v60 }
 0x127   : > { %3844 = vmatmul.mubr.bf16.gmra.mrb[12].mxu0 %v4815_v4  ;;  %3655 = vmatprep.mubr.bf16.mxu1 %v5305_v0 }
 0x128   : > { %3847 = vmatprep.mubr.bf16.mxu0 %v4838_v42 }
 0x12e   : > { %3656 = vmatmul.mubr.bf16.vlgmr.msra.gmra.mrb[16].mxu1 %v5306_v41 }
 0x12f   : > { %3848 = vmatmul.mubr.bf16.gmra.mrb[16].mxu0 %v4840_v11  ;;  %3659 = vmatprep.mubr.bf16.mxu1 %v4719_v35 }
 0x130   : > { %3851 = vmatprep.mubr.bf16.mxu0 %v4864_v43 }
 0x136   : > { %3660 = vmatmul.mubr.bf16.gmra.mrb[20].mxu1 %v5307_v48 }
 0x137   : > { %3852 = vmatmul.mubr.bf16.gmra.mrb[20].mxu0 %v4866_v26  ;;  %3663 = vmatprep.mubr.bf16.mxu1 %v4777_v24 }
 0x138   : > { %3855 = vmatprep.mubr.bf16.mxu0 %v4895_v51  ;;  %v5160_v51 = vld [vmem:[%s5241_s2] ss:$0 sm:$0xff] }
 0x13e   : > { %3664 = vmatmul.mubr.bf16.gmra.mrb[24].mxu1 %v4783_v28 }
 0x13f   : > { %3856 = vmatmul.mubr.bf16.gmra.mrb[24].mxu0 %v4897_v18  ;;  %3667 = vmatprep.mubr.bf16.mxu1 %v4808_v54 }
 0x140   : > { %3859 = vmatprep.mubr.bf16.mxu0 %v4919_v10 }
 0x146   : > { %3668 = vmatmul.mubr.bf16.gmra.mrb[28].mxu1 %v4917_v30 }
 0x147   : > { %3860 = vmatmul.mubr.bf16.gmra.mrb[28].mxu0 %v2586_v31 }
 0x1c1   : > { %v3593_v32 = vpop.f32.mrb[0].mxu1 }
 0x1c2   : > { %v1357_v52 = vpop.f32.mrb[1].mxu1 }
 0x1c3   : > { %v3594_v35 = vpop.f32.mrb[2].mxu1 }
 0x1c4   : > { %v1360_v17 = vpop.f32.mrb[3].mxu1 }
 0x1c9   : > { %v3597_v61 = vpop.f32.mrb[4].mxu1 }
 0x1ca   : > { %v1373_v24 = vpop.f32.mrb[5].mxu1 }
 0x1cb   : > { %v3598_v20 = vpop.f32.mrb[6].mxu1 }
 0x1cc   : > { %v1376_v37 = vpop.f32.mrb[7].mxu1 }
 0x1d1   : > { %v3601_v28 = vpop.f32.mrb[8].mxu1 }
 0x1d2   : > { %v1389_v16 = vpop.f32.mrb[9].mxu1 }
 0x1d3   : > { %v3602_v54 = vpop.f32.mrb[10].mxu1 }
 0x1d4   : > { %v1392_v7 = vpop.f32.mrb[11].mxu1 }
 0x1d9   : > { %v5149_v4 = vpop.f32.mrb[12].mxu1 }
 0x1da   : > { %v5151_v42 = vpop.f32.mrb[13].mxu1 }
 0x1db   : > { %v5153_v11 = vpop.f32.mrb[14].mxu1 }
 0x1dc   : > { %v5155_v43 = vpop.f32.mrb[15].mxu1 }
 0x1e2   : > { %v3833_v26 = vpop.f32.mrb[0].mxu0 }
 0x1e3   : > { %v3879_v18 = vadd.f32 %v3833_v26, %v3593_v32  ;;  %v2686_v30 = vpop.f32.mrb[1].mxu0 }
 0x1e4   : > { %v3880_v10 = vadd.f32 %v2686_v30, %v1357_v52  ;;  %v3834_v63 = vpop.f32.mrb[2].mxu0 }
 0x1e5   : > { %v2854_v6 = vadd.f32 %v3879_v18, %v5160_v51  ;;  %v3881_v44 = vadd.f32 %v3834_v63, %v3594_v35  ;;  %v2689_v50 = vpop.f32.mrb[3].mxu0 }
 0x1e6   : > { %v2852_v36 = vadd.f32 %v3880_v10, %v5160_v51  ;;  %v3882_v14 = vadd.f32 %v2689_v50, %v1360_v17 }
 0x1e7   : > { %v2886_v19 = vmax.f32 %v2854_v6, 0.0  ;;  %v2855_v60 = vadd.f32 %v3881_v44, %v5160_v51 }
 0x1e8   : > { %v2884_v5 = vmax.f32 %v2852_v36, 0.0  ;;  %v2853_v40 = vadd.f32 %v3882_v14, %v5160_v51 }
 0x1e9   : > { %2918 = vst [vmem:[%s5167_s9 + $0x10] sm:$0xff] %v2886_v19  ;;  %v2887_v8 = vmax.f32 %v2855_v60, 0.0 }
 0x1ea   : > { %2916 = vst [vmem:[%s5167_s9] sm:$0xff] %v2884_v5  ;;  %v2885_v31 = vmax.f32 %v2853_v40, 0.0  ;;  %v3837_v9 = vpop.f32.mrb[4].mxu0 }
 0x1eb   : > { %2919 = vst [vmem:[%s5167_s9 + $0x18] sm:$0xff] %v2887_v8  ;;  %v3883_v59 = vadd.f32 %v3837_v9, %v3597_v61  ;;  %v2702_v33 = vpop.f32.mrb[5].mxu0 }
 0x1ec   : > { %2917 = vst [vmem:[%s5167_s9 + $0x8] sm:$0xff] %v2885_v31  ;;  %v3884_v22 = vadd.f32 %v2702_v33, %v1373_v24  ;;  %v3838_v46 = vpop.f32.mrb[6].mxu0 }
 0x1ed   : > { %v2858_v49 = vadd.f32 %v3883_v59, %v5160_v51  ;;  %v3885_v2 = vadd.f32 %v3838_v46, %v3598_v20  ;;  %v2705_v38 = vpop.f32.mrb[7].mxu0 }
 0x1ee   : > { %v2856_v29 = vadd.f32 %v3884_v22, %v5160_v51  ;;  %v3886_v25 = vadd.f32 %v2705_v38, %v1376_v37 }
 0x1ef   : > { %v2890_v53 = vmax.f32 %v2858_v49, 0.0  ;;  %v2859_v56 = vadd.f32 %v3885_v2, %v5160_v51 }
 0x1f0   : > { %v2888_v27 = vmax.f32 %v2856_v29, 0.0  ;;  %v2857_v13 = vadd.f32 %v3886_v25, %v5160_v51 }
 0x1f1   : > { %2922 = vst [vmem:[%s5167_s9 + $0x30] sm:$0xff] %v2890_v53  ;;  %v2891_v55 = vmax.f32 %v2859_v56, 0.0 }
 0x1f2   : > { %2920 = vst [vmem:[%s5167_s9 + $0x20] sm:$0xff] %v2888_v27  ;;  %v2889_v0 = vmax.f32 %v2857_v13, 0.0  ;;  %v3841_v41 = vpop.f32.mrb[8].mxu0 }
 0x1f3   : > { %2923 = vst [vmem:[%s5167_s9 + $0x38] sm:$0xff] %v2891_v55  ;;  %v3887_v48 = vadd.f32 %v3841_v41, %v3601_v28  ;;  %v2718_v45 = vpop.f32.mrb[9].mxu0 }
 0x1f4   : > { %2921 = vst [vmem:[%s5167_s9 + $0x28] sm:$0xff] %v2889_v0  ;;  %v3888_v21 = vadd.f32 %v2718_v45, %v1389_v16  ;;  %v3842_v39 = vpop.f32.mrb[10].mxu0 }
 0x1f5   : > { %v2862_v57 = vadd.f32 %v3887_v48, %v5160_v51  ;;  %v3889_v62 = vadd.f32 %v3842_v39, %v3602_v54  ;;  %v2721_v12 = vpop.f32.mrb[11].mxu0 }
 0x1f6   : > { %v2860_v58 = vadd.f32 %v3888_v21, %v5160_v51  ;;  %v3890_v3 = vadd.f32 %v2721_v12, %v1392_v7 }
 0x1f7   : > { %v2894_v1 = vmax.f32 %v2862_v57, 0.0  ;;  %v2863_v34 = vadd.f32 %v3889_v62, %v5160_v51 }
 0x1f8   : > { %v2892_v47 = vmax.f32 %v2860_v58, 0.0  ;;  %v2861_v15 = vadd.f32 %v3890_v3, %v5160_v51 }
 0x1f9   : > { %2926 = vst [vmem:[%s5167_s9 + $0x50] sm:$0xff] %v2894_v1  ;;  %v2895_v23 = vmax.f32 %v2863_v34, 0.0 }
 0x1fa   : > { %2924 = vst [vmem:[%s5167_s9 + $0x40] sm:$0xff] %v2892_v47  ;;  %v2893_v32 = vmax.f32 %v2861_v15, 0.0  ;;  %v3845_v52 = vpop.f32.mrb[12].mxu0 }
 0x1fb   : > { %2927 = vst [vmem:[%s5167_s9 + $0x58] sm:$0xff] %v2895_v23  ;;  %v3891_v35 = vadd.f32 %v3845_v52, %v5149_v4  ;;  %v2734_v17 = vpop.f32.mrb[13].mxu0 }
 0x1fc   : > { %2925 = vst [vmem:[%s5167_s9 + $0x48] sm:$0xff] %v2893_v32  ;;  %v3892_v61 = vadd.f32 %v2734_v17, %v5151_v42  ;;  %v3846_v24 = vpop.f32.mrb[14].mxu0 }
 0x1fd   : > { %v2866_v20 = vadd.f32 %v3891_v35, %v5160_v51  ;;  %v3893_v37 = vadd.f32 %v3846_v24, %v5153_v11  ;;  %v2737_v28 = vpop.f32.mrb[15].mxu0 }
 0x1fe   : > { %v2864_v16 = vadd.f32 %v3892_v61, %v5160_v51  ;;  %v3894_v54 = vadd.f32 %v2737_v28, %v5155_v43 }
 0x1ff   : > { %v2898_v7 = vmax.f32 %v2866_v20, 0.0  ;;  %v2867_v4 = vadd.f32 %v3893_v37, %v5160_v51 }
 0x200   : > { %v2896_v26 = vmax.f32 %v2864_v16, 0.0  ;;  %v2865_v18 = vadd.f32 %v3894_v54, %v5160_v51 }
 0x201   : > { %2930 = vst [vmem:[%s5167_s9 + $0x70] sm:$0xff] %v2898_v7  ;;  %v2899_v42 = vmax.f32 %v2867_v4, 0.0  ;;  %v3657_v30 = vpop.f32.mrb[16].mxu1 }
 0x202   : > { %2928 = vst [vmem:[%s5167_s9 + $0x60] sm:$0xff] %v2896_v26  ;;  %v2897_v10 = vmax.f32 %v2865_v18, 0.0  ;;  %v3849_v63 = vpop.f32.mrb[16].mxu0  ;;  %v1690_v6 = vpop.f32.mrb[17].mxu1 }
 0x203   : > { %2931 = vst [vmem:[%s5167_s9 + $0x78] sm:$0xff] %v2899_v42  ;;  %v3895_v11 = vadd.f32 %v3849_v63, %v3657_v30  ;;  %v2750_v44 = vpop.f32.mrb[17].mxu0  ;;  %v3658_v50 = vpop.f32.mrb[18].mxu1 }
 0x204   : > { %2929 = vst [vmem:[%s5167_s9 + $0x68] sm:$0xff] %v2897_v10  ;;  %v3896_v43 = vadd.f32 %v2750_v44, %v1690_v6  ;;  %v3850_v36 = vpop.f32.mrb[18].mxu0  ;;  %v1693_v14 = vpop.f32.mrb[19].mxu1 }
 0x205   : > { %v2870_v19 = vadd.f32 %v3895_v11, %v5160_v51  ;;  %v3897_v60 = vadd.f32 %v3850_v36, %v3658_v50  ;;  %v2753_v5 = vpop.f32.mrb[19].mxu0 }
 0x206   : > { %v2868_v40 = vadd.f32 %v3896_v43, %v5160_v51  ;;  %v3898_v8 = vadd.f32 %v2753_v5, %v1693_v14 }
 0x207   : > { %v2902_v31 = vmax.f32 %v2870_v19, 0.0  ;;  %v2871_v9 = vadd.f32 %v3897_v60, %v5160_v51 }
 0x208   : > { %v2900_v59 = vmax.f32 %v2868_v40, 0.0  ;;  %v2869_v33 = vadd.f32 %v3898_v8, %v5160_v51 }
 0x209   : > { %2934 = vst [vmem:[%s5167_s9 + $0x90] sm:$0xff] %v2902_v31  ;;  %v2903_v22 = vmax.f32 %v2871_v9, 0.0  ;;  %v3661_v46 = vpop.f32.mrb[20].mxu1 }
 0x20a   : > { %2932 = vst [vmem:[%s5167_s9 + $0x80] sm:$0xff] %v2900_v59  ;;  %v2901_v49 = vmax.f32 %v2869_v33, 0.0  ;;  %v3853_v2 = vpop.f32.mrb[20].mxu0  ;;  %v1706_v38 = vpop.f32.mrb[21].mxu1 }
 0x20b   : > { %2935 = vst [vmem:[%s5167_s9 + $0x98] sm:$0xff] %v2903_v22  ;;  %v3899_v29 = vadd.f32 %v3853_v2, %v3661_v46  ;;  %v2766_v25 = vpop.f32.mrb[21].mxu0  ;;  %v3662_v53 = vpop.f32.mrb[22].mxu1 }
 0x20c   : > { %2933 = vst [vmem:[%s5167_s9 + $0x88] sm:$0xff] %v2901_v49  ;;  %v3900_v56 = vadd.f32 %v2766_v25, %v1706_v38  ;;  %v3854_v27 = vpop.f32.mrb[22].mxu0  ;;  %v1709_v13 = vpop.f32.mrb[23].mxu1 }
 0x20d   : > { %v2874_v55 = vadd.f32 %v3899_v29, %v5160_v51  ;;  %v3901_v0 = vadd.f32 %v3854_v27, %v3662_v53  ;;  %v2769_v41 = vpop.f32.mrb[23].mxu0 }
 0x20e   : > { %v2872_v48 = vadd.f32 %v3900_v56, %v5160_v51  ;;  %v3902_v45 = vadd.f32 %v2769_v41, %v1709_v13 }
 0x20f   : > { %v2906_v21 = vmax.f32 %v2874_v55, 0.0  ;;  %v2875_v39 = vadd.f32 %v3901_v0, %v5160_v51 }
 0x210   : > { %v2904_v57 = vmax.f32 %v2872_v48, 0.0  ;;  %v2873_v62 = vadd.f32 %v3902_v45, %v5160_v51 }
 0x211   : > { %2938 = vst [vmem:[%s5167_s9 + $0xb0] sm:$0xff] %v2906_v21  ;;  %v2907_v12 = vmax.f32 %v2875_v39, 0.0  ;;  %v3665_v58 = vpop.f32.mrb[24].mxu1 }
 0x212   : > { %2936 = vst [vmem:[%s5167_s9 + $0xa0] sm:$0xff] %v2904_v57  ;;  %v2905_v3 = vmax.f32 %v2873_v62, 0.0  ;;  %v3857_v1 = vpop.f32.mrb[24].mxu0  ;;  %v1722_v34 = vpop.f32.mrb[25].mxu1 }
 0x213   : > { %2939 = vst [vmem:[%s5167_s9 + $0xb8] sm:$0xff] %v2907_v12  ;;  %v3903_v47 = vadd.f32 %v3857_v1, %v3665_v58  ;;  %v2782_v15 = vpop.f32.mrb[25].mxu0  ;;  %v3666_v23 = vpop.f32.mrb[26].mxu1 }
 0x214   : > { %2937 = vst [vmem:[%s5167_s9 + $0xa8] sm:$0xff] %v2905_v3  ;;  %v3904_v32 = vadd.f32 %v2782_v15, %v1722_v34  ;;  %v3858_v52 = vpop.f32.mrb[26].mxu0  ;;  %v1725_v35 = vpop.f32.mrb[27].mxu1 }
 0x215   : > { %v2878_v17 = vadd.f32 %v3903_v47, %v5160_v51  ;;  %v3905_v61 = vadd.f32 %v3858_v52, %v3666_v23  ;;  %v2785_v24 = vpop.f32.mrb[27].mxu0 }
 0x216   : > { %v2876_v20 = vadd.f32 %v3904_v32, %v5160_v51  ;;  %v3906_v37 = vadd.f32 %v2785_v24, %v1725_v35 }
 0x217   : > { %v2910_v28 = vmax.f32 %v2878_v17, 0.0  ;;  %v2879_v16 = vadd.f32 %v3905_v61, %v5160_v51 }
 0x218   : > { %v2908_v54 = vmax.f32 %v2876_v20, 0.0  ;;  %v2877_v7 = vadd.f32 %v3906_v37, %v5160_v51 }
 0x219   : > { %2942 = vst [vmem:[%s5167_s9 + $0xd0] sm:$0xff] %v2910_v28  ;;  %v2911_v4 = vmax.f32 %v2879_v16, 0.0  ;;  %v3669_v26 = vpop.f32.mrb[28].mxu1 }
 0x21a   : > { %2940 = vst [vmem:[%s5167_s9 + $0xc0] sm:$0xff] %v2908_v54  ;;  %v2909_v18 = vmax.f32 %v2877_v7, 0.0  ;;  %v3861_v42 = vpop.f32.mrb[28].mxu0  ;;  %v1738_v30 = vpop.f32.mrb[29].mxu1 }
 0x21b   : > { %2943 = vst [vmem:[%s5167_s9 + $0xd8] sm:$0xff] %v2911_v4  ;;  %v3907_v10 = vadd.f32 %v3861_v42, %v3669_v26  ;;  %v2798_v63 = vpop.f32.mrb[29].mxu0  ;;  %v3670_v6 = vpop.f32.mrb[30].mxu1 }
 0x21c   : > { %2941 = vst [vmem:[%s5167_s9 + $0xc8] sm:$0xff] %v2909_v18  ;;  %v3908_v11 = vadd.f32 %v2798_v63, %v1738_v30  ;;  %v3862_v44 = vpop.f32.mrb[30].mxu0  ;;  %v1741_v50 = vpop.f32.mrb[31].mxu1 }
 0x21d   : > { %v2882_v43 = vadd.f32 %v3907_v10, %v5160_v51  ;;  %v3909_v36 = vadd.f32 %v3862_v44, %v3670_v6  ;;  %v2801_v14 = vpop.f32.mrb[31].mxu0 }
 0x21e   : > { %v2880_v19 = vadd.f32 %v3908_v11, %v5160_v51  ;;  %v3910_v60 = vadd.f32 %v2801_v14, %v1741_v50 }
 0x21f   : > { %v2914_v5 = vmax.f32 %v2882_v43, 0.0  ;;  %v2883_v40 = vadd.f32 %v3909_v36, %v5160_v51 }
 0x220   : > { %v2912_v8 = vmax.f32 %v2880_v19, 0.0  ;;  %v2881_v31 = vadd.f32 %v3910_v60, %v5160_v51 }
 0x221   : > { %2946 = vst [vmem:[%s5167_s9 + $0xf0] sm:$0xff] %v2914_v5  ;;  %v2915_v9 = vmax.f32 %v2883_v40, 0.0 }
 0x222   : > { %2944 = vst [vmem:[%s5167_s9 + $0xe0] sm:$0xff] %v2912_v8  ;;  %v2913_v59 = vmax.f32 %v2881_v31, 0.0 }
 0x223   : > { %2947 = vst [vmem:[%s5167_s9 + $0xf8] sm:$0xff] %v2915_v9 }
 0x224   : > { %2945 = vst [vmem:[%s5167_s9 + $0xe8] sm:$0xff] %v2913_v59 }
 0x225 PF: > { %s13_s12 = sadd.s32 1, %s4230_s12  }
 0x226   : > { %p10_p4 = scmp.ge.s32.totalorder %s13_s12, 6  }
 0x228   :  { %12 = sbr.rel (!%p10_p4) target bundleno = 1 (0x1), region = 70 }

// kernel: contextual_loss_forward.6
= control target key start
LH: loop header
LB: loop body
LE: loop exit
PB: predicated region body
PF: predicated region fallthrough
CT: control target
= control target key end

     0   :  { %s2357_s12 = smov 0   ;;  %s2824_s0 = inlined_call_operand.vmem [shape: f32[4,10,10,128], index: 0, kind: input, shape index: {}]   ;;  %s2825_s1 = inlined_call_operand.vmem [shape: bf16[9,128,128], index: 1, kind: input, shape index: {}]   ;;  %s2826_s2 = inlined_call_operand.vmem [shape: f32[1,128], index: 2, kind: input, shape index: {}]   ;;  %s2827_s3 = inlined_call_operand.vmem [shape: f32[4,64,128], index: 3, kind: output, shape index: {}]  }
   0x1 LB: > { %s1632_s13 = sadd.s32 4294967295, %s2335_s12   ;;  %p1636_p0 = scmp.ge.s32.totalorder %s2335_s12, 1  ;;  %s2335_s12 = sphi %s2357_s12, %s13_s12  }
   0x2   : > { %p137_p1 = scmp.lt.s32.totalorder %s2335_s12, 5 }
   0x4   : > { %p138_p2 = pnand %p1636_p0, %p137_p1 }
   0x5   : > { %v2257_v0 = vld [vmem:[%s2825_s1 + $0x40] sm:$0xff] (!%p138_p2)   ;;  %p161_p3 = scmp.lt.s32.totalorder (!%p138_p2), %s1632_s13, 3  ;;  %v2259_v2 = vld [vmem:[%s2825_s1 + $0x48] sm:$0xff] (!%p138_p2)   ;;  %v2261_v4 = vld [vmem:[%s2825_s1 + $0x50] sm:$0xff] (!%p138_p2)   ;;  %vm228_vm0 = vcmask (!%p138_p2), 1046528   ;;  %vm508_vm1 = vcmask (!%p138_p2), 1045504  }
   0x6   : > { %141 = sbr.rel (%p138_p2) target bundleno = 389 (0x185), region = 32  ;;  %v2258_v1 = vld [vmem:[%s2825_s1 + $0x100] sm:$0xff] (!%p138_p2)   ;;  %1952 = vmatprep.subr.bf16.mxu1 (!%p138_p2), %v2257_v0  ;;  %v2260_v3 = vld [vmem:[%s2825_s1 + $0x108] sm:$0xff] (!%p138_p2)   ;;  %v2262_v5 = vld [vmem:[%s2825_s1 + $0x110] sm:$0xff] (!%p138_p2)  }
   0x7   : > { %2048 = vmatprep.subr.bf16.mxu0 (!%p138_p2), %v2258_v1  ;;  %1953 = vmatpush3.bf16.msra.mxu1 (!%p138_p2), %v2257_v0  ;;  %v2263_v6 = vld [vmem:[%s2825_s1 + $0x58] sm:$0xff] (!%p138_p2)   ;;  %v2265_v8 = vld [vmem:[%s2825_s1 + $0x60] sm:$0xff] (!%p138_p2)   ;;  %v2267_v10 = vld [vmem:[%s2825_s1 + $0x68] sm:$0xff] (!%p138_p2)  }
   0x8   : > { %2049 = vmatpush3.bf16.msra.mxu0 (!%p138_p2), %v2258_v1  ;;  %1954 = vmatprep.subr.bf16.mxu1 (!%p138_p2), %v2259_v2  ;;  %v2264_v7 = vld [vmem:[%s2825_s1 + $0x118] sm:$0xff] (!%p138_p2)   ;;  %v2266_v9 = vld [vmem:[%s2825_s1 + $0x120] sm:$0xff] (!%p138_p2)   ;;  %v2268_v14 = vld [vmem:[%s2825_s1 + $0x128] sm:$0xff] (!%p138_p2)  }
   0x9   : > { %2050 = vmatprep.subr.bf16.mxu0 (!%p138_p2), %v2260_v3  ;;  %v2269_v23 = vld [vmem:[%s2825_s1 + $0x70] sm:$0xff] (!%p138_p2)   ;;  %v2271_v31 = vld [vmem:[%s2825_s1 + $0x78] sm:$0xff] (!%p138_p2)   ;;  %v2273_v44 = vld [vmem:[%s2825_s1] sm:$0xff] (!%p138_p2)  }
   0xa   : > { %v2270_v29 = vld [vmem:[%s2825_s1 + $0x130] sm:$0xff] (!%p138_p2)   ;;  %v2272_v40 = vld [vmem:[%s2825_s1 + $0x138] sm:$0xff] (!%p138_p2)   ;;  %v2274_v46 = vld [vmem:[%s2825_s1 + $0x140] sm:$0xff] (!%p138_p2)  }
   0xb   : > { %1955 = vmatpush3.bf16.msra.mxu1 (!%p138_p2), %v2259_v2  ;;  %v2275_v49 = vld [vmem:[%s2825_s1 + $0x8] sm:$0xff] (!%p138_p2)   ;;  %v2277_v58 = vld [vmem:[%s2825_s1 + $0x10] sm:$0xff] (!%p138_p2)  }
   0xc   : > { %2051 = vmatpush3.bf16.msra.mxu0 (!%p138_p2), %v2260_v3  ;;  %1956 = vmatprep.subr.bf16.mxu1 (!%p138_p2), %v2261_v4  ;;  %v2276_v51 = vld [vmem:[%s2825_s1 + $0x148] sm:$0xff] (!%p138_p2)   ;;  %v2278_v2 = vld [vmem:[%s2825_s1 + $0x150] sm:$0xff] (!%p138_p2)  }
   0xd   : > { %s2829_s13 = smov (!%p161_p3, %s1632_s13), 3  ;;  %2052 = vmatprep.subr.bf16.mxu0 %v2262_v5 }
   0xe   : > { %s2248_s30 = smul.u32 160, %s2829_s13  ;;  %s1843_s15 = sshll.u32 %s2829_s13, 6 }
   0xf   : > { %1957 = vmatpush3.bf16.msra.mxu1 %v2261_v4  ;;  %s170_s18 = scalar_lea.vmem %s2827_s3, %s1843_s15 }
  0x10   : > { %2053 = vmatpush3.bf16.msra.mxu0 %v2262_v5  ;;  %1958 = vmatprep.subr.bf16.mxu1 %v2263_v6  ;;  %s2401_s10 = scalar_lea.vmem %s2824_s0, %s2248_s30 }
  0x11   : > { %2054 = vmatprep.subr.bf16.mxu0 %v2264_v7  ;;  %v2407_v11 = vld [vmem:[%s2401_s10] sm:$0xff]  ;;  %v2410_v12 = vld [vmem:[%s2401_s10 + $0x8] sm:$0x3]  ;;  %v2413_v13 = vld [vmem:[%s2401_s10 + $0x10] sm:$0xff] }
  0x12   : > { %v2419_v15 = vld [vmem:[%s2401_s10 + $0x18] sm:$0x3]  ;;  %v229_v16 = vrot.slane %v2407_v11, 1  ;;  %v230_v17 = vrot.slane %v2410_v12, 1  ;;  %v232_v18 = vrot.slane %v2413_v13, 1  ;;  %v2427_v21 = vld [vmem:[%s2401_s10 + $0x20] sm:$0xff] }
  0x13   : > { %1959 = vmatpush3.bf16.msra.mxu1 %v2263_v6  ;;  %v233_v19 = vrot.slane %v2419_v15, 1  ;;  %v2430_v22 = vld [vmem:[%s2401_s10 + $0x28] sm:$0x3]  ;;  %v2437_v25 = vld [vmem:[%s2401_s10 + $0x30] sm:$0xff]  ;;  %v2440_v26 = vld [vmem:[%s2401_s10 + $0x38] sm:$0x3]  ;;  %v683_v41 = vpack.c.bf16 %v2427_v21, %v2413_v13 }
  0x14   : > { %2055 = vmatpush3.bf16.msra.mxu0 %v2264_v7  ;;  %1960 = vmatprep.subr.bf16.mxu1 %v2265_v8  ;;  %v231_v20 = vsel %vm228_vm0, %v229_v16, %v230_v17  ;;  %v235_v27 = vrot.slane %v2427_v21, 1  ;;  %v236_v28 = vrot.slane %v2430_v22, 1  ;;  %v2452_v33 = vld [vmem:[%s2401_s10 + $0x40] sm:$0xff]  ;;  %v2455_v34 = vld [vmem:[%s2401_s10 + $0x48] sm:$0x3]  ;;  %v238_v35 = vrot.slane %v2437_v25, 1 }
  0x15   : > { %2056 = vmatprep.subr.bf16.mxu0 %v2266_v9  ;;  %v234_v24 = vsel %vm228_vm0, %v232_v18, %v233_v19  ;;  %v239_v36 = vrot.slane %v2440_v26, 1  ;;  %v241_v38 = vrot.slane %v2452_v33, 1  ;;  %v242_v39 = vrot.slane %v2455_v34, 1  ;;  %v2486_v52 = vld [vmem:[%s2401_s10 + $0x50] sm:$0xff]  ;;  %v2489_v53 = vld [vmem:[%s2401_s10 + $0x58] sm:$0x3] }
  0x16   : > { %v261_v30 = vpack.c.bf16 %v234_v24, %v231_v20  ;;  %v237_v32 = vsel %vm228_vm0, %v235_v27, %v236_v28  ;;  %v684_v42 = vpack.c.bf16 %v2452_v33, %v2437_v25  ;;  %v513_v50 = vrot.slane %v2419_v15, 2  ;;  %v2500_v59 = vld [vmem:[%s2401_s10 + $0x60] sm:$0xff]  ;;  %v2503_v60 = vld [vmem:[%s2401_s10 + $0x68] sm:$0x3]  ;;  %v2517_v4 = vld [vmem:[%s2401_s10 + $0x70] sm:$0xff] }
  0x17   : > { %1961 = vmatpush3.bf16.msra.mxu1 %v2265_v8  ;;  %v831_v37 = vpack.c.bf16 %v237_v32, %v234_v24  ;;  %v240_v43 = vsel %vm228_vm0, %v238_v35, %v239_v36  ;;  %v243_v45 = vsel %vm228_vm0, %v241_v38, %v242_v39  ;;  %v512_v54 = vrot.slane %v2413_v13, 2  ;;  %v2520_v5 = vld [vmem:[%s2401_s10 + $0x78] sm:$0x3]  ;;  %v2283_v35 = vld [vmem:[%s2825_s1 + $0x28] sm:$0xff]  }
  0x18   : > { %2057 = vmatpush3.bf16.msra.mxu0 %v2266_v9  ;;  %1962 = vmatprep.subr.bf16.mxu1 %v2267_v10  ;;  %v2476_v47 = vpack.c.bf16 %v240_v43, %v237_v32  ;;  %v832_v48 = vpack.c.bf16 %v243_v45, %v240_v43  ;;  %v244_v55 = vrot.slane %v2486_v52, 1  ;;  %v245_v56 = vrot.slane %v2489_v53, 1  ;;  %v2526_v9 = vld [vmem:[%s2401_s10 + $0x80] sm:$0xff]  ;;  %v2279_v17 = vld [vmem:[%s2825_s1 + $0x18] sm:$0xff]   ;;  %v2284_v36 = vld [vmem:[%s2825_s1 + $0x168] sm:$0xff]  }
  0x19   : > { %2058 = vmatprep.subr.bf16.mxu0 %v2268_v14  ;;  %1968 = vmatprep.mubr.bf16.mxu1 %v261_v30  ;;  %v516_v57 = vrot.slane %v2430_v22, 2  ;;  %v515_v61 = vrot.slane %v2427_v21, 2  ;;  %v247_v63 = vrot.slane %v2500_v59, 1  ;;  %v248_v0 = vrot.slane %v2503_v60, 1  ;;  %v2280_v22 = vld [vmem:[%s2825_s1 + $0x158] sm:$0xff]   ;;  %v2282_v32 = vld [vmem:[%s2825_s1 + $0x160] sm:$0xff]  }
  0x1a   : > { %2064 = vmatprep.mubr.bf16.mxu0 %v831_v37  ;;  %v246_v62 = vsel %vm228_vm0, %v244_v55, %v245_v56  ;;  %v685_v1 = vpack.c.bf16 %v2500_v59, %v2486_v52  ;;  %v250_v7 = vrot.slane %v2517_v4, 1  ;;  %v251_v8 = vrot.slane %v2520_v5, 1 }
  0x1b   : > { %1963 = vmatpush3.bf16.msra.mxu1 %v2267_v10  ;;  %v2514_v3 = vpack.c.bf16 %v246_v62, %v243_v45  ;;  %v249_v6 = vsel %vm228_vm0, %v247_v63, %v248_v0  ;;  %v2529_v10 = vld [vmem:[%s2401_s10 + $0x88] sm:$0x3]  ;;  %v827_v15 = vrot.slane %v2526_v9, 1  ;;  %v2539_v19 = vsel %vm508_vm1, %v512_v54, %v513_v50  ;;  %v2287_v50 = vld [vmem:[%s2825_s1 + $0x38] sm:$0xff]  }
  0x1c   : > { %2059 = vmatpush3.bf16.msra.mxu0 %v2268_v14  ;;  %1964 = vmatprep.subr.bf16.mxu1 %v2269_v23  ;;  %v833_v14 = vpack.c.bf16 %v249_v6, %v246_v62  ;;  %v828_v16 = vrot.slane %v2529_v10, 1  ;;  %v252_v18 = vsel %vm228_vm0, %v250_v7, %v251_v8  ;;  %v2542_v20 = vsel %vm508_vm1, %v515_v61, %v516_v57 }
  0x1d   : > { %2060 = vmatprep.subr.bf16.mxu0 %v2270_v29  ;;  %v686_v27 = vpack.c.bf16 %v2526_v9, %v2517_v4  ;;  %v977_v30 = vpack.c.bf16 %v2542_v20, %v2539_v19  ;;  %v519_v37 = vrot.slane %v2440_v26, 2  ;;  %v522_v38 = vrot.slane %v2455_v34, 2 }
  0x1e   : > { %v2550_v24 = vsel %vm228_vm0, %v827_v15, %v828_v16  ;;  %v518_v39 = vrot.slane %v2437_v25, 2  ;;  %v521_v43 = vrot.slane %v2452_v33, 2  ;;  %v524_v26 = vrot.slane %v2486_v52, 2 }
  0x1f   : > { %1965 = vmatpush3.bf16.msra.mxu1 %v2269_v23  ;;  %v2547_v23 = vpack.c.bf16 %v252_v18, %v249_v6  ;;  %v834_v28 = vpack.c.bf16 %v2550_v24, %v252_v18  ;;  %v973_v34 = vrot.slane %v2526_v9, 2  ;;  %v974_v45 = vrot.slane %v2529_v10, 2 }
  0x20   : > { %2061 = vmatpush3.bf16.msra.mxu0 %v2270_v29  ;;  %1966 = vmatprep.subr.bf16.mxu1 %v2271_v31  ;;  %v192_v29 = vpack.c.bf16 %v2413_v13, %v2407_v11  ;;  %v528_v62 = vrot.slane %v2503_v60, 2  ;;  %v2614_v6 = vsel %vm508_vm1, %v518_v39, %v519_v37  ;;  %v2617_v7 = vsel %vm508_vm1, %v521_v43, %v522_v38  ;;  %v2290_v60 = vld [vmem:[%s2825_s1 + $0x180] sm:$0xff]   ;;  %v2295_v39 = vld [vmem:[%s2825_s1 + $0x98] sm:$0xff]   ;;  %v2317_v13 = vld [vmem:[%s2825_s1 + $0xf0] sm:$0xff]  }
  0x21   : > { %2062 = vmatprep.subr.bf16.mxu0 %v2272_v40  ;;  %v2601_v57 = vsel %vm508_vm1, %v973_v34, %v974_v45  ;;  %v193_v10 = vpack.c.bf16 %v2437_v25, %v2427_v21  ;;  %v978_v15 = vpack.c.bf16 %v2617_v7, %v2614_v6  ;;  %v530_v18 = vrot.slane %v2517_v4, 2  ;;  %v2300_v34 = vld [vmem:[%s2825_s1 + $0x1a8] sm:$0xff]   ;;  %v2301_v45 = vld [vmem:[%s2825_s1 + $0xb0] sm:$0xff]   ;;  %v2324_v25 = vld [vmem:[%s2825_s1 + $0x218] sm:$0xff]  }
  0x22   : > { %v2318_v21 = vld [vmem:[%s2825_s1 + $0x1f0] sm:$0xff]  }
  0x23   : > { %1967 = vmatpush3.bf16.msra.mxu1 %v2271_v31  ;;  %v2281_v31 = vld [vmem:[%s2825_s1 + $0x20] sm:$0xff]  }
  0x24   : > { %2063 = vmatpush3.bf16.msra.mxu0 %v2272_v40  ;;  %1976 = vmatprep.subr.bf16.mxu1 %v2273_v44  ;;  %v2285_v40 = vld [vmem:[%s2825_s1 + $0x30] sm:$0xff]  }
  0x25   : > { %2072 = vmatprep.subr.bf16.mxu0 %v2274_v46 }
  0x26   : > { %1969 = vmatmul.mubr.bf16.vlgmr.msra.gmra.mrb[0].mxu1 %v2476_v47 }
  0x27   : > { %1977 = vmatpush3.bf16.msra.mxu1 %v2273_v44  ;;  %2065 = vmatmul.mubr.bf16.vlgmr.msra.gmra.mrb[0].mxu0 %v832_v48  ;;  %v2286_v44 = vld [vmem:[%s2825_s1 + $0x170] sm:$0xff]  }
  0x28   : > { %2073 = vmatpush3.bf16.msra.mxu0 %v2274_v46  ;;  %1978 = vmatprep.subr.bf16.mxu1 %v2275_v49  ;;  %v525_v46 = vrot.slane %v2489_v53, 2  ;;  %v2587_v48 = vld [vmem:[%s2401_s10 + $0x90] sm:$0xff]  ;;  %v527_v53 = vrot.slane %v2500_v59, 2 }
  0x29   : > { %2074 = vmatprep.subr.bf16.mxu0 %v2276_v51  ;;  %1972 = vmatprep.mubr.bf16.mxu1 %v2514_v3  ;;  %v1403_v54 = vrot.slane %v2587_v48, 2  ;;  %v1119_v56 = vpack.c.bf16 %v2587_v48, %v2526_v9  ;;  %v1260_v61 = vrot.slane %v2587_v48, 1  ;;  %v2315_v48 = vld [vmem:[%s2825_s1 + $0xe8] sm:$0xff]  }
  0x2a   : > { %2068 = vmatprep.mubr.bf16.mxu0 %v833_v14  ;;  %v2632_v16 = vsel %vm508_vm1, %v524_v26, %v525_v46  ;;  %v2298_v26 = vld [vmem:[%s2825_s1 + $0x1a0] sm:$0xff]   ;;  %v2302_v46 = vld [vmem:[%s2825_s1 + $0x1b0] sm:$0xff]  }
  0x2b   : > { %1979 = vmatpush3.bf16.msra.mxu1 %v2275_v49  ;;  %v191_v49 = vld [vmem:[%s2401_s10 + $0x98] sm:$0x3] }
  0x2c   : > { %2075 = vmatpush3.bf16.msra.mxu0 %v2276_v51  ;;  %1980 = vmatprep.subr.bf16.mxu1 %v2277_v58  ;;  %v2288_v51 = vld [vmem:[%s2825_s1 + $0x178] sm:$0xff]   ;;  %v1404_v55 = vrot.slane %v191_v49, 2  ;;  %v1261_v0 = vrot.slane %v191_v49, 1 }
  0x2d   : > { %2076 = vmatprep.subr.bf16.mxu0 %v2278_v2  ;;  %v2303_v49 = vld [vmem:[%s2825_s1 + $0xb8] sm:$0xff]  }
  0x2e   : > { %1973 = vmatmul.mubr.bf16.gmra.mrb[4].mxu1 %v2547_v23  ;;  %v2623_v8 = vsel %vm228_vm0, %v1260_v61, %v1261_v0  ;;  %v2308_v61 = vld [vmem:[%s2825_s1 + $0x1c8] sm:$0xff]   ;;  %v2310_v0 = vld [vmem:[%s2825_s1 + $0x1d0] sm:$0xff]  }
  0x2f   : > { %1981 = vmatpush3.bf16.msra.mxu1 %v2277_v58  ;;  %2069 = vmatmul.mubr.bf16.gmra.mrb[4].mxu0 %v834_v28  ;;  %v2604_v58 = vsel %vm508_vm1, %v1403_v54, %v1404_v55  ;;  %v1264_v14 = vpack.c.bf16 %v2623_v8, %v2550_v24  ;;  %v531_v28 = vrot.slane %v2520_v5, 2  ;;  %v2293_v5 = vld [vmem:[%s2825_s1 + $0x90] sm:$0xff]   ;;  %v2306_v54 = vld [vmem:[%s2825_s1 + $0x1c0] sm:$0xff]   ;;  %v2707_v55 = vpack.c.bf16 %v2614_v6, %v2542_v20  ;;  %v2311_v6 = vld [vmem:[%s2825_s1 + $0xd8] sm:$0xff]  }
  0x30   : > { %2077 = vmatpush3.bf16.msra.mxu0 %v2278_v2  ;;  %1982 = vmatprep.subr.bf16.mxu1 %v2279_v17  ;;  %v1407_v63 = vpack.c.bf16 %v2604_v58, %v2601_v57  ;;  %v2289_v2 = vld [vmem:[%s2825_s1 + $0x80] sm:$0xff]   ;;  %v2309_v20 = vld [vmem:[%s2825_s1 + $0xd0] sm:$0xff]  }
  0x31   : > { %2078 = vmatprep.subr.bf16.mxu0 %v2280_v22  ;;  %1992 = vmatprep.mubr.bf16.mxu1 %v192_v29  ;;  %v2292_v29 = vld [vmem:[%s2825_s1 + $0x188] sm:$0xff]   ;;  %v1840_v58 = vld [vmem:[%s2826_s2] ss:$0 sm:$0xff] }
  0x32   : > { %2088 = vmatprep.mubr.bf16.mxu0 %v977_v30  ;;  %v2647_v30 = vpack.c.bf16 %v2486_v52, %v2452_v33  ;;  %v2325_v33 = vld [vmem:[%s2825_s1 + $0x220] sm:$0xff]   ;;  %v2327_v52 = vld [vmem:[%s2825_s1 + $0x230] sm:$0xff]  }
  0x33   : > { %1983 = vmatpush3.bf16.msra.mxu1 %v2279_v17  ;;  %v2635_v17 = vsel %vm508_vm1, %v527_v53, %v528_v62  ;;  %v2307_v53 = vld [vmem:[%s2825_s1 + $0xc8] sm:$0xff]   ;;  %v2717_v62 = vpack.c.bf16 %v2632_v16, %v2617_v7  ;;  %v2312_v7 = vld [vmem:[%s2825_s1 + $0x1d8] sm:$0xff]  }
  0x34   : > { %2079 = vmatpush3.bf16.msra.mxu0 %v2280_v22  ;;  %1984 = vmatprep.subr.bf16.mxu1 %v2281_v31  ;;  %v2291_v22 = vld [vmem:[%s2825_s1 + $0x88] sm:$0xff]  }
  0x35   : > { %2080 = vmatprep.subr.bf16.mxu0 %v2282_v32 }
  0x37   : > { %1985 = vmatpush3.bf16.msra.mxu1 %v2281_v31  ;;  %v510_v31 = vrot.slane %v2410_v12, 2  ;;  %v2294_v12 = vld [vmem:[%s2825_s1 + $0x190] sm:$0xff]  }
  0x38   : > { %2081 = vmatpush3.bf16.msra.mxu0 %v2282_v32  ;;  %1986 = vmatprep.subr.bf16.mxu1 %v2283_v35  ;;  %v979_v32 = vpack.c.bf16 %v2635_v17, %v2632_v16  ;;  %v2322_v16 = vld [vmem:[%s2825_s1 + $0x208] sm:$0xff]  }
  0x39   : > { %2082 = vmatprep.subr.bf16.mxu0 %v2284_v36 }
  0x3b   : > { %1987 = vmatpush3.bf16.msra.mxu1 %v2283_v35  ;;  %v509_v35 = vrot.slane %v2407_v11, 2  ;;  %v195_v11 = vpack.c.bf16 %v2517_v4, %v2500_v59  ;;  %v2328_v59 = vld [vmem:[%s2825_s1 + $0x238] sm:$0xff]  }
  0x3c   : > { %2083 = vmatpush3.bf16.msra.mxu0 %v2284_v36  ;;  %1988 = vmatprep.subr.bf16.mxu1 %v2285_v40  ;;  %v2657_v36 = vsel %vm508_vm1, %v530_v18, %v531_v28 }
  0x3d   : > { %2084 = vmatprep.subr.bf16.mxu0 %v2286_v44  ;;  %v511_v37 = vsel %vm508_vm1, %v509_v35, %v510_v31  ;;  %v980_v38 = vpack.c.bf16 %v2601_v57, %v2657_v36 }
  0x3e   : > { %v541_v43 = vpack.c.bf16 %v2539_v19, %v511_v37  ;;  %v2299_v19 = vld [vmem:[%s2825_s1 + $0xa8] sm:$0xff]  }
  0x3f   : > { %1989 = vmatpush3.bf16.msra.mxu1 %v2285_v40  ;;  %v2296_v40 = vld [vmem:[%s2825_s1 + $0x198] sm:$0xff]  }
  0x40   : > { %2085 = vmatpush3.bf16.msra.mxu0 %v2286_v44  ;;  %1990 = vmatprep.subr.bf16.mxu1 %v2287_v50  ;;  %v2297_v44 = vld [vmem:[%s2825_s1 + $0xa0] sm:$0xff]  }
  0x41   : > { %2086 = vmatprep.subr.bf16.mxu0 %v2288_v51 }
  0x43   : > { %1991 = vmatpush3.bf16.msra.mxu1 %v2287_v50  ;;  %v2304_v50 = vld [vmem:[%s2825_s1 + $0x1b8] sm:$0xff]  }
  0x44   : > { %2087 = vmatpush3.bf16.msra.mxu0 %v2288_v51  ;;  %2000 = vmatprep.subr.bf16.mxu1 %v2289_v2  ;;  %v2305_v51 = vld [vmem:[%s2825_s1 + $0xc0] sm:$0xff]  }
  0x45   : > { %2096 = vmatprep.subr.bf16.mxu0 %v2290_v60 }
  0x46   : > { %1993 = vmatmul.mubr.bf16.vlgmr.msra.gmra.mrb[0].mxu1 %v193_v10 }
  0x47   : > { %2001 = vmatpush3.bf16.msra.mxu1 %v2289_v2  ;;  %2089 = vmatmul.mubr.bf16.vlgmr.msra.gmra.mrb[0].mxu0 %v978_v15  ;;  %v2730_v2 = vpack.c.bf16 %v2657_v36, %v2635_v17  ;;  %v2321_v15 = vld [vmem:[%s2825_s1 + $0x200] sm:$0xff]   ;;  %v2323_v17 = vld [vmem:[%s2825_s1 + $0x210] sm:$0xff]  }
  0x48   : > { %2097 = vmatpush3.bf16.msra.mxu0 %v2290_v60  ;;  %2002 = vmatprep.subr.bf16.mxu1 %v2291_v22  ;;  %v2313_v60 = vld [vmem:[%s2825_s1 + $0xe0] sm:$0xff]  }
  0x49   : > { %2098 = vmatprep.subr.bf16.mxu0 %v2292_v29  ;;  %1996 = vmatprep.mubr.bf16.mxu1 %v2647_v30 }
  0x4a   : > { %2092 = vmatprep.mubr.bf16.mxu0 %v979_v32 }
  0x4b   : > { %2003 = vmatpush3.bf16.msra.mxu1 %v2291_v22 }
  0x4c   : > { %2099 = vmatpush3.bf16.msra.mxu0 %v2292_v29  ;;  %2004 = vmatprep.subr.bf16.mxu1 %v2293_v5 }
  0x4d   : > { %2100 = vmatprep.subr.bf16.mxu0 %v2294_v12 }
  0x4e   : > { %1997 = vmatmul.mubr.bf16.gmra.mrb[4].mxu1 %v195_v11 }
  0x4f   : > { %2005 = vmatpush3.bf16.msra.mxu1 %v2293_v5  ;;  %2093 = vmatmul.mubr.bf16.gmra.mrb[4].mxu0 %v980_v38 }
  0x50   : > { %2101 = vmatpush3.bf16.msra.mxu0 %v2294_v12  ;;  %2006 = vmatprep.subr.bf16.mxu1 %v2295_v39 }
  0x51   : > { %2102 = vmatprep.subr.bf16.mxu0 %v2296_v40  ;;  %2016 = vmatprep.mubr.bf16.mxu1 %v541_v43 }
  0x52   : > { %2112 = vmatprep.mubr.bf16.mxu0 %v193_v10  ;;  %v2314_v10 = vld [vmem:[%s2825_s1 + $0x1e0] sm:$0xff]  }
  0x53   : > { %2007 = vmatpush3.bf16.msra.mxu1 %v2295_v39 }
  0x54   : > { %2103 = vmatpush3.bf16.msra.mxu0 %v2296_v40  ;;  %2008 = vmatprep.subr.bf16.mxu1 %v2297_v44 }
  0x55   : > { %2104 = vmatprep.subr.bf16.mxu0 %v2298_v26 }
  0x57   : > { %2009 = vmatpush3.bf16.msra.mxu1 %v2297_v44 }
  0x58   : > { %2105 = vmatpush3.bf16.msra.mxu0 %v2298_v26  ;;  %2010 = vmatprep.subr.bf16.mxu1 %v2299_v19 }
  0x59   : > { %2106 = vmatprep.subr.bf16.mxu0 %v2300_v34 }
  0x5b   : > { %2011 = vmatpush3.bf16.msra.mxu1 %v2299_v19 }
  0x5c   : > { %2107 = vmatpush3.bf16.msra.mxu0 %v2300_v34  ;;  %2012 = vmatprep.subr.bf16.mxu1 %v2301_v45 }
  0x5d   : > { %2108 = vmatprep.subr.bf16.mxu0 %v2302_v46 }
  0x5f   : > { %2013 = vmatpush3.bf16.msra.mxu1 %v2301_v45 }
  0x60   : > { %2109 = vmatpush3.bf16.msra.mxu0 %v2302_v46  ;;  %2014 = vmatprep.subr.bf16.mxu1 %v2303_v49 }
  0x61   : > { %2110 = vmatprep.subr.bf16.mxu0 %v2304_v50 }
  0x63   : > { %2015 = vmatpush3.bf16.msra.mxu1 %v2303_v49 }
  0x64   : > { %2111 = vmatpush3.bf16.msra.mxu0 %v2304_v50  ;;  %2024 = vmatprep.subr.bf16.mxu1 %v2305_v51 }
  0x65   : > { %2120 = vmatprep.subr.bf16.mxu0 %v2306_v54 }
  0x66   : > { %2017 = vmatmul.mubr.bf16.vlgmr.msra.gmra.mrb[0].mxu1 %v2707_v55 }
  0x67   : > { %2025 = vmatpush3.bf16.msra.mxu1 %v2305_v51  ;;  %2113 = vmatmul.mubr.bf16.vlgmr.msra.gmra.mrb[0].mxu0 %v2647_v30 }
  0x68   : > { %2121 = vmatpush3.bf16.msra.mxu0 %v2306_v54  ;;  %2026 = vmatprep.subr.bf16.mxu1 %v2307_v53 }
  0x69   : > { %2122 = vmatprep.subr.bf16.mxu0 %v2308_v61  ;;  %2020 = vmatprep.mubr.bf16.mxu1 %v2717_v62 }
  0x6a   : > { %2116 = vmatprep.mubr.bf16.mxu0 %v195_v11 }
  0x6b   : > { %2027 = vmatpush3.bf16.msra.mxu1 %v2307_v53 }
  0x6c   : > { %2123 = vmatpush3.bf16.msra.mxu0 %v2308_v61  ;;  %2028 = vmatprep.subr.bf16.mxu1 %v2309_v20 }
  0x6d   : > { %2124 = vmatprep.subr.bf16.mxu0 %v2310_v0 }
  0x6e   : > { %2021 = vmatmul.mubr.bf16.gmra.mrb[4].mxu1 %v2730_v2 }
  0x6f   : > { %2029 = vmatpush3.bf16.msra.mxu1 %v2309_v20  ;;  %2117 = vmatmul.mubr.bf16.gmra.mrb[4].mxu0 %v1119_v56  ;;  %v2316_v56 = vld [vmem:[%s2825_s1 + $0x1e8] sm:$0xff]  }
  0x70   : > { %2125 = vmatpush3.bf16.msra.mxu0 %v2310_v0  ;;  %2030 = vmatprep.subr.bf16.mxu1 %v2311_v6 }
  0x71   : > { %2126 = vmatprep.subr.bf16.mxu0 %v2312_v7  ;;  %2040 = vmatprep.mubr.bf16.mxu1 %v683_v41  ;;  %v2319_v41 = vld [vmem:[%s2825_s1 + $0xf8] sm:$0xff]  }
  0x72   : > { %2136 = vmatprep.mubr.bf16.mxu0 %v2476_v47  ;;  %v2320_v47 = vld [vmem:[%s2825_s1 + $0x1f8] sm:$0xff]  }
  0x73   : > { %2031 = vmatpush3.bf16.msra.mxu1 %v2311_v6 }
  0x74   : > { %2127 = vmatpush3.bf16.msra.mxu0 %v2312_v7  ;;  %2032 = vmatprep.subr.bf16.mxu1 %v2313_v60 }
  0x75   : > { %2128 = vmatprep.subr.bf16.mxu0 %v2314_v10 }
  0x77   : > { %2033 = vmatpush3.bf16.msra.mxu1 %v2313_v60 }
  0x78   : > { %2129 = vmatpush3.bf16.msra.mxu0 %v2314_v10  ;;  %2034 = vmatprep.subr.bf16.mxu1 %v2315_v48 }
  0x79   : > { %2130 = vmatprep.subr.bf16.mxu0 %v2316_v56 }
  0x7b   : > { %2035 = vmatpush3.bf16.msra.mxu1 %v2315_v48 }
  0x7c   : > { %2131 = vmatpush3.bf16.msra.mxu0 %v2316_v56  ;;  %2036 = vmatprep.subr.bf16.mxu1 %v2317_v13 }
  0x7d   : > { %2132 = vmatprep.subr.bf16.mxu0 %v2318_v21 }
  0x7f   : > { %2037 = vmatpush3.bf16.msra.mxu1 %v2317_v13 }
  0x80   : > { %2133 = vmatpush3.bf16.msra.mxu0 %v2318_v21  ;;  %2038 = vmatprep.subr.bf16.mxu1 %v2319_v41 }
  0x81   : > { %2134 = vmatprep.subr.bf16.mxu0 %v2320_v47 }
  0x83   : > { %2039 = vmatpush3.bf16.msra.mxu1 %v2319_v41 }
  0x84   : > { %2135 = vmatpush3.bf16.msra.mxu0 %v2320_v47  ;;  %2168 = vmatprep.subr.bf16.mxu1 %v2321_v15 }
  0x85   : > { %2144 = vmatprep.subr.bf16.mxu0 %v2321_v15 }
  0x86   : > { %2041 = vmatmul.mubr.bf16.vlgmr.msra.gmra.mrb[0].mxu1 %v684_v42  ;;  %v2326_v42 = vld [vmem:[%s2825_s1 + $0x228] sm:$0xff]  }
  0x87   : > { %2137 = vmatmul.mubr.bf16.vlgmr.msra.gmra.mrb[0].mxu0 %v2514_v3  ;;  %2176 = vmatpush3.bf16.msra.mxu1 %v2321_v15 }
  0x88   : > { %2145 = vmatpush3.bf16.msra.mxu0 %v2321_v15  ;;  %2169 = vmatprep.subr.bf16.mxu1 %v2322_v16 }
  0x89   : > { %2146 = vmatprep.subr.bf16.mxu0 %v2322_v16  ;;  %2044 = vmatprep.mubr.bf16.mxu1 %v685_v1 }
  0x8a   : > { %2140 = vmatprep.mubr.bf16.mxu0 %v2547_v23 }
  0x8b   : > { %2177 = vmatpush3.bf16.msra.mxu1 %v2322_v16 }
  0x8c   : > { %2147 = vmatpush3.bf16.msra.mxu0 %v2322_v16  ;;  %2170 = vmatprep.subr.bf16.mxu1 %v2323_v17 }
  0x8d   : > { %2148 = vmatprep.subr.bf16.mxu0 %v2323_v17 }
  0x8e   : > { %2045 = vmatmul.mubr.bf16.gmra.mrb[4].mxu1 %v686_v27 }
  0x8f   : > { %2141 = vmatmul.mubr.bf16.gmra.mrb[4].mxu0 %v1264_v14  ;;  %2178 = vmatpush3.bf16.msra.mxu1 %v2323_v17 }
  0x90   : > { %2149 = vmatpush3.bf16.msra.mxu0 %v2323_v17  ;;  %2171 = vmatprep.subr.bf16.mxu1 %v2324_v25 }
  0x91   : > { %2150 = vmatprep.subr.bf16.mxu0 %v2324_v25  ;;  %2160 = vmatprep.mubr.bf16.mxu0 %v2707_v55 }
  0x92   : > { %2164 = vmatprep.mubr.bf16.mxu1 %v2730_v2 }
  0x93   : > { %2179 = vmatpush3.bf16.msra.mxu1 %v2324_v25 }
  0x94   : > { %2151 = vmatpush3.bf16.msra.mxu0 %v2324_v25  ;;  %2172 = vmatprep.subr.bf16.mxu1 %v2325_v33 }
  0x95   : > { %2152 = vmatprep.subr.bf16.mxu0 %v2325_v33 }
  0x97   : > { %2180 = vmatpush3.bf16.msra.mxu1 %v2325_v33 }
  0x98   : > { %2153 = vmatpush3.bf16.msra.mxu0 %v2325_v33  ;;  %2173 = vmatprep.subr.bf16.mxu1 %v2326_v42 }
  0x99   : > { %2154 = vmatprep.subr.bf16.mxu0 %v2326_v42 }
  0x9b   : > { %2181 = vmatpush3.bf16.msra.mxu1 %v2326_v42 }
  0x9c   : > { %2155 = vmatpush3.bf16.msra.mxu0 %v2326_v42  ;;  %2174 = vmatprep.subr.bf16.mxu1 %v2327_v52 }
  0x9d   : > { %2156 = vmatprep.subr.bf16.mxu0 %v2327_v52 }
  0x9f   : > { %2182 = vmatpush3.bf16.msra.mxu1 %v2327_v52 }
  0xa0   : > { %2157 = vmatpush3.bf16.msra.mxu0 %v2327_v52  ;;  %2175 = vmatprep.subr.bf16.mxu1 %v2328_v59 }
  0xa1   : > { %2158 = vmatprep.subr.bf16.mxu0 %v2328_v59 }
  0xa3   : > { %2183 = vmatpush3.bf16.msra.mxu1 %v2328_v59 }
  0xa4   : > { %2159 = vmatpush3.bf16.msra.mxu0 %v2328_v59 }
  0xa6   : > { %2165 = vmatmul.mubr.bf16.vlgmr.msra.gmra.mrb[8].mxu1 %v1407_v63 }
  0xa7   : > { %2161 = vmatmul.mubr.bf16.vlgmr.msra.gmra.mrb[0].mxu0 %v2717_v62 }
 0x159   : > { %v2042_v1 = vpop.f32.mrb[0].mxu1 }
 0x15a   : > { %v786_v3 = vpop.f32.mrb[1].mxu1 }
 0x15b   : > { %v2043_v4 = vpop.f32.mrb[2].mxu1 }
 0x15c   : > { %v789_v9 = vpop.f32.mrb[3].mxu1 }
 0x161   : > { %v2046_v23 = vpop.f32.mrb[4].mxu1 }
 0x162   : > { %v2142_v24 = vpop.f32.mrb[4].mxu0  ;;  %v802_v27 = vpop.f32.mrb[5].mxu1 }
 0x163   : > { %v2188_v8 = vadd.f32 %v2142_v24, %v2046_v23  ;;  %v1380_v14 = vpop.f32.mrb[5].mxu0  ;;  %v2047_v18 = vpop.f32.mrb[6].mxu1 }
 0x164   : > { %v2190_v22 = vadd.f32 %v1380_v14, %v802_v27  ;;  %v2143_v28 = vpop.f32.mrb[6].mxu0  ;;  %v805_v29 = vpop.f32.mrb[7].mxu1 }
 0x165   : > { %v2192_v30 = vadd.f32 %v2143_v28, %v2047_v18  ;;  %v1383_v31 = vpop.f32.mrb[7].mxu0 }
 0x166   : > { %v2194_v57 = vadd.f32 %v1383_v31, %v805_v29 }
 0x179   : > { %v2166_v63 = vpop.f32.mrb[8].mxu1 }
 0x17a   : > { %v2162_v32 = vpop.f32.mrb[0].mxu0  ;;  %v2189_v35 = vadd.f32 %v2188_v8, %v2166_v63  ;;  %v1523_v5 = vpop.f32.mrb[9].mxu1 }
 0x17b   : > { %v2184_v36 = vadd.f32 %v2162_v32, %v2042_v1  ;;  %v1507_v12 = vpop.f32.mrb[1].mxu0  ;;  %v2191_v11 = vadd.f32 %v2190_v22, %v1523_v5  ;;  %v2167_v37 = vpop.f32.mrb[10].mxu1 }
 0x17c   : > { %v1559_v38 = vadd.f32 %v2189_v35, %v1840_v58  ;;  %v2185_v39 = vadd.f32 %v1507_v12, %v786_v3  ;;  %v2163_v40 = vpop.f32.mrb[2].mxu0  ;;  %v2193_v43 = vadd.f32 %v2192_v30, %v2167_v37  ;;  %v1526_v44 = vpop.f32.mrb[11].mxu1 }
 0x17d   : > { %v1555_v26 = vadd.f32 %v2184_v36, %v1840_v58  ;;  %v1557_v19 = vadd.f32 %v2191_v11, %v1840_v58  ;;  %v2186_v34 = vadd.f32 %v2163_v40, %v2043_v4  ;;  %v1510_v45 = vpop.f32.mrb[3].mxu0  ;;  %v2195_v46 = vadd.f32 %v2194_v57, %v1526_v44 }
 0x17e   : > { %v1567_v49 = vmax.f32 %v1559_v38, 0.0  ;;  %v1553_v50 = vadd.f32 %v2185_v39, %v1840_v58  ;;  %v1560_v51 = vadd.f32 %v2193_v43, %v1840_v58  ;;  %v2187_v54 = vadd.f32 %v1510_v45, %v789_v9 }
 0x17f   : > { %v1563_v55 = vmax.f32 %v1555_v26, 0.0  ;;  %v1565_v53 = vmax.f32 %v1557_v19, 0.0  ;;  %v1556_v61 = vadd.f32 %v2186_v34, %v1840_v58  ;;  %v1558_v62 = vadd.f32 %v2195_v46, %v1840_v58 }
 0x180   : > { %1575 = vst [vmem:[%s170_s18 + $0x30] sm:$0xff] %v1567_v49  ;;  %v1561_v20 = vmax.f32 %v1553_v50, 0.0  ;;  %v1568_v0 = vmax.f32 %v1560_v51, 0.0  ;;  %v1554_v2 = vadd.f32 %v2187_v54, %v1840_v58 }
 0x181   : > { %1571 = vst [vmem:[%s170_s18 + $0x10] sm:$0xff] %v1563_v55  ;;  %1573 = vst [vmem:[%s170_s18 + $0x20] sm:$0xff] %v1565_v53  ;;  %v1564_v6 = vmax.f32 %v1556_v61, 0.0  ;;  %v1566_v7 = vmax.f32 %v1558_v62, 0.0 }
 0x182   : > { %1569 = vst [vmem:[%s170_s18] sm:$0xff] %v1561_v20  ;;  %1576 = vst [vmem:[%s170_s18 + $0x38] sm:$0xff] %v1568_v0  ;;  %v1562_v60 = vmax.f32 %v1554_v2, 0.0 }
 0x183   : > { %1572 = vst [vmem:[%s170_s18 + $0x18] sm:$0xff] %v1564_v6  ;;  %1574 = vst [vmem:[%s170_s18 + $0x28] sm:$0xff] %v1566_v7 }
 0x184   : > { %1570 = vst [vmem:[%s170_s18 + $0x8] sm:$0xff] %v1562_v60 }
 0x185 PF: > { %s13_s12 = sadd.s32 1, %s2335_s12  }
 0x186   : > { %p10_p4 = scmp.ge.s32.totalorder %s13_s12, 6  }
 0x188   :  { %12 = sbr.rel (!%p10_p4) target bundleno = 1 (0x1), region = 70 }

// kernel: contextual_loss_forward.7
= control target key start
LH: loop header
LB: loop body
LE: loop exit
PB: predicated region body
PF: predicated region fallthrough
CT: control target
= control target key end

     0   :  { %s936_s12 = smov 0   ;;  %s938_s13 = smov 0   ;;  %s1116_s0 = inlined_call_operand.vmem [shape: f32[1,128], index: 0, kind: input, shape index: {}]   ;;  %s1117_s1 = inlined_call_operand.vmem [shape: f32[2,64,128], index: 1, kind: input, shape index: {}]   ;;  %s1118_s2 = inlined_call_operand.vmem [shape: f32[2,64,128], index: 2, kind: input, shape index: {}]   ;;  %s1119_s3 = inlined_call_operand.vmem [shape: f32[2,1,128], index: 3, kind: output, shape index: {}]  }
   0x1   :  { %s940_s14 = smov 0  }
   0x2 LB: > { %s25_s15 = sadd.s32 1, %s909_s13  ;;  %p706_p0 = scmp.ge.s32.totalorder %s913_s14, 1  ;;  %s913_s14 = sphi %s940_s14, %s13_s14   ;;  %s909_s13 = sphi %s938_s13, %s1121_s13   ;;  %s905_s12 = sphi %s936_s12, %s1120_s12  }
   0x3   : > { %p27_p1 = scmp.ge.s32.totalorder %s25_s15, 2  ;;  %p166_p2 = scmp.lt.s32.totalorder %s913_s14, 3 }
   0x5   : > { %s1123_s15 = smov (%p27_p1, %s25_s15), 0  ;;  %p167_p3 = pnand %p706_p0, %p166_p2 }
   0x6   : > { %p198_p4 = scmp.lt.s32.totalorder (!%p167_p3), %s905_s12, 1  ;;  %v711_v0 = vld [vmem:[%s1116_s0] ss:$0 sm:$0xff] (!%p167_p3)  ;;  %vm463_vm0 = vcmask (!%p167_p3), 523264   ;;  %vm609_vm1 = vcmask (!%p167_p3), 516096  }
   0x7   : > { %170 = sbr.rel (%p167_p3) target bundleno = 967 (0x3c7), region = 32 }
   0xe   : > { %s1125_s12 = smov (!%p198_p4, %s905_s12), 1 }
   0xf   : > { %s714_s16 = sshll.u32 %s1125_s12, 6  ;;  %s214_s27 = scalar_lea.vmem %s1119_s3, %s1125_s12 }
  0x10   : > { %s211_s21 = scalar_lea.vmem %s1118_s2, %s714_s16  ;;  %s986_s24 = scalar_lea.vmem %s1117_s1, %s714_s16 }
  0x11   : > { %v238_v1 = vld [vmem:[%s211_s21] sm:$0xff]  ;;  %v240_v2 = vld [vmem:[%s211_s21 + $0x10] sm:$0xff]  ;;  %v239_v3 = vld [vmem:[%s211_s21 + $0x8] sm:$0xff] }
  0x12   : > { %v963_v4 = vsub.f32 %v238_v1, %v711_v0  ;;  %v965_v5 = vsub.f32 %v240_v2, %v711_v0  ;;  %v967_v6 = vsub.f32 %v239_v3, %v711_v0  ;;  %v241_v7 = vld [vmem:[%s211_s21 + $0x18] sm:$0xff]  ;;  %v243_v8 = vld [vmem:[%s211_s21 + $0x28] sm:$0xff]  ;;  %v242_v10 = vld [vmem:[%s211_s21 + $0x20] sm:$0xff] }
  0x13   : > { %v969_v9 = vsub.f32 %v241_v7, %v711_v0  ;;  %v975_v13 = vsub.f32 %v243_v8, %v711_v0  ;;  %v981_v16 = vsub.f32 %v242_v10, %v711_v0  ;;  %v245_v17 = vld [vmem:[%s211_s21 + $0x38] sm:$0xff]  ;;  %v244_v18 = vld [vmem:[%s211_s21 + $0x30] sm:$0xff]  ;;  %v216_v23 = vld [vmem:[%s986_s24] sm:$0xff] }
  0x14   : > { %v302_v11 = vmul.f32 %v963_v4, %v963_v4  ;;  %v304_v12 = vmul.f32 %v965_v5, %v965_v5  ;;  %v303_v14 = vmul.f32 %v967_v6, %v967_v6  ;;  %v988_v19 = vsub.f32 %v245_v17, %v711_v0  ;;  %v220_v24 = vld [vmem:[%s986_s24 + $0x20] sm:$0xff]  ;;  %v217_v29 = vld [vmem:[%s986_s24 + $0x8] sm:$0xff]  ;;  %v218_v35 = vld [vmem:[%s986_s24 + $0x10] sm:$0xff] }
  0x15   : > { %v305_v15 = vmul.f32 %v969_v9, %v969_v9  ;;  %v307_v20 = vmul.f32 %v975_v13, %v975_v13  ;;  %v306_v21 = vmul.f32 %v981_v16, %v981_v16  ;;  %v994_v22 = vsub.f32 %v244_v18, %v711_v0  ;;  %v221_v30 = vld [vmem:[%s986_s24 + $0x28] sm:$0xff]  ;;  %v222_v36 = vld [vmem:[%s986_s24 + $0x30] sm:$0xff]  ;;  %v219_v41 = vld [vmem:[%s986_s24 + $0x18] sm:$0xff] }
  0x16   : > { %310 = vadd.xlane.f32.xlu0 %v302_v11  ;;  %314 = vadd.xlane.f32.xlu1 %v304_v12  ;;  %v309_v25 = vmul.f32 %v988_v19, %v988_v19  ;;  %v1002_v27 = vsub.f32 %v216_v23, %v711_v0  ;;  %v1004_v28 = vsub.f32 %v220_v24, %v711_v0  ;;  %v223_v42 = vld [vmem:[%s986_s24 + $0x38] sm:$0xff] }
  0x17   : > { %v308_v26 = vmul.f32 %v994_v22, %v994_v22  ;;  %v1008_v31 = vsub.f32 %v217_v29, %v711_v0  ;;  %v1014_v34 = vsub.f32 %v221_v30, %v711_v0  ;;  %v1018_v37 = vsub.f32 %v218_v35, %v711_v0 }
  0x18   : > { %v254_v32 = vmul.f32 %v1002_v27, %v1002_v27  ;;  %v258_v33 = vmul.f32 %v1004_v28, %v1004_v28  ;;  %v1024_v40 = vsub.f32 %v222_v36, %v711_v0  ;;  %v1028_v43 = vsub.f32 %v219_v41, %v711_v0 }
  0x19   : > { %v255_v38 = vmul.f32 %v1008_v31, %v1008_v31  ;;  %v259_v39 = vmul.f32 %v1014_v34, %v1014_v34  ;;  %v256_v44 = vmul.f32 %v1018_v37, %v1018_v37  ;;  %v1034_v46 = vsub.f32 %v223_v42, %v711_v0 }
  0x1a   : > { %312 = vadd.xlane.f32.xlu0 %v303_v14  ;;  %316 = vadd.xlane.f32.xlu1 %v305_v15  ;;  %v260_v45 = vmul.f32 %v1024_v40, %v1024_v40  ;;  %v257_v47 = vmul.f32 %v1028_v43, %v1028_v43 }
  0x1b   : > { %v261_v48 = vmul.f32 %v1034_v46, %v1034_v46 }
  0x1e   : > { %320 = vadd.xlane.f32.xlu1 %v307_v20  ;;  %318 = vadd.xlane.f32.xlu0 %v306_v21 }
  0x22   : > { %324 = vadd.xlane.f32.xlu1 %v309_v25  ;;  %322 = vadd.xlane.f32.xlu0 %v308_v26 }
  0x26   : > { %262 = vadd.xlane.f32.xlu0 %v254_v32  ;;  %270 = vadd.xlane.f32.xlu1 %v258_v33 }
  0x2a   : > { %264 = vadd.xlane.f32.xlu0 %v255_v38  ;;  %272 = vadd.xlane.f32.xlu1 %v259_v39 }
  0x2e   : > { %266 = vadd.xlane.f32.xlu0 %v256_v44  ;;  %274 = vadd.xlane.f32.xlu1 %v260_v45 }
  0x32   : > { %268 = vadd.xlane.f32.xlu0 %v257_v47  ;;  %276 = vadd.xlane.f32.xlu1 %v261_v48 }
  0xa3   : > { %v311_v49 = vpop.xlane.xlu0 %310  ;;  %v315_v50 = vpop.xlane.xlu1 %314 }
  0xa4   : > { %v326_v51 = vmax.f32 %v311_v49, 1e-24  ;;  %v328_v52 = vmax.f32 %v315_v50, 1e-24 }
  0xa6   : > { %809 = vrsqrt.f32 %v328_v52 }
  0xa7   : > { %v313_v53 = vpop.xlane.xlu0 %312  ;;  %v317_v54 = vpop.xlane.xlu1 %316  ;;  %811 = vrsqrt.f32 %v326_v51 }
  0xa8   : > { %v327_v55 = vmax.f32 %v313_v53, 1e-24  ;;  %v329_v56 = vmax.f32 %v317_v54, 1e-24 }
  0xaa   : > { %813 = vrsqrt.f32 %v327_v55 }
  0xab   : > { %815 = vrsqrt.f32 %v329_v56  ;;  %v321_v57 = vpop.xlane.xlu1 %320  ;;  %v319_v58 = vpop.xlane.xlu0 %318 }
  0xac   : > { %v331_v59 = vmax.f32 %v321_v57, 1e-24  ;;  %v330_v60 = vmax.f32 %v319_v58, 1e-24 }
  0xae   : > { %817 = vrsqrt.f32 %v331_v59 }
  0xaf   : > { %819 = vrsqrt.f32 %v330_v60  ;;  %v325_v61 = vpop.xlane.xlu1 %324  ;;  %v323_v62 = vpop.xlane.xlu0 %322 }
  0xb0   : > { %v333_v63 = vmax.f32 %v325_v61, 1e-24  ;;  %v810_v0 = vpop.eup %809  ;;  %v332_v1 = vmax.f32 %v323_v62, 1e-24 }
  0xb1   : > { %v812_v2 = vpop.eup %811  ;;  %v344_v10 = vmul.f32 %v810_v0, %v965_v5 }
  0xb2   : > { %821 = vrsqrt.f32 %v333_v63  ;;  %v342_v15 = vmul.f32 %v812_v2, %v963_v4 }
  0xb3   : > { %v263_v3 = vpop.xlane.xlu0 %262  ;;  %v271_v7 = vpop.xlane.xlu1 %270  ;;  %823 = vrsqrt.f32 %v332_v1 }
  0xb4   : > { %v814_v8 = vpop.eup %813  ;;  %v278_v11 = vmax.f32 %v263_v3, 1e-24  ;;  %v282_v12 = vmax.f32 %v271_v7, 1e-24 }
  0xb5   : > { %v816_v14 = vpop.eup %815  ;;  %v343_v17 = vmul.f32 %v814_v8, %v967_v6 }
  0xb6   : > { %v345_v18 = vmul.f32 %v816_v14, %v969_v9  ;;  %825 = vrsqrt.f32 %v278_v11 }
  0xb7   : > { %v760_v20 = vpack.c.bf16 %v343_v17, %v342_v15  ;;  %827 = vrsqrt.f32 %v282_v12  ;;  %v265_v24 = vpop.xlane.xlu0 %264  ;;  %v273_v5 = vpop.xlane.xlu1 %272 }
  0xb8   : > { %v818_v21 = vpop.eup %817  ;;  %v764_v23 = vpack.c.bf16 %v345_v18, %v344_v10  ;;  %v279_v38 = vmax.f32 %v265_v24, 1e-24  ;;  %v283_v41 = vmax.f32 %v273_v5, 1e-24 }
  0xb9   : > { %v820_v25 = vpop.eup %819  ;;  %761 = vmatprep.subr.bf16.mxu0 %v760_v20  ;;  %776 = vmatprep.subr.bf16.mxu1 %v760_v20  ;;  %v347_v6 = vmul.f32 %v818_v21, %v975_v13 }
  0xba   : > { %763 = vmatpush3.bf16.xpose.msra.mxu0 %v760_v20  ;;  %780 = vmatpush3.bf16.xpose.msra.mxu1 %v760_v20  ;;  %v346_v4 = vmul.f32 %v820_v25, %v981_v16  ;;  %829 = vrsqrt.f32 %v279_v38 }
  0xbb   : > { %765 = vmatprep.subr.bf16.mxu0 %v764_v23  ;;  %777 = vmatprep.subr.bf16.mxu1 %v764_v23  ;;  %v267_v9 = vpop.xlane.xlu0 %266  ;;  %v275_v32 = vpop.xlane.xlu1 %274  ;;  %831 = vrsqrt.f32 %v283_v41 }
  0xbc   : > { %v822_v26 = vpop.eup %821  ;;  %v768_v30 = vpack.c.bf16 %v347_v6, %v346_v4  ;;  %v280_v42 = vmax.f32 %v267_v9, 1e-24  ;;  %v284_v45 = vmax.f32 %v275_v32, 1e-24 }
  0xbd   : > { %v824_v29 = vpop.eup %823  ;;  %v349_v13 = vmul.f32 %v822_v26, %v988_v19 }
  0xbe   : > { %v348_v16 = vmul.f32 %v824_v29, %v994_v22  ;;  %833 = vrsqrt.f32 %v280_v42 }
  0xbf   : > { %v269_v44 = vpop.xlane.xlu0 %268  ;;  %v277_v47 = vpop.xlane.xlu1 %276  ;;  %835 = vrsqrt.f32 %v284_v45 }
  0xc0   : > { %v826_v33 = vpop.eup %825  ;;  %v772_v48 = vpack.c.bf16 %v349_v13, %v348_v16  ;;  %v285_v49 = vmax.f32 %v277_v47, 1e-24 }
  0xc1   : > { %v828_v35 = vpop.eup %827  ;;  %v294_v36 = vmul.f32 %v826_v33, %v1002_v27  ;;  %v281_v27 = vmax.f32 %v269_v44, 1e-24 }
  0xc2   : > { %767 = vmatpush3.bf16.xpose.msra.mxu0 %v764_v23  ;;  %781 = vmatpush3.bf16.xpose.msra.mxu1 %v764_v23  ;;  %v298_v39 = vmul.f32 %v828_v35, %v1004_v28 }
  0xc3   : > { %769 = vmatprep.subr.bf16.mxu0 %v768_v30  ;;  %778 = vmatprep.subr.bf16.mxu1 %v768_v30  ;;  %837 = vrsqrt.f32 %v281_v27 }
  0xc4   : > { %748 = vmatprep.mubr.f32.mxu0 %v294_v36  ;;  %754 = vmatprep.mubr.f32.mxu1 %v298_v39  ;;  %839 = vrsqrt.f32 %v285_v49  ;;  %v830_v19 = vpop.eup %829 }
  0xc5   : > { %v832_v22 = vpop.eup %831  ;;  %v295_v52 = vmul.f32 %v830_v19, %v1008_v31 }
  0xc6   : > { %v299_v53 = vmul.f32 %v832_v22, %v1014_v34 }
  0xc8   : > { %v834_v28 = vpop.eup %833 }
  0xc9   : > { %v836_v50 = vpop.eup %835  ;;  %v296_v55 = vmul.f32 %v834_v28, %v1018_v37 }
  0xca   : > { %771 = vmatpush3.bf16.xpose.msra.mxu0 %v768_v30  ;;  %782 = vmatpush3.bf16.xpose.msra.mxu1 %v768_v30  ;;  %v300_v56 = vmul.f32 %v836_v50, %v1024_v40 }
  0xcb   : > { %773 = vmatprep.subr.bf16.mxu0 %v772_v48  ;;  %779 = vmatprep.subr.bf16.mxu1 %v772_v48 }
  0xcd   : > { %v838_v51 = vpop.eup %837 }
  0xce   : > { %v840_v54 = vpop.eup %839  ;;  %v297_v57 = vmul.f32 %v838_v51, %v1028_v43 }
  0xcf   : > { %v301_v58 = vmul.f32 %v840_v54, %v1034_v46 }
  0xd2   : > { %775 = vmatpush3.bf16.xpose.msra.mxu0 %v772_v48  ;;  %783 = vmatpush3.bf16.xpose.msra.mxu1 %v772_v48 }
  0xd9   : > { %749 = vmatmul.mubr.f32.vlgmr.msra.gmra.mrb[0].mxu0 %v295_v52  ;;  %755 = vmatmul.mubr.f32.vlgmr.msra.gmra.mrb[0].mxu1 %v299_v53 }
  0xda   : > { %751 = vmatprep.mubr.f32.mxu0 %v296_v55  ;;  %757 = vmatprep.mubr.f32.mxu1 %v300_v56 }
  0xdd   : > { %752 = vmatmul.mubr.f32.gmra.mrb[2].mxu0 %v297_v57  ;;  %758 = vmatmul.mubr.f32.gmra.mrb[2].mxu1 %v301_v58 }
 0x1ac   : > { %v750_v59 = vpop.f32.mrb[0].mxu0  ;;  %v1056_v60 = vpop.f32.mrb[0].mxu1 }
 0x1ad   : > { %v456_v31 = vsub.f32 1.0, %v750_v59  ;;  %v416_v34 = vpop.f32.mrb[1].mxu0  ;;  %v460_v37 = vsub.f32 1.0, %v1056_v60  ;;  %v436_v61 = vpop.f32.mrb[1].mxu1 }
 0x1ae   : > { %v455_v40 = vsub.f32 1.0, %v416_v34  ;;  %v459_v62 = vsub.f32 1.0, %v436_v61 }
 0x1af   : > { %v467_v63 = vsel %vm463_vm0, %v456_v31, inf  ;;  %v479_v2 = vsel %vm463_vm0, %v460_v37, inf }
 0x1b0   : > { %468 = vmin.xlane.f32.xlu1 %v467_v63  ;;  %v464_v43 = vsel %vm463_vm0, %v455_v40, inf  ;;  %v1061_v46 = vpop.f32.mrb[2].mxu0  ;;  %v1063_v0 = vpop.f32.mrb[2].mxu1  ;;  %v476_v10 = vsel %vm463_vm0, %v459_v62, inf }
 0x1b1   : > { %465 = vmin.xlane.f32.xlu0 %v464_v43  ;;  %v458_v1 = vsub.f32 1.0, %v1061_v46  ;;  %v426_v3 = vpop.f32.mrb[3].mxu0  ;;  %v1067_v7 = vpop.f32.mrb[3].mxu1  ;;  %v462_v11 = vsub.f32 1.0, %v1063_v0 }
 0x1b2   : > { %v457_v8 = vsub.f32 1.0, %v426_v3  ;;  %v461_v14 = vsub.f32 1.0, %v1067_v7 }
 0x1b3   : > { %v473_v12 = vsel %vm463_vm0, %v458_v1, inf  ;;  %v485_v17 = vsel %vm463_vm0, %v462_v11, inf }
 0x1b4   : > { %480 = vmin.xlane.f32.xlu1 %v479_v2  ;;  %v470_v15 = vsel %vm463_vm0, %v457_v8, inf  ;;  %v482_v18 = vsel %vm463_vm0, %v461_v14, inf }
 0x1b5   : > { %477 = vmin.xlane.f32.xlu0 %v476_v10 }
 0x1b8   : > { %474 = vmin.xlane.f32.xlu1 %v473_v12 }
 0x1b9   : > { %471 = vmin.xlane.f32.xlu0 %v470_v15 }
 0x1bc   : > { %486 = vmin.xlane.f32.xlu1 %v485_v17 }
 0x1bd   : > { %483 = vmin.xlane.f32.xlu0 %v482_v18 }
 0x23d   : > { %v469_v20 = vpop.xlane.xlu1 %468 }
 0x23e   : > { %v489_v21 = vadd.f32 1e-05, %v469_v20  ;;  %v466_v23 = vpop.xlane.xlu0 %465 }
 0x23f   : > { %v488_v24 = vadd.f32 1e-05, %v466_v23 }
 0x240   : > { %841 = vrcp.f32 %v489_v21 }
 0x241   : > { %843 = vrcp.f32 %v488_v24  ;;  %v481_v25 = vpop.xlane.xlu1 %480 }
 0x242   : > { %v493_v5 = vadd.f32 1e-05, %v481_v25  ;;  %v478_v4 = vpop.xlane.xlu0 %477 }
 0x243   : > { %v492_v6 = vadd.f32 1e-05, %v478_v4 }
 0x244   : > { %845 = vrcp.f32 %v493_v5 }
 0x245   : > { %847 = vrcp.f32 %v492_v6  ;;  %v475_v26 = vpop.xlane.xlu1 %474 }
 0x246   : > { %v491_v9 = vadd.f32 1e-05, %v475_v26  ;;  %v472_v29 = vpop.xlane.xlu0 %471  ;;  %v915_v26 = vmov -inf  }
 0x247   : > { %v490_v30 = vadd.f32 1e-05, %v472_v29  ;;  %610 = vst.msk [vmem:[#allocation2] sm:$0x1] %vm609_vm1, %v915_v26 }
 0x248   : > { %849 = vrcp.f32 %v491_v9 }
 0x249   : > { %851 = vrcp.f32 %v490_v30  ;;  %v487_v32 = vpop.xlane.xlu1 %486 }
 0x24a   : > { %v842_v33 = vpop.eup %841  ;;  %v495_v35 = vadd.f32 1e-05, %v487_v32  ;;  %v484_v36 = vpop.xlane.xlu0 %483 }
 0x24b   : > { %v844_v38 = vpop.eup %843  ;;  %v505_v39 = vmul.f32 %v842_v33, %v456_v31  ;;  %v494_v41 = vadd.f32 1e-05, %v484_v36 }
 0x24c   : > { %v504_v16 = vmul.f32 %v844_v38, %v455_v40  ;;  %853 = vrcp.f32 %v495_v35 }
 0x24d   : > { %v513_v13 = vsub.f32 1.0, %v505_v39  ;;  %855 = vrcp.f32 %v494_v41 }
 0x24e   : > { %v846_v42 = vpop.eup %845  ;;  %v512_v44 = vsub.f32 1.0, %v504_v16 }
 0x24f   : > { %v848_v45 = vpop.eup %847  ;;  %v509_v47 = vmul.f32 %v846_v42, %v460_v37  ;;  %v521_v27 = vmul.f32 2.0, %v513_v13 }
 0x250   : > { %v508_v48 = vmul.f32 %v848_v45, %v459_v62  ;;  %v520_v49 = vmul.f32 2.0, %v512_v44 }
 0x251   : > { %v517_v19 = vsub.f32 1.0, %v509_v47  ;;  %v530_v22 = vmul.f32 1.442695, %v521_v27 }
 0x252   : > { %v850_v28 = vpop.eup %849  ;;  %v516_v50 = vsub.f32 1.0, %v508_v48  ;;  %v528_v51 = vmul.f32 1.442695, %v520_v49 }
 0x253   : > { %v852_v52 = vpop.eup %851  ;;  %v507_v53 = vmul.f32 %v850_v28, %v458_v1  ;;  %857 = vpow2.f32 %v530_v22  ;;  %v525_v54 = vmul.f32 2.0, %v517_v19 }
 0x254   : > { %v506_v55 = vmul.f32 %v852_v52, %v457_v8  ;;  %859 = vpow2.f32 %v528_v51  ;;  %v524_v56 = vmul.f32 2.0, %v516_v50 }
 0x255   : > { %v515_v57 = vsub.f32 1.0, %v507_v53  ;;  %v538_v58 = vmul.f32 1.442695, %v525_v54 }
 0x256   : > { %v854_v59 = vpop.eup %853  ;;  %v514_v60 = vsub.f32 1.0, %v506_v55  ;;  %v536_v31 = vmul.f32 1.442695, %v524_v56 }
 0x257   : > { %v856_v34 = vpop.eup %855  ;;  %v511_v37 = vmul.f32 %v854_v59, %v462_v11  ;;  %861 = vpow2.f32 %v538_v58  ;;  %v523_v61 = vmul.f32 2.0, %v515_v57 }
 0x258   : > { %v510_v40 = vmul.f32 %v856_v34, %v461_v14  ;;  %863 = vpow2.f32 %v536_v31  ;;  %v522_v62 = vmul.f32 2.0, %v514_v60 }
 0x259   : > { %v519_v63 = vsub.f32 1.0, %v511_v37  ;;  %v534_v43 = vmul.f32 1.442695, %v523_v61 }
 0x25a   : > { %v518_v46 = vsub.f32 1.0, %v510_v40  ;;  %v532_v1 = vmul.f32 1.442695, %v522_v62 }
 0x25b   : > { %865 = vpow2.f32 %v534_v43  ;;  %v527_v2 = vmul.f32 2.0, %v519_v63 }
 0x25c   : > { %867 = vpow2.f32 %v532_v1  ;;  %v526_v3 = vmul.f32 2.0, %v518_v46 }
 0x25d   : > { %v858_v8 = vpop.eup %857  ;;  %v542_v10 = vmul.f32 1.442695, %v527_v2 }
 0x25e   : > { %v860_v12 = vpop.eup %859  ;;  %v547_v0 = vsel %vm463_vm0, %v858_v8, 0.0  ;;  %v540_v11 = vmul.f32 1.442695, %v526_v3  ;;  %v611_v3 = vld [vmem:[#allocation2] sm:$0x1] }
 0x25f   : > { %548 = vadd.xlane.f32.xlu1 %v547_v0  ;;  %v544_v7 = vsel %vm463_vm0, %v860_v12, 0.0  ;;  %869 = vpow2.f32 %v542_v10 }
 0x260   : > { %545 = vadd.xlane.f32.xlu0 %v544_v7  ;;  %871 = vpow2.f32 %v540_v11 }
 0x261   : > { %v862_v14 = vpop.eup %861 }
 0x262   : > { %v864_v15 = vpop.eup %863  ;;  %v559_v17 = vsel %vm463_vm0, %v862_v14, 0.0 }
 0x263   : > { %560 = vadd.xlane.f32.xlu1 %v559_v17  ;;  %v556_v18 = vsel %vm463_vm0, %v864_v15, 0.0 }
 0x264   : > { %557 = vadd.xlane.f32.xlu0 %v556_v18 }
 0x265   : > { %v866_v20 = vpop.eup %865 }
 0x266   : > { %v868_v21 = vpop.eup %867  ;;  %v553_v23 = vsel %vm463_vm0, %v866_v20, 0.0 }
 0x267   : > { %554 = vadd.xlane.f32.xlu1 %v553_v23  ;;  %v550_v24 = vsel %vm463_vm0, %v868_v21, 0.0 }
 0x268   : > { %551 = vadd.xlane.f32.xlu0 %v550_v24 }
 0x269   : > { %v870_v25 = vpop.eup %869 }
 0x26a   : > { %v872_v5 = vpop.eup %871  ;;  %v565_v4 = vsel %vm463_vm0, %v870_v25, 0.0 }
 0x26b   : > { %566 = vadd.xlane.f32.xlu1 %v565_v4  ;;  %v562_v6 = vsel %vm463_vm0, %v872_v5, 0.0 }
 0x26c   : > { %563 = vadd.xlane.f32.xlu0 %v562_v6 }
 0x2ec   : > { %v549_v9 = vpop.xlane.xlu1 %548 }
 0x2ed   : > { %v546_v29 = vpop.xlane.xlu0 %545 }
 0x2f0   : > { %v561_v30 = vpop.xlane.xlu1 %560 }
 0x2f1   : > { %873 = vrcp.f32 %v561_v30  ;;  %v558_v32 = vpop.xlane.xlu0 %557 }
 0x2f2   : > { %875 = vrcp.f32 %v558_v32 }
 0x2f3   : > { %877 = vrcp.f32 %v549_v9 }
 0x2f4   : > { %879 = vrcp.f32 %v546_v29  ;;  %v555_v33 = vpop.xlane.xlu1 %554 }
 0x2f5   : > { %881 = vrcp.f32 %v555_v33  ;;  %v552_v35 = vpop.xlane.xlu0 %551 }
 0x2f6   : > { %883 = vrcp.f32 %v552_v35 }
 0x2f8   : > { %v567_v36 = vpop.xlane.xlu1 %566 }
 0x2f9   : > { %885 = vrcp.f32 %v567_v36  ;;  %v564_v38 = vpop.xlane.xlu0 %563 }
 0x2fa   : > { %887 = vrcp.f32 %v564_v38 }
 0x2fb   : > { %v874_v39 = vpop.eup %873 }
 0x2fc   : > { %v876_v41 = vpop.eup %875  ;;  %v581_v44 = vmul.f32 %v874_v39, %v862_v14 }
 0x2fd   : > { %v878_v16 = vpop.eup %877  ;;  %v580_v45 = vmul.f32 %v876_v41, %v864_v15 }
 0x2fe   : > { %v880_v13 = vpop.eup %879  ;;  %v577_v27 = vmul.f32 %v878_v16, %v858_v8  ;;  %v590_v22 = vsel %vm463_vm0, %v581_v44, -inf }
 0x2ff   : > { %v882_v42 = vpop.eup %881  ;;  %v576_v48 = vmul.f32 %v880_v13, %v860_v12  ;;  %v588_v28 = vsel %vm463_vm0, %v580_v45, -inf }
 0x300   : > { %v884_v47 = vpop.eup %883  ;;  %v579_v49 = vmul.f32 %v882_v42, %v866_v20  ;;  %v585_v53 = vsel %vm463_vm0, %v577_v27, -inf }
 0x301   : > { %v578_v50 = vmul.f32 %v884_v47, %v868_v21  ;;  %v584_v54 = vsel %vm463_vm0, %v576_v48, -inf  ;;  %v591_v56 = vmax.f32 %v585_v53, %v590_v22 }
 0x302   : > { %v589_v57 = vmax.f32 %v584_v54, %v588_v28  ;;  %v587_v58 = vsel %vm463_vm0, %v579_v49, -inf }
 0x303   : > { %v886_v19 = vpop.eup %885  ;;  %v586_v60 = vsel %vm463_vm0, %v578_v50, -inf }
 0x304   : > { %v888_v51 = vpop.eup %887  ;;  %v583_v52 = vmul.f32 %v886_v19, %v870_v25  ;;  %v596_v61 = vmax.f32 %v589_v57, %v591_v56 }
 0x305   : > { %v582_v55 = vmul.f32 %v888_v51, %v872_v5 }
 0x306   : > { %v594_v59 = vsel %vm463_vm0, %v583_v52, -inf }
 0x307   : > { %v595_v31 = vmax.f32 %v587_v58, %v594_v59  ;;  %v592_v34 = vsel %vm463_vm0, %v582_v55, -inf }
 0x308   : > { %v593_v37 = vmax.f32 %v586_v60, %v592_v34 }
 0x30a   : > { %v597_v40 = vmax.f32 %v593_v37, %v595_v31 }
 0x30c   : > { %v598_v62 = vmax.f32 %v596_v61, %v597_v40 }
 0x30e   : > { %v599_v63 = vrot.slane %v598_v62, 4 }
 0x310   : > { %v600_v43 = vmax.f32 %v598_v62, %v599_v63 }
 0x312   : > { %v601_v46 = vrot.slane %v600_v43, 2 }
 0x314   : > { %v602_v1 = vmax.f32 %v600_v43, %v601_v46 }
 0x316   : > { %v603_v2 = vrot.slane %v602_v1, 1 }
 0x318   : > { %v604_v8 = vmax.f32 %v602_v1, %v603_v2 }
 0x31a   : > { %v612_v10 = vmax.f32 %v611_v3, %v604_v8 }
 0x31c   : > { %614 = vst.msk [vmem:[#allocation2] sm:$0x1] %vm609_vm1, %v612_v10 }
 0x323   : > { %v618_v12 = vld [vmem:[#allocation2] sm:$0x1] }
 0x324   : > { %v619_v0 = vsel %vm609_vm1, %v618_v12, 0.0 }
 0x325   : > { %620 = vadd.xlane.f32.xlu0 %v619_v0 }
 0x3b2   : > { %v621_v11 = vpop.xlane.xlu0 %620 }
 0x3b3   : > { %v623_v7 = vmul.f32 0.015625, %v621_v11 }
 0x3b5   : > { %v624_v14 = vadd.f32 1e-05, %v623_v7 }
 0x3b7   : > { %889 = vlog2.f32 %v624_v14 }
 0x3c1   : > { %v890_v15 = vpop.eup %889 }
 0x3c2   : > { %v626_v17 = vmul.f32 0.6931472, %v890_v15 }
 0x3c4   : > { %v627_v18 = vsub.f32 0.0, %v626_v17 }
 0x3c6   : > { %628 = vst [vmem:[%s214_s27] sm:$0x1] %v627_v18 }
 0x3c7 PF: > { %s13_s14 = sadd.s32 1, %s913_s14   ;;  %s1120_s12 = smov %s909_s13 }
 0x3c8   : > { %p10_p5 = scmp.ge.s32.totalorder %s13_s14, 4   ;;  %s1121_s13 = smov %s1123_s15 }
 0x3ca   :  { %12 = sbr.rel (!%p10_p5) target bundleno = 2 (0x2), region = 73 }

</bundles_post_ra>
